<compile_context>
chip_gen: v7x
topology: tpu7x:2x2x1
jax: 0.10.0
libtpu: 0.0.40
codegen_flags: <defaults>
</compile_context>

<pallas_src>
import jax
import jax.numpy as jnp
import numpy as np
from jax.experimental import pallas as pl
from jax.experimental.pallas import tpu as pltpu

EPS = 1e-5                       # PyTorch BatchNorm1d default eps
L_IN, LP = 36, 128               # input length, padded lane width
C1, L1, N1, N1P = 4, 34, 136, 256
C2, L2, N2, N2P = 16, 32, 512, 512
C3, L3, N3, N3P = 32, 15, 480, 512
FC_HID, FC_OUT = 128, 3

# packed-weight row offsets (all multiples of 16 -> aligned bf16 sublane slices)
WA_W1, WA_S1T = 0, 128                                       # wa: (256, 256)  bf16
WB_W2, WB_W3, WB_S2T, WB_S3T = 0, 256, 768, 896              # wb: (1024, 512) bf16
WC_WL1, WC_WL2, WC_S1, WC_S2, WC_S3 = 0, 512, 640, 896, 1408  # wc: (1920, 128) bf16
(V_CB1, V_CB2, V_CB3, V_G1, V_BE1, V_G2, V_BE2,
 V_G3, V_BE3, V_BL1, V_BL2) = range(11)                      # vec: (16, 512)  f32


# ------------------------------ Pallas kernel ------------------------------ #

def generator_kernel(x_ref, wa_ref, wb_ref, wc_ref, vec_ref, o_ref):
    """Full Generator forward; every intermediate stays in VMEM/vregs."""
    f32, bf16 = jnp.float32, jnp.bfloat16
    B = x_ref.shape[0]

    def mm(a, w):                       # single-pass bf16 MXU dot, f32 accumulate
        return jnp.dot(a.astype(bf16), w, preferred_element_type=f32)

    def sel_dot(a, s):                  # near-f32 dot against a 0/1 selector (hi/lo split)
        hi = a.astype(bf16)
        lo = (a - hi.astype(f32)).astype(bf16)
        return (jnp.dot(hi, s, preferred_element_type=f32)
                + jnp.dot(lo, s, preferred_element_type=f32))

    def vrow(r, n):                     # (1, n) packed f32 vector row
        return vec_ref[r:r + 1, 0:n]

    def bn_relu(h, s, st, g, be, count):
        # train-mode BatchNorm1d, one pass: per-lane sum & sum-of-squares,
        # per-channel gather via selector matmul, var = E[x^2] - mean^2.
        rows = jnp.concatenate([jnp.sum(h, axis=0, keepdims=True),
                                jnp.sum(h * h, axis=0, keepdims=True)], axis=0)
        stats = sel_dot(rows, s) * (1.0 / count)                   # (2, 128)
        mean = stats[0:1]
        var = stats[1:2] - mean * mean
        scale = g * jax.lax.rsqrt(var + EPS)
        shift = be - mean * scale
        # broadcast per-channel scale/shift back to channel-major lanes
        bcast = sel_dot(jnp.concatenate([scale, shift], axis=0), st)   # (2, Npad)
        return jnp.maximum(h * bcast[0:1] + bcast[1:2], 0.0)

    x = x_ref[...]                                                     # (B, 128)

    # conv1 (1->4, k=3) as one banded matmul; channel-major lanes c*34 + l
    h1 = mm(x, wa_ref[WA_W1:WA_W1 + LP, :]) + vrow(V_CB1, N1P)
    h1 = bn_relu(h1, wc_ref[WC_S1:WC_S1 + N1P, :], wa_ref[WA_S1T:WA_S1T + 128, :],
                 vrow(V_G1, 128), vrow(V_BE1, 128), B * L1)

    # conv2 (4->16, k=3)
    h2 = mm(h1, wb_ref[WB_W2:WB_W2 + N1P, :]) + vrow(V_CB2, N2P)
    h2 = bn_relu(h2, wc_ref[WC_S2:WC_S2 + N2P, :], wb_ref[WB_S2T:WB_S2T + 128, :],
                 vrow(V_G2, 128), vrow(V_BE2, 128), B * L2)

    # conv3 (16->32, k=4, stride 2); output lanes c*15 + l == PyTorch view(-1,480) order
    h3 = mm(h2, wb_ref[WB_W3:WB_W3 + N2P, :]) + vrow(V_CB3, N3P)
    h3 = bn_relu(h3, wc_ref[WC_S3:WC_S3 + N3P, :], wb_ref[WB_S3T:WB_S3T + 128, :],
                 vrow(V_G3, 128), vrow(V_BE3, 128), B * L3)

    # lin1 (480->128): single K=512 dot, no per-position accumulation loop
    fc = jnp.maximum(mm(h3, wc_ref[WC_WL1:WC_WL1 + N3P, :]) + vrow(V_BL1, FC_HID), 0.0)

    # lin2 (128->3) against the zero-padded 128-wide block -> lane-dense (B,128) store
    o_ref[...] = mm(fc, wc_ref[WC_WL2:WC_WL2 + FC_HID, :]) + vrow(V_BL2, FC_HID)


# --------------------------- host-side preparation -------------------------- #

def prepare_params(p):
    """One-time packing of all weights into lane-dense banded matrices (bf16) + f32 table."""
    f32 = np.float32
    w1 = np.asarray(p['w1'], f32)     # (4, 1, 3)
    w2 = np.asarray(p['w2'], f32)     # (16, 4, 3)
    w3 = np.asarray(p['w3'], f32)     # (32, 16, 4)
    wl1 = np.asarray(p['wl1'], f32)   # (128, 480)
    wl2 = np.asarray(p['wl2'], f32)   # (3, 128)

    # conv layers as banded matmuls, channel-major lane order (feature = c*L + l)
    W1 = np.zeros((LP, N1P), f32)
    W2 = np.zeros((N1P, N2P), f32)
    W3 = np.zeros((N2P, N3P), f32)
    l1, l2, l3 = np.arange(L1), np.arange(L2), np.arange(L3)
    for co in range(C1):
        for t in range(3):
            W1[l1 + t, co * L1 + l1] = w1[co, 0, t]
    for co in range(C2):
        for ci in range(C1):
            for t in range(3):
                W2[ci * L1 + l2 + t, co * L2 + l2] = w2[co, ci, t]
    for co in range(C3):
        for ci in range(C2):
            for t in range(4):
                W3[ci * L2 + 2 * l3 + t, co * L3 + l3] = w3[co, ci, t]

    # 0/1 selectors: S gathers per-channel sums; S^T broadcasts per-channel scale/shift
    def selector(C, L, NP):
        S = np.zeros((NP, 128), f32)
        for c in range(C):
            S[c * L:(c + 1) * L, c] = 1.0
        return S
    S1, S2, S3 = selector(C1, L1, N1P), selector(C2, L2, N2P), selector(C3, L3, N3P)

    # linear layers (h3 lane order == PyTorch flatten order, so no column permutation)
    WL1 = np.zeros((N3P, 128), f32); WL1[:N3, :] = wl1.T
    WL2 = np.zeros((FC_HID, 128), f32); WL2[:, :FC_OUT] = wl2.T

    wa = np.zeros((256, 256), f32)
    wa[WA_W1:WA_W1 + LP] = W1
    wa[WA_S1T:WA_S1T + 128] = S1.T
    wb = np.zeros((1024, 512), f32)
    wb[WB_W2:WB_W2 + N1P] = W2
    wb[WB_W3:WB_W3 + N2P] = W3
    wb[WB_S2T:WB_S2T + 128] = S2.T
    wb[WB_S3T:WB_S3T + 128] = S3.T
    wc = np.zeros((1920, 128), f32)
    wc[WC_WL1:WC_WL1 + N3P] = WL1
    wc[WC_WL2:WC_WL2 + FC_HID] = WL2
    wc[WC_S1:WC_S1 + N1P] = S1
    wc[WC_S2:WC_S2 + N2P] = S2
    wc[WC_S3:WC_S3 + N3P] = S3

    vec = np.zeros((16, 512), f32)
    vec[V_CB1, :N1] = np.repeat(np.asarray(p['b1'], f32), L1)   # conv biases pre-broadcast
    vec[V_CB2, :N2] = np.repeat(np.asarray(p['b2'], f32), L2)
    vec[V_CB3, :N3] = np.repeat(np.asarray(p['b3'], f32), L3)
    vec[V_G1, :C1] = np.asarray(p['g1'], f32)
    vec[V_BE1, :C1] = np.asarray(p['be1'], f32)
    vec[V_G2, :C2] = np.asarray(p['g2'], f32)
    vec[V_BE2, :C2] = np.asarray(p['be2'], f32)
    vec[V_G3, :C3] = np.asarray(p['g3'], f32)
    vec[V_BE3, :C3] = np.asarray(p['be3'], f32)
    vec[V_BL1, :FC_HID] = np.asarray(p['bl1'], f32)
    vec[V_BL2, :FC_OUT] = np.asarray(p['bl2'], f32)

    return dict(wa=jnp.asarray(wa, jnp.bfloat16), wb=jnp.asarray(wb, jnp.bfloat16),
                wc=jnp.asarray(wc, jnp.bfloat16), vec=jnp.asarray(vec, jnp.float32))


@jax.jit
def generator_forward(x, prepped):
    """x: (B, 1, 36) float32, NCL like PyTorch.  Returns (B, 3)."""
    B = x.shape[0]
    xp = jnp.zeros((B, LP), jnp.float32)
    xp = xp.at[:, :L_IN].set(x.reshape(B, L_IN).astype(jnp.float32))   # lane-dense input

    out = pl.pallas_call(
        generator_kernel,
        out_shape=jax.ShapeDtypeStruct((B, FC_HID), jnp.float32),      # lane-dense output
        in_specs=[pl.BlockSpec(memory_space=pltpu.MemorySpace.VMEM)] * 5,
        out_specs=pl.BlockSpec(memory_space=pltpu.MemorySpace.VMEM),
    )(xp, prepped['wa'], prepped['wb'], prepped['wc'], prepped['vec'])
    return out[:, :FC_OUT]


# ----------------------- pure-JAX reference (check) ------------------------- #

def reference_forward(x, p):
    HI = jax.lax.Precision.HIGHEST

    def conv1d(h, w, b, stride):
        y = jax.lax.conv_general_dilated(h, w, (stride,), 'VALID',
                                         dimension_numbers=('NCH', 'OIH', 'NCH'),
                                         precision=HI)
        return y + b[None, :, None]

    def bn(h, g, be):
        m = jnp.mean(h, axis=(0, 2), keepdims=True)
        v = jnp.mean((h - m) ** 2, axis=(0, 2), keepdims=True)
        return (h - m) / jnp.sqrt(v + EPS) * g[None, :, None] + be[None, :, None]

    h = jax.nn.relu(bn(conv1d(x, p['w1'], p['b1'], 1), p['g1'], p['be1']))
    h = jax.nn.relu(bn(conv1d(h, p['w2'], p['b2'], 1), p['g2'], p['be2']))
    h = jax.nn.relu(bn(conv1d(h, p['w3'], p['b3'], 2), p['g3'], p['be3']))
    h = h.reshape(-1, 480)
    h = jax.nn.relu(jnp.dot(h, p['wl1'].T, precision=HI) + p['bl1'])
    return jnp.dot(h, p['wl2'].T, precision=HI) + p['bl2']


# --------------------------------- main -------------------------------------- #

def init_params(key):
    ks = jax.random.split(key, 16)
    nrm = lambda k, shape, s=0.1: s * jax.random.normal(k, shape, jnp.float32)
    return dict(
        w1=nrm(ks[0], (4, 1, 3)),    b1=nrm(ks[1], (4,)),
        w2=nrm(ks[2], (16, 4, 3)),   b2=nrm(ks[3], (16,)),
        w3=nrm(ks[4], (32, 16, 4)),  b3=nrm(ks[5], (32,)),
        wl1=nrm(ks[6], (128, 480)),  bl1=nrm(ks[7], (128,)),
        wl2=nrm(ks[8], (3, 128)),    bl2=nrm(ks[9], (3,)),
        g1=1.0 + nrm(ks[10], (4,)),  be1=nrm(ks[11], (4,)),
        g2=1.0 + nrm(ks[12], (16,)), be2=nrm(ks[13], (16,)),
        g3=1.0 + nrm(ks[14], (32,)), be3=nrm(ks[15], (32,)),
    )


if __name__ == "__main__":
    key = jax.random.PRNGKey(0)
    pkey, xkey = jax.random.split(key)
    params = init_params(pkey)
    prepped = prepare_params(params)          # one-time weight packing (hoisted)

    B = 2
    x = jax.random.normal(xkey, (B, 1, L_IN), jnp.float32)   # NCL, like PyTorch

    out = generator_forward(x, prepped)
    out = jax.block_until_ready(out)

    ref = reference_forward(x, params)
    # tolerance reflects default (single bf16 MXU pass) matmul precision in the kernel
    np.testing.assert_allclose(np.asarray(out), np.asarray(ref), rtol=5e-2, atol=5e-2)
    assert out.shape == (B, FC_OUT)
    print("KERNEL_OK")
</pallas_src>

<mosaic_0001>
module attributes {stable_mosaic.version = 11 : i64} {
  func.func @generator_kernel(%arg0: memref<2x128xf32, #tpu.memory_space<vmem>>, %arg1: memref<256x256xbf16, #tpu.memory_space<vmem>>, %arg2: memref<1024x512xbf16, #tpu.memory_space<vmem>>, %arg3: memref<1920x128xbf16, #tpu.memory_space<vmem>>, %arg4: memref<16x512xf32, #tpu.memory_space<vmem>>, %arg5: memref<2x128xf32, #tpu.memory_space<vmem>>) attributes {dimension_semantics = [], scalar_prefetch = 0 : i64, scratch_operands = 0 : i64, tpu.core_type = #tpu.core_type<tc>} {
    %c0 = arith.constant 0 : index
    %c0_0 = arith.constant 0 : index
    %0 = vector.load %arg0[%c0, %c0_0] : memref<2x128xf32, #tpu.memory_space<vmem>>, vector<2x128xf32>
    %c0_1 = arith.constant 0 : index
    %c0_2 = arith.constant 0 : index
    %1 = vector.load %arg1[%c0_1, %c0_2] : memref<256x256xbf16, #tpu.memory_space<vmem>>, vector<128x256xbf16>
    %2 = arith.truncf %0 : vector<2x128xf32> to vector<2x128xbf16>
    %cst = arith.constant dense<0.000000e+00> : vector<2x256xf32>
    %3 = tpu.matmul %2, %1, %cst {dimension_numbers = #tpu.dot_dimension_numbers<[1], [0], [0], [1], [0, 0, 1, 1], [], []>} : vector<2x128xbf16>, vector<128x256xbf16>, vector<2x256xf32> -> vector<2x256xf32>
    %c0_3 = arith.constant 0 : index
    %c0_4 = arith.constant 0 : index
    %4 = vector.load %arg4[%c0_3, %c0_4] : memref<16x512xf32, #tpu.memory_space<vmem>>, vector<1x256xf32>
    %5 = vector.broadcast %4 : vector<1x256xf32> to vector<2x256xf32>
    %6 = arith.addf %3, %5 : vector<2x256xf32>
    %c640 = arith.constant 640 : index
    %c0_5 = arith.constant 0 : index
    %7 = vector.load %arg3[%c640, %c0_5] : memref<1920x128xbf16, #tpu.memory_space<vmem>>, vector<256x128xbf16>
    %c128 = arith.constant 128 : index
    %c0_6 = arith.constant 0 : index
    %8 = vector.load %arg1[%c128, %c0_6] : memref<256x256xbf16, #tpu.memory_space<vmem>>, vector<128x256xbf16>
    %c3 = arith.constant 3 : index
    %c0_7 = arith.constant 0 : index
    %9 = vector.load %arg4[%c3, %c0_7] : memref<16x512xf32, #tpu.memory_space<vmem>>, vector<1x128xf32>
    %c4 = arith.constant 4 : index
    %c0_8 = arith.constant 0 : index
    %10 = vector.load %arg4[%c4, %c0_8] : memref<16x512xf32, #tpu.memory_space<vmem>>, vector<1x128xf32>
    %cst_9 = arith.constant dense<0.000000e+00> : vector<256xf32>
    %11 = vector.multi_reduction <add>, %6, %cst_9 [0] : vector<2x256xf32> to vector<256xf32>
    %12 = vector.shape_cast %11 : vector<256xf32> to vector<1x256xf32>
    %13 = arith.mulf %6, %6 : vector<2x256xf32>
    %cst_10 = arith.constant dense<0.000000e+00> : vector<256xf32>
    %14 = vector.multi_reduction <add>, %13, %cst_10 [0] : vector<2x256xf32> to vector<256xf32>
    %15 = vector.shape_cast %14 : vector<256xf32> to vector<1x256xf32>
    %16 = tpu.concatenate %12, %15 in 0 : vector<1x256xf32>, vector<1x256xf32> -> vector<2x256xf32>
    %17 = arith.truncf %16 : vector<2x256xf32> to vector<2x256xbf16>
    %18 = arith.extf %17 : vector<2x256xbf16> to vector<2x256xf32>
    %19 = arith.subf %16, %18 : vector<2x256xf32>
    %20 = arith.truncf %19 : vector<2x256xf32> to vector<2x256xbf16>
    %cst_11 = arith.constant dense<0.000000e+00> : vector<2x128xf32>
    %21 = tpu.matmul %17, %7, %cst_11 {dimension_numbers = #tpu.dot_dimension_numbers<[1], [0], [0], [1], [0, 0, 1, 1], [], []>} : vector<2x256xbf16>, vector<256x128xbf16>, vector<2x128xf32> -> vector<2x128xf32>
    %cst_12 = arith.constant dense<0.000000e+00> : vector<2x128xf32>
    %22 = tpu.matmul %20, %7, %cst_12 {dimension_numbers = #tpu.dot_dimension_numbers<[1], [0], [0], [1], [0, 0, 1, 1], [], []>} : vector<2x256xbf16>, vector<256x128xbf16>, vector<2x128xf32> -> vector<2x128xf32>
    %23 = arith.addf %21, %22 : vector<2x128xf32>
    %cst_13 = arith.constant 0.0147058824 : f32
    %24 = vector.broadcast %cst_13 : f32 to vector<2x128xf32>
    %25 = arith.mulf %23, %24 : vector<2x128xf32>
    %26 = vector.extract_strided_slice %25 {offsets = [0, 0], sizes = [1, 128], strides = [1, 1]} : vector<2x128xf32> to vector<1x128xf32>
    %27 = vector.extract_strided_slice %25 {offsets = [1, 0], sizes = [1, 128], strides = [1, 1]} : vector<2x128xf32> to vector<1x128xf32>
    %28 = arith.mulf %26, %26 : vector<1x128xf32>
    %29 = arith.subf %27, %28 : vector<1x128xf32>
    %cst_14 = arith.constant 9.99999974E-6 : f32
    %30 = vector.broadcast %cst_14 : f32 to vector<1x128xf32>
    %31 = arith.addf %29, %30 : vector<1x128xf32>
    %32 = math.rsqrt %31 : vector<1x128xf32>
    %33 = arith.mulf %9, %32 : vector<1x128xf32>
    %34 = arith.mulf %26, %33 : vector<1x128xf32>
    %35 = arith.subf %10, %34 : vector<1x128xf32>
    %36 = tpu.concatenate %33, %35 in 0 : vector<1x128xf32>, vector<1x128xf32> -> vector<2x128xf32>
    %37 = arith.truncf %36 : vector<2x128xf32> to vector<2x128xbf16>
    %38 = arith.extf %37 : vector<2x128xbf16> to vector<2x128xf32>
    %39 = arith.subf %36, %38 : vector<2x128xf32>
    %40 = arith.truncf %39 : vector<2x128xf32> to vector<2x128xbf16>
    %cst_15 = arith.constant dense<0.000000e+00> : vector<2x256xf32>
    %41 = tpu.matmul %37, %8, %cst_15 {dimension_numbers = #tpu.dot_dimension_numbers<[1], [0], [0], [1], [0, 0, 1, 1], [], []>} : vector<2x128xbf16>, vector<128x256xbf16>, vector<2x256xf32> -> vector<2x256xf32>
    %cst_16 = arith.constant dense<0.000000e+00> : vector<2x256xf32>
    %42 = tpu.matmul %40, %8, %cst_16 {dimension_numbers = #tpu.dot_dimension_numbers<[1], [0], [0], [1], [0, 0, 1, 1], [], []>} : vector<2x128xbf16>, vector<128x256xbf16>, vector<2x256xf32> -> vector<2x256xf32>
    %43 = arith.addf %41, %42 : vector<2x256xf32>
    %44 = vector.extract_strided_slice %43 {offsets = [0, 0], sizes = [1, 256], strides = [1, 1]} : vector<2x256xf32> to vector<1x256xf32>
    %45 = vector.broadcast %44 : vector<1x256xf32> to vector<2x256xf32>
    %46 = arith.mulf %6, %45 : vector<2x256xf32>
    %47 = vector.extract_strided_slice %43 {offsets = [1, 0], sizes = [1, 256], strides = [1, 1]} : vector<2x256xf32> to vector<1x256xf32>
    %48 = vector.broadcast %47 : vector<1x256xf32> to vector<2x256xf32>
    %49 = arith.addf %46, %48 : vector<2x256xf32>
    %cst_17 = arith.constant 0.000000e+00 : f32
    %50 = vector.broadcast %cst_17 : f32 to vector<2x256xf32>
    %51 = arith.maximumf %49, %50 : vector<2x256xf32>
    %c0_18 = arith.constant 0 : index
    %c0_19 = arith.constant 0 : index
    %52 = vector.load %arg2[%c0_18, %c0_19] : memref<1024x512xbf16, #tpu.memory_space<vmem>>, vector<256x512xbf16>
    %53 = arith.truncf %51 : vector<2x256xf32> to vector<2x256xbf16>
    %cst_20 = arith.constant dense<0.000000e+00> : vector<2x512xf32>
    %54 = tpu.matmul %53, %52, %cst_20 {dimension_numbers = #tpu.dot_dimension_numbers<[1], [0], [0], [1], [0, 0, 1, 1], [], []>} : vector<2x256xbf16>, vector<256x512xbf16>, vector<2x512xf32> -> vector<2x512xf32>
    %c1 = arith.constant 1 : index
    %c0_21 = arith.constant 0 : index
    %55 = vector.load %arg4[%c1, %c0_21] : memref<16x512xf32, #tpu.memory_space<vmem>>, vector<1x512xf32>
    %56 = vector.broadcast %55 : vector<1x512xf32> to vector<2x512xf32>
    %57 = arith.addf %54, %56 : vector<2x512xf32>
    %c896 = arith.constant 896 : index
    %c0_22 = arith.constant 0 : index
    %58 = vector.load %arg3[%c896, %c0_22] : memref<1920x128xbf16, #tpu.memory_space<vmem>>, vector<512x128xbf16>
    %c768 = arith.constant 768 : index
    %c0_23 = arith.constant 0 : index
    %59 = vector.load %arg2[%c768, %c0_23] : memref<1024x512xbf16, #tpu.memory_space<vmem>>, vector<128x512xbf16>
    %c5 = arith.constant 5 : index
    %c0_24 = arith.constant 0 : index
    %60 = vector.load %arg4[%c5, %c0_24] : memref<16x512xf32, #tpu.memory_space<vmem>>, vector<1x128xf32>
    %c6 = arith.constant 6 : index
    %c0_25 = arith.constant 0 : index
    %61 = vector.load %arg4[%c6, %c0_25] : memref<16x512xf32, #tpu.memory_space<vmem>>, vector<1x128xf32>
    %cst_26 = arith.constant dense<0.000000e+00> : vector<512xf32>
    %62 = vector.multi_reduction <add>, %57, %cst_26 [0] : vector<2x512xf32> to vector<512xf32>
    %63 = vector.shape_cast %62 : vector<512xf32> to vector<1x512xf32>
    %64 = arith.mulf %57, %57 : vector<2x512xf32>
    %cst_27 = arith.constant dense<0.000000e+00> : vector<512xf32>
    %65 = vector.multi_reduction <add>, %64, %cst_27 [0] : vector<2x512xf32> to vector<512xf32>
    %66 = vector.shape_cast %65 : vector<512xf32> to vector<1x512xf32>
    %67 = tpu.concatenate %63, %66 in 0 : vector<1x512xf32>, vector<1x512xf32> -> vector<2x512xf32>
    %68 = arith.truncf %67 : vector<2x512xf32> to vector<2x512xbf16>
    %69 = arith.extf %68 : vector<2x512xbf16> to vector<2x512xf32>
    %70 = arith.subf %67, %69 : vector<2x512xf32>
    %71 = arith.truncf %70 : vector<2x512xf32> to vector<2x512xbf16>
    %cst_28 = arith.constant dense<0.000000e+00> : vector<2x128xf32>
    %72 = tpu.matmul %68, %58, %cst_28 {dimension_numbers = #tpu.dot_dimension_numbers<[1], [0], [0], [1], [0, 0, 1, 1], [], []>} : vector<2x512xbf16>, vector<512x128xbf16>, vector<2x128xf32> -> vector<2x128xf32>
    %cst_29 = arith.constant dense<0.000000e+00> : vector<2x128xf32>
    %73 = tpu.matmul %71, %58, %cst_29 {dimension_numbers = #tpu.dot_dimension_numbers<[1], [0], [0], [1], [0, 0, 1, 1], [], []>} : vector<2x512xbf16>, vector<512x128xbf16>, vector<2x128xf32> -> vector<2x128xf32>
    %74 = arith.addf %72, %73 : vector<2x128xf32>
    %cst_30 = arith.constant 1.562500e-02 : f32
    %75 = vector.broadcast %cst_30 : f32 to vector<2x128xf32>
    %76 = arith.mulf %74, %75 : vector<2x128xf32>
    %77 = vector.extract_strided_slice %76 {offsets = [0, 0], sizes = [1, 128], strides = [1, 1]} : vector<2x128xf32> to vector<1x128xf32>
    %78 = vector.extract_strided_slice %76 {offsets = [1, 0], sizes = [1, 128], strides = [1, 1]} : vector<2x128xf32> to vector<1x128xf32>
    %79 = arith.mulf %77, %77 : vector<1x128xf32>
    %80 = arith.subf %78, %79 : vector<1x128xf32>
    %cst_31 = arith.constant 9.99999974E-6 : f32
    %81 = vector.broadcast %cst_31 : f32 to vector<1x128xf32>
    %82 = arith.addf %80, %81 : vector<1x128xf32>
    %83 = math.rsqrt %82 : vector<1x128xf32>
    %84 = arith.mulf %60, %83 : vector<1x128xf32>
    %85 = arith.mulf %77, %84 : vector<1x128xf32>
    %86 = arith.subf %61, %85 : vector<1x128xf32>
    %87 = tpu.concatenate %84, %86 in 0 : vector<1x128xf32>, vector<1x128xf32> -> vector<2x128xf32>
    %88 = arith.truncf %87 : vector<2x128xf32> to vector<2x128xbf16>
    %89 = arith.extf %88 : vector<2x128xbf16> to vector<2x128xf32>
    %90 = arith.subf %87, %89 : vector<2x128xf32>
    %91 = arith.truncf %90 : vector<2x128xf32> to vector<2x128xbf16>
    %cst_32 = arith.constant dense<0.000000e+00> : vector<2x512xf32>
    %92 = tpu.matmul %88, %59, %cst_32 {dimension_numbers = #tpu.dot_dimension_numbers<[1], [0], [0], [1], [0, 0, 1, 1], [], []>} : vector<2x128xbf16>, vector<128x512xbf16>, vector<2x512xf32> -> vector<2x512xf32>
    %cst_33 = arith.constant dense<0.000000e+00> : vector<2x512xf32>
    %93 = tpu.matmul %91, %59, %cst_33 {dimension_numbers = #tpu.dot_dimension_numbers<[1], [0], [0], [1], [0, 0, 1, 1], [], []>} : vector<2x128xbf16>, vector<128x512xbf16>, vector<2x512xf32> -> vector<2x512xf32>
    %94 = arith.addf %92, %93 : vector<2x512xf32>
    %95 = vector.extract_strided_slice %94 {offsets = [0, 0], sizes = [1, 512], strides = [1, 1]} : vector<2x512xf32> to vector<1x512xf32>
    %96 = vector.broadcast %95 : vector<1x512xf32> to vector<2x512xf32>
    %97 = arith.mulf %57, %96 : vector<2x512xf32>
    %98 = vector.extract_strided_slice %94 {offsets = [1, 0], sizes = [1, 512], strides = [1, 1]} : vector<2x512xf32> to vector<1x512xf32>
    %99 = vector.broadcast %98 : vector<1x512xf32> to vector<2x512xf32>
    %100 = arith.addf %97, %99 : vector<2x512xf32>
    %cst_34 = arith.constant 0.000000e+00 : f32
    %101 = vector.broadcast %cst_34 : f32 to vector<2x512xf32>
    %102 = arith.maximumf %100, %101 : vector<2x512xf32>
    %c256 = arith.constant 256 : index
    %c0_35 = arith.constant 0 : index
    %103 = vector.load %arg2[%c256, %c0_35] : memref<1024x512xbf16, #tpu.memory_space<vmem>>, vector<512x512xbf16>
    %104 = arith.truncf %102 : vector<2x512xf32> to vector<2x512xbf16>
    %cst_36 = arith.constant dense<0.000000e+00> : vector<2x512xf32>
    %105 = tpu.matmul %104, %103, %cst_36 {dimension_numbers = #tpu.dot_dimension_numbers<[1], [0], [0], [1], [0, 0, 1, 1], [], []>} : vector<2x512xbf16>, vector<512x512xbf16>, vector<2x512xf32> -> vector<2x512xf32>
    %c2 = arith.constant 2 : index
    %c0_37 = arith.constant 0 : index
    %106 = vector.load %arg4[%c2, %c0_37] : memref<16x512xf32, #tpu.memory_space<vmem>>, vector<1x512xf32>
    %107 = vector.broadcast %106 : vector<1x512xf32> to vector<2x512xf32>
    %108 = arith.addf %105, %107 : vector<2x512xf32>
    %c1408 = arith.constant 1408 : index
    %c0_38 = arith.constant 0 : index
    %109 = vector.load %arg3[%c1408, %c0_38] : memref<1920x128xbf16, #tpu.memory_space<vmem>>, vector<512x128xbf16>
    %c896_39 = arith.constant 896 : index
    %c0_40 = arith.constant 0 : index
    %110 = vector.load %arg2[%c896_39, %c0_40] : memref<1024x512xbf16, #tpu.memory_space<vmem>>, vector<128x512xbf16>
    %c7 = arith.constant 7 : index
    %c0_41 = arith.constant 0 : index
    %111 = vector.load %arg4[%c7, %c0_41] : memref<16x512xf32, #tpu.memory_space<vmem>>, vector<1x128xf32>
    %c8 = arith.constant 8 : index
    %c0_42 = arith.constant 0 : index
    %112 = vector.load %arg4[%c8, %c0_42] : memref<16x512xf32, #tpu.memory_space<vmem>>, vector<1x128xf32>
    %cst_43 = arith.constant dense<0.000000e+00> : vector<512xf32>
    %113 = vector.multi_reduction <add>, %108, %cst_43 [0] : vector<2x512xf32> to vector<512xf32>
    %114 = vector.shape_cast %113 : vector<512xf32> to vector<1x512xf32>
    %115 = arith.mulf %108, %108 : vector<2x512xf32>
    %cst_44 = arith.constant dense<0.000000e+00> : vector<512xf32>
    %116 = vector.multi_reduction <add>, %115, %cst_44 [0] : vector<2x512xf32> to vector<512xf32>
    %117 = vector.shape_cast %116 : vector<512xf32> to vector<1x512xf32>
    %118 = tpu.concatenate %114, %117 in 0 : vector<1x512xf32>, vector<1x512xf32> -> vector<2x512xf32>
    %119 = arith.truncf %118 : vector<2x512xf32> to vector<2x512xbf16>
    %120 = arith.extf %119 : vector<2x512xbf16> to vector<2x512xf32>
    %121 = arith.subf %118, %120 : vector<2x512xf32>
    %122 = arith.truncf %121 : vector<2x512xf32> to vector<2x512xbf16>
    %cst_45 = arith.constant dense<0.000000e+00> : vector<2x128xf32>
    %123 = tpu.matmul %119, %109, %cst_45 {dimension_numbers = #tpu.dot_dimension_numbers<[1], [0], [0], [1], [0, 0, 1, 1], [], []>} : vector<2x512xbf16>, vector<512x128xbf16>, vector<2x128xf32> -> vector<2x128xf32>
    %cst_46 = arith.constant dense<0.000000e+00> : vector<2x128xf32>
    %124 = tpu.matmul %122, %109, %cst_46 {dimension_numbers = #tpu.dot_dimension_numbers<[1], [0], [0], [1], [0, 0, 1, 1], [], []>} : vector<2x512xbf16>, vector<512x128xbf16>, vector<2x128xf32> -> vector<2x128xf32>
    %125 = arith.addf %123, %124 : vector<2x128xf32>
    %cst_47 = arith.constant 0.0333333351 : f32
    %126 = vector.broadcast %cst_47 : f32 to vector<2x128xf32>
    %127 = arith.mulf %125, %126 : vector<2x128xf32>
    %128 = vector.extract_strided_slice %127 {offsets = [0, 0], sizes = [1, 128], strides = [1, 1]} : vector<2x128xf32> to vector<1x128xf32>
    %129 = vector.extract_strided_slice %127 {offsets = [1, 0], sizes = [1, 128], strides = [1, 1]} : vector<2x128xf32> to vector<1x128xf32>
    %130 = arith.mulf %128, %128 : vector<1x128xf32>
    %131 = arith.subf %129, %130 : vector<1x128xf32>
    %cst_48 = arith.constant 9.99999974E-6 : f32
    %132 = vector.broadcast %cst_48 : f32 to vector<1x128xf32>
    %133 = arith.addf %131, %132 : vector<1x128xf32>
    %134 = math.rsqrt %133 : vector<1x128xf32>
    %135 = arith.mulf %111, %134 : vector<1x128xf32>
    %136 = arith.mulf %128, %135 : vector<1x128xf32>
    %137 = arith.subf %112, %136 : vector<1x128xf32>
    %138 = tpu.concatenate %135, %137 in 0 : vector<1x128xf32>, vector<1x128xf32> -> vector<2x128xf32>
    %139 = arith.truncf %138 : vector<2x128xf32> to vector<2x128xbf16>
    %140 = arith.extf %139 : vector<2x128xbf16> to vector<2x128xf32>
    %141 = arith.subf %138, %140 : vector<2x128xf32>
    %142 = arith.truncf %141 : vector<2x128xf32> to vector<2x128xbf16>
    %cst_49 = arith.constant dense<0.000000e+00> : vector<2x512xf32>
    %143 = tpu.matmul %139, %110, %cst_49 {dimension_numbers = #tpu.dot_dimension_numbers<[1], [0], [0], [1], [0, 0, 1, 1], [], []>} : vector<2x128xbf16>, vector<128x512xbf16>, vector<2x512xf32> -> vector<2x512xf32>
    %cst_50 = arith.constant dense<0.000000e+00> : vector<2x512xf32>
    %144 = tpu.matmul %142, %110, %cst_50 {dimension_numbers = #tpu.dot_dimension_numbers<[1], [0], [0], [1], [0, 0, 1, 1], [], []>} : vector<2x128xbf16>, vector<128x512xbf16>, vector<2x512xf32> -> vector<2x512xf32>
    %145 = arith.addf %143, %144 : vector<2x512xf32>
    %146 = vector.extract_strided_slice %145 {offsets = [0, 0], sizes = [1, 512], strides = [1, 1]} : vector<2x512xf32> to vector<1x512xf32>
    %147 = vector.broadcast %146 : vector<1x512xf32> to vector<2x512xf32>
    %148 = arith.mulf %108, %147 : vector<2x512xf32>
    %149 = vector.extract_strided_slice %145 {offsets = [1, 0], sizes = [1, 512], strides = [1, 1]} : vector<2x512xf32> to vector<1x512xf32>
    %150 = vector.broadcast %149 : vector<1x512xf32> to vector<2x512xf32>
    %151 = arith.addf %148, %150 : vector<2x512xf32>
    %cst_51 = arith.constant 0.000000e+00 : f32
    %152 = vector.broadcast %cst_51 : f32 to vector<2x512xf32>
    %153 = arith.maximumf %151, %152 : vector<2x512xf32>
    %c0_52 = arith.constant 0 : index
    %c0_53 = arith.constant 0 : index
    %154 = vector.load %arg3[%c0_52, %c0_53] : memref<1920x128xbf16, #tpu.memory_space<vmem>>, vector<512x128xbf16>
    %155 = arith.truncf %153 : vector<2x512xf32> to vector<2x512xbf16>
    %cst_54 = arith.constant dense<0.000000e+00> : vector<2x128xf32>
    %156 = tpu.matmul %155, %154, %cst_54 {dimension_numbers = #tpu.dot_dimension_numbers<[1], [0], [0], [1], [0, 0, 1, 1], [], []>} : vector<2x512xbf16>, vector<512x128xbf16>, vector<2x128xf32> -> vector<2x128xf32>
    %c9 = arith.constant 9 : index
    %c0_55 = arith.constant 0 : index
    %157 = vector.load %arg4[%c9, %c0_55] : memref<16x512xf32, #tpu.memory_space<vmem>>, vector<1x128xf32>
    %158 = vector.broadcast %157 : vector<1x128xf32> to vector<2x128xf32>
    %159 = arith.addf %156, %158 : vector<2x128xf32>
    %cst_56 = arith.constant 0.000000e+00 : f32
    %160 = vector.broadcast %cst_56 : f32 to vector<2x128xf32>
    %161 = arith.maximumf %159, %160 : vector<2x128xf32>
    %c512 = arith.constant 512 : index
    %c0_57 = arith.constant 0 : index
    %162 = vector.load %arg3[%c512, %c0_57] : memref<1920x128xbf16, #tpu.memory_space<vmem>>, vector<128x128xbf16>
    %163 = arith.truncf %161 : vector<2x128xf32> to vector<2x128xbf16>
    %cst_58 = arith.constant dense<0.000000e+00> : vector<2x128xf32>
    %164 = tpu.matmul %163, %162, %cst_58 {dimension_numbers = #tpu.dot_dimension_numbers<[1], [0], [0], [1], [0, 0, 1, 1], [], []>} : vector<2x128xbf16>, vector<128x128xbf16>, vector<2x128xf32> -> vector<2x128xf32>
    %c10 = arith.constant 10 : index
    %c0_59 = arith.constant 0 : index
    %165 = vector.load %arg4[%c10, %c0_59] : memref<16x512xf32, #tpu.memory_space<vmem>>, vector<1x128xf32>
    %166 = vector.broadcast %165 : vector<1x128xf32> to vector<2x128xf32>
    %167 = arith.addf %164, %166 : vector<2x128xf32>
    %c0_60 = arith.constant 0 : index
    %c0_61 = arith.constant 0 : index
    %168 = vector.load %arg5[%c0_60, %c0_61] : memref<2x128xf32, #tpu.memory_space<vmem>>, vector<2x128xf32>
    tpu.vector_store %arg5[%c0_60, %c0_61], %167 {strides = array<i32>} : memref<2x128xf32, #tpu.memory_space<vmem>>, vector<2x128xf32>,
    return
  }
}

</mosaic_0001>

<bundles_post_ra>
// kernel: generator_forward.1
= control target key start
LH: loop header
LB: loop body
LE: loop exit
PB: predicated region body
PF: predicated region fallthrough
CT: control target
= control target key end

     0   :  { %10 = vsyncpa [#allocation3], 0  ;;  %s6592_s0 = inlined_call_operand.vmem [shape: f32[2,128], index: 0, kind: input, shape index: {}]   ;;  %s6593_s1 = inlined_call_operand.hbm [shape: bf16[256,256], index: 1, kind: input, shape index: {}]   ;;  %s6594_s2 = inlined_call_operand.hbm [shape: bf16[1024,512], index: 2, kind: input, shape index: {}]   ;;  %s6595_s3 = inlined_call_operand.hbm [shape: bf16[1920,128], index: 3, kind: input, shape index: {}]   ;;  %s6596_s4 = inlined_call_operand.hbm [shape: f32[16,512], index: 4, kind: input, shape index: {}]   ;;  %s6597_s5 = inlined_call_operand.hbm [shape: f32[2,128], index: 5, kind: output, shape index: {}]  }
   0x1   :  { %11 = vsyncpa [#allocation6], 0 }
   0x2   :  { %12 = vsyncpa [#allocation9], 0 }
   0x3   :  { %13 = vsyncpa [#allocation4], 0  ;;  %s5883_s18 = smov [#allocation5]   ;;  %s5765_s22 = scalar_lea.hbm %s6594_s2, 32768 }
   0x4   :  { %s33_s19 = sshll.u32 %s5883_s18, 4  ;;  %p5766_p0 = scmp.ne.s32.totalorder %s6594_s2, %s5765_s22  ;;  %s34_s19 = int_to_ptr.vmem [resolvable:$true] %s33_s19 }
   0x5   :  { %p5769_p1 = scmp.lt.u32.totalorder %s5765_s22, %s6594_s2 }
   0x7   :  { %p5771_p2 = pnand %p5769_p1, %p5766_p0 }
   0x9   :  { %5774 = shalt.err (!%p5771_p2)
}
   0xa   :  { %s5775_s27 = scalar_lea.vmem %s34_s19, 32768  ;;  %p5780_p4 = scmp.lt.s32.totalorder %s34_s19, %s34_s19 }
   0xb   :  { %p5776_p3 = scmp.ne.s32.totalorder %s34_s19, %s5775_s27  ;;  %p5781_p5 = scmp.lt.s32.totalorder %s5775_s27, %s5775_s27 }
   0xd   :  { %p5782_p6 = por %p5781_p5, %p5780_p4 }
   0xf   :  { %p5783_p7 = pnand %p5782_p6, %p5776_p3 }
  0x11   :  { %5786 = shalt.err (!%p5783_p7)
}
  0x12   :  { %s5884_s28 = smov 256   ;;  %s5885_s29 = smov 16  }
  0x13   :  { %39 = dma.hbm_to_vmem [thread:$0]  %s6594_s2, 32768, %s34_s19, [#allocation6], %s5884_s28, %s5884_s28, %s5885_s29  }
  0x14   :  { %s5886_s7 = smov [#allocation2]   ;;  %s5787_s11 = scalar_lea.hbm %s6593_s1, 4096 }
  0x15   :  { %s21_s8 = sshll.u32 %s5886_s7, 4  ;;  %p5788_p8 = scmp.ne.s32.totalorder %s6593_s1, %s5787_s11  ;;  %s22_s8 = int_to_ptr.vmem [resolvable:$true] %s21_s8 }
  0x16   :  { %p5791_p9 = scmp.lt.u32.totalorder %s5787_s11, %s6593_s1 }
  0x18   :  { %p5793_p10 = pnand %p5791_p9, %p5788_p8 }
  0x1a   :  { %5796 = shalt.err (!%p5793_p10)
}
  0x1b   :  { %s5797_s16 = scalar_lea.vmem %s22_s8, 4096  ;;  %p5802_p12 = scmp.lt.s32.totalorder %s22_s8, %s22_s8 }
  0x1c   :  { %p5798_p11 = scmp.ne.s32.totalorder %s22_s8, %s5797_s16  ;;  %p5803_p13 = scmp.lt.s32.totalorder %s5797_s16, %s5797_s16 }
  0x1e   :  { %p5804_p0 = por %p5803_p13, %p5802_p12 }
  0x20   :  { %p5805_p1 = pnand %p5804_p0, %p5798_p11 }
  0x22   :  { %5808 = shalt.err (!%p5805_p1)
}
  0x23   :  { %s5887_s2 = smov 128   ;;  %s5888_s17 = smov 8  }
  0x24   :  { %27 = dma.hbm_to_vmem [thread:$0]  %s6593_s1, 4096, %s22_s8, [#allocation3], %s5887_s2, %s5887_s2, %s5888_s17  }
  0x25   :  { %s5889_s20 = smov [#allocation7]   ;;  %s5809_s24 = scalar_lea.hbm %s6595_s3, 15360 }
  0x26   :  { %s45_s21 = sshll.u32 %s5889_s20, 4  ;;  %p5810_p2 = scmp.ne.s32.totalorder %s6595_s3, %s5809_s24  ;;  %s46_s21 = int_to_ptr.vmem [resolvable:$true] %s45_s21 }
  0x27   :  { %p5813_p3 = scmp.lt.u32.totalorder %s5809_s24, %s6595_s3 }
  0x29   :  { %p5815_p4 = pnand %p5813_p3, %p5810_p2 }
  0x2b   :  { %5818 = shalt.err (!%p5815_p4)
}
  0x2c   :  { %s5819_s29 = scalar_lea.vmem %s46_s21, 15360  ;;  %p5824_p6 = scmp.lt.s32.totalorder %s46_s21, %s46_s21 }
  0x2d   :  { %p5820_p5 = scmp.ne.s32.totalorder %s46_s21, %s5819_s29  ;;  %p5825_p7 = scmp.lt.s32.totalorder %s5819_s29, %s5819_s29 }
  0x2f   :  { %p5826_p8 = por %p5825_p7, %p5824_p6 }
  0x31   :  { %p5827_p9 = pnand %p5826_p8, %p5820_p5 }
  0x33   :  { %5830 = shalt.err (!%p5827_p9)
}
  0x34   :  { %s5890_s1 = smov 64   ;;  %s5891_s30 = smov 4  }
  0x35   :  { %51 = dma.hbm_to_vmem [thread:$0]  %s6595_s3, 15360, %s46_s21, [#allocation6], %s5890_s1, %s5890_s1, %s5891_s30  }
  0x36   :  { %s5892_s8 = smov [#allocation8]   ;;  %s5831_s12 = scalar_lea.hbm %s6596_s4, 1024 }
  0x37   :  { %s57_s9 = sshll.u32 %s5892_s8, 4  ;;  %p5832_p10 = scmp.ne.s32.totalorder %s6596_s4, %s5831_s12  ;;  %s58_s9 = int_to_ptr.vmem [resolvable:$true] %s57_s9 }
  0x38   :  { %p5835_p11 = scmp.lt.u32.totalorder %s5831_s12, %s6596_s4 }
  0x3a   :  { %p5837_p12 = pnand %p5835_p11, %p5832_p10 }
  0x3c   :  { %5840 = shalt.err (!%p5837_p12)
}
  0x3d   :  { %s5841_s2 = scalar_lea.vmem %s58_s9, 1024  ;;  %p5846_p0 = scmp.lt.s32.totalorder %s58_s9, %s58_s9 }
  0x3e   :  { %p5842_p13 = scmp.ne.s32.totalorder %s58_s9, %s5841_s2  ;;  %p5847_p1 = scmp.lt.s32.totalorder %s5841_s2, %s5841_s2 }
  0x40   :  { %p5848_p2 = por %p5847_p1, %p5846_p0 }
  0x42   :  { %p5849_p3 = pnand %p5848_p2, %p5842_p13 }
  0x44   :  { %5852 = shalt.err (!%p5849_p3)
}
  0x45   :  { %s5893_s3 = smov 512   ;;  %s5894_s17 = smov 32  }
  0x46   :  { %63 = dma.hbm_to_vmem [thread:$0]  %s6596_s4, 1024, %s58_s9, [#allocation9], %s5893_s3, %s5893_s3, %s5894_s17  }
  0x47   :  { %5875 = dma.done.wait [#allocation3], 4096  }
  0x48   :  { %5876 = vsyncadd [#allocation3], 4294963200 }
  0x49   :  { %5877 = dma.done.wait [#allocation6], 48128  }
  0x4a   :  { %5878 = vsyncadd [#allocation6], 4294919168 }
  0x4b   :  { %5879 = dma.done.wait [#allocation9], 1024  }
  0x4c   :  { %5880 = vsyncadd [#allocation9], 4294966272  ;;  %v6598_v0 = vmov 0   ;;  %v5207_v1 = vld [vmem:[#allocation2 + $0x4] ss:$8 sps:$4 sm:$0xff]   ;;  %v5235_v16 = vld [vmem:[#allocation7 + $0x190] sm:$0xff]   ;;  %v97_v35 = vlaneseq }
  0x4d   :  { %219 = vmatprep.mubr.bf16.mxu0 %v6598_v0  ;;  %v5209_v2 = vld [vmem:[#allocation2] ss:$8 sps:$4 sm:$0xff]   ;;  %187 = vmatprep.subr.bf16.mxu0 %v5207_v1  ;;  %v5210_v3 = vld [vmem:[#allocation2 + $0x14] ss:$8 sps:$4 sm:$0xff]   ;;  %v5212_v4 = vld [vmem:[#allocation2 + $0x10] ss:$8 sps:$4 sm:$0xff]  }
  0x4e   :  { %188 = vmatpush1.bf16.msra.mxu0 %v5209_v2  ;;  %v5213_v5 = vld [vmem:[#allocation2 + $0x24] ss:$8 sps:$4 sm:$0xff]   ;;  %v5215_v6 = vld [vmem:[#allocation2 + $0x20] ss:$8 sps:$4 sm:$0xff]   ;;  %v5216_v7 = vld [vmem:[#allocation2 + $0x34] ss:$8 sps:$4 sm:$0xff]  }
  0x4f   :  { %189 = vmatprep.subr.bf16.mxu0 %v5210_v3  ;;  %v5218_v8 = vld [vmem:[#allocation2 + $0x30] ss:$8 sps:$4 sm:$0xff]   ;;  %v5219_v9 = vld [vmem:[#allocation2 + $0x44] ss:$8 sps:$4 sm:$0xff]   ;;  %v5221_v12 = vld [vmem:[#allocation2 + $0x40] ss:$8 sps:$4 sm:$0xff]  }
  0x50   :  { %v5231_v10 = vld [vmem:[#allocation7 + $0x180] sm:$0xff]   ;;  %v5233_v13 = vld [vmem:[#allocation7 + $0x188] sm:$0xff]   ;;  %v5222_v14 = vld [vmem:[#allocation2 + $0x54] ss:$8 sps:$4 sm:$0xff]   ;;  %v5981_v36 = vshrl.u32 %v97_v35, 7  ;;  %vm278_vm0 = vcmask 1041408  }
  0x51   :  { %v5232_v11 = vld [vmem:[#allocation7 + $0x140] sm:$0xff]   ;;  %4866 = vmatprep.subr.bf16.mxu1 %v5231_v10  ;;  %v5234_v15 = vld [vmem:[#allocation7 + $0x148] sm:$0xff]   ;;  %v5224_v17 = vld [vmem:[#allocation2 + $0x50] ss:$8 sps:$4 sm:$0xff]   ;;  %vm309_vm1 = vcmask 1040384   ;;  %vm5897_vm2 = vmmov 0  }
  0x52   :  { %190 = vmatpush1.bf16.msra.mxu0 %v5212_v4  ;;  %4867 = vmatpush3.bf16.msra.mxu1 %v5232_v11  ;;  %v5225_v18 = vld [vmem:[#allocation2 + $0x64] ss:$8 sps:$4 sm:$0xff]   ;;  %v5227_v19 = vld [vmem:[#allocation2 + $0x60] ss:$8 sps:$4 sm:$0xff]   ;;  %v5228_v20 = vld [vmem:[#allocation2 + $0x74] ss:$8 sps:$4 sm:$0xff]  }
  0x53   :  { %191 = vmatprep.subr.bf16.mxu0 %v5213_v5  ;;  %4868 = vmatprep.subr.bf16.mxu1 %v5233_v13  ;;  %v5230_v21 = vld [vmem:[#allocation2 + $0x70] ss:$8 sps:$4 sm:$0xff]   ;;  %v77_v22 = vld [vmem:[%s6592_s0] sm:$0x3]  ;;  %v5241_v29 = vld [vmem:[#allocation7 + $0x1a8] sm:$0xff]   ;;  %v5984_v37 = vsub.s32 0, %v5981_v36 }
  0x54   :  { %v94_v23 = vpack.c.bf16 %v77_v22, %v77_v22  ;;  %v5236_v24 = vld [vmem:[#allocation7 + $0x150] sm:$0xff]   ;;  %v5237_v25 = vld [vmem:[#allocation7 + $0x198] sm:$0xff]   ;;  %v5239_v27 = vld [vmem:[#allocation7 + $0x1a0] sm:$0xff]   ;;  %v5987_v39 = vsub.s32 1, %v5981_v36  ;;  %s5898_s0 = smov [#allocation10]  }
  0x55   :  { %v5238_v26 = vld [vmem:[#allocation7 + $0x158] sm:$0xff]   ;;  %v5240_v28 = vld [vmem:[#allocation7 + $0x160] sm:$0xff]   ;;  %v5242_v30 = vld [vmem:[#allocation7 + $0x168] sm:$0xff]   ;;  %s4447_s21 = sshll.u32 %s5898_s0, 4  ;;  %s4448_s21 = int_to_ptr.vmem [resolvable:$true] %s4447_s21 }
  0x56   :  { %192 = vmatpush1.bf16.msra.mxu0 %v5215_v6  ;;  %4869 = vmatpush3.bf16.msra.mxu1 %v5234_v15  ;;  %v5243_v31 = vld [vmem:[#allocation7 + $0x1b0] sm:$0xff]   ;;  %v5245_v33 = vld [vmem:[#allocation7 + $0x1b8] sm:$0xff]   ;;  %v95_v38 = vld [vmem:[#allocation8] ss:$8 sm:$0x3]  ;;  %6605 = vst [vmem:[#allocation15_spill] sm:$0xff] %v5987_v39  ;;  %p5858_p5 = scmp.lt.s32.totalorder %s4448_s21, %s4448_s21 }
  0x57   :  { %193 = vmatprep.subr.bf16.mxu0 %v5216_v7  ;;  %4870 = vmatprep.subr.bf16.mxu1 %v5235_v16  ;;  %v5244_v32 = vld [vmem:[#allocation7 + $0x170] sm:$0xff]   ;;  %v5246_v34 = vld [vmem:[#allocation7 + $0x178] sm:$0xff]   ;;  %v100_v40 = vrot.slane %v95_v38, %v5984_v37  ;;  %v104_v41 = vrot.slane %v95_v38, %v5987_v39  ;;  %s5853_s22 = scalar_lea.vmem %s4448_s21, 32 }
  0x58   :  { %v6035_v35 = vld [vmem:[#allocation2 + $0xd4] ss:$8 sps:$4 sm:$0xff]   ;;  %v6037_v38 = vld [vmem:[#allocation2 + $0xd0] ss:$8 sps:$4 sm:$0xff]   ;;  %p5854_p4 = scmp.ne.s32.totalorder %s4448_s21, %s5853_s22  ;;  %p5859_p6 = scmp.lt.s32.totalorder %s5853_s22, %s5853_s22 }
  0x5a   :  { %194 = vmatpush1.bf16.msra.mxu0 %v5218_v8  ;;  %4871 = vmatpush3.bf16.msra.mxu1 %v5236_v24  ;;  %p5860_p7 = por %p5859_p6, %p5858_p5 }
  0x5b   :  { %195 = vmatprep.subr.bf16.mxu0 %v5219_v9  ;;  %4872 = vmatprep.subr.bf16.mxu1 %v5237_v25 }
  0x5c   :  { %p5861_p8 = pnand %p5860_p7, %p5854_p4 }
  0x5e   :  { %196 = vmatpush1.bf16.msra.mxu0 %v5221_v12  ;;  %4873 = vmatpush3.bf16.msra.mxu1 %v5238_v26 }
  0x5f   :  { %197 = vmatprep.subr.bf16.mxu0 %v5222_v14  ;;  %4874 = vmatprep.subr.bf16.mxu1 %v5239_v27 }
  0x62   :  { %198 = vmatpush1.bf16.msra.mxu0 %v5224_v17  ;;  %4875 = vmatpush3.bf16.msra.mxu1 %v5240_v28 }
  0x63   :  { %199 = vmatprep.subr.bf16.mxu0 %v5225_v18  ;;  %4876 = vmatprep.subr.bf16.mxu1 %v5241_v29 }
  0x66   :  { %200 = vmatpush1.bf16.msra.mxu0 %v5227_v19  ;;  %4877 = vmatpush3.bf16.msra.mxu1 %v5242_v30 }
  0x67   :  { %201 = vmatprep.subr.bf16.mxu0 %v5228_v20  ;;  %4878 = vmatprep.subr.bf16.mxu1 %v5243_v31 }
  0x6a   :  { %202 = vmatpush1.bf16.msra.mxu0 %v5230_v21  ;;  %4879 = vmatpush3.bf16.msra.mxu1 %v5244_v32 }
  0x6b   :  { %4888 = vmatprep.subr.bf16.mxu0 %v5231_v10  ;;  %4880 = vmatprep.subr.bf16.mxu1 %v5245_v33 }
  0x6d   :  { %220 = vmatmul.mubr.bf16.vlgmr.msra.gmra.mrb[0].mxu0 %v94_v23 }
  0x6e   :  { %4889 = vmatpush3.bf16.msra.mxu0 %v5232_v11  ;;  %4881 = vmatpush3.bf16.msra.mxu1 %v5246_v34 }
  0x6f   :  { %4890 = vmatprep.subr.bf16.mxu0 %v5233_v13 }
  0x72   :  { %4891 = vmatpush3.bf16.msra.mxu0 %v5234_v15 }
  0x73   :  { %4892 = vmatprep.subr.bf16.mxu0 %v5235_v16 }
  0x76   :  { %4893 = vmatpush3.bf16.msra.mxu0 %v5236_v24 }
  0x77   :  { %4894 = vmatprep.subr.bf16.mxu0 %v5237_v25  ;;  %v5249_v25 = vld [vmem:[#allocation2 + $0x84] ss:$8 sps:$4 sm:$0xff]  }
  0x78   :  { %598 = vmatprep.subr.bf16.mxu1 %v5249_v25 }
  0x7a   :  { %4895 = vmatpush3.bf16.msra.mxu0 %v5238_v26  ;;  %v6008_v26 = vld [vmem:[#allocation2 + $0x80] ss:$8 sps:$4 sm:$0xff]  }
  0x7b   :  { %4896 = vmatprep.subr.bf16.mxu0 %v5239_v27  ;;  %v6011_v27 = vld [vmem:[#allocation2 + $0x94] ss:$8 sps:$4 sm:$0xff]  }
  0x7e   :  { %4897 = vmatpush3.bf16.msra.mxu0 %v5240_v28  ;;  %v6013_v28 = vld [vmem:[#allocation2 + $0x90] ss:$8 sps:$4 sm:$0xff]  }
  0x7f   :  { %4898 = vmatprep.subr.bf16.mxu0 %v5241_v29  ;;  %v6017_v29 = vld [vmem:[#allocation2 + $0xa4] ss:$8 sps:$4 sm:$0xff]  }
  0x82   :  { %4899 = vmatpush3.bf16.msra.mxu0 %v5242_v30  ;;  %v6019_v30 = vld [vmem:[#allocation2 + $0xa0] ss:$8 sps:$4 sm:$0xff]  }
  0x83   :  { %4900 = vmatprep.subr.bf16.mxu0 %v5243_v31  ;;  %v6023_v31 = vld [vmem:[#allocation2 + $0xb4] ss:$8 sps:$4 sm:$0xff]  }
  0x86   :  { %4901 = vmatpush3.bf16.msra.mxu0 %v5244_v32  ;;  %v6025_v32 = vld [vmem:[#allocation2 + $0xb0] ss:$8 sps:$4 sm:$0xff]  }
  0x87   :  { %4902 = vmatprep.subr.bf16.mxu0 %v5245_v33  ;;  %v6029_v33 = vld [vmem:[#allocation2 + $0xc4] ss:$8 sps:$4 sm:$0xff]  }
  0x8a   :  { %4903 = vmatpush3.bf16.msra.mxu0 %v5246_v34  ;;  %v6031_v34 = vld [vmem:[#allocation2 + $0xc0] ss:$8 sps:$4 sm:$0xff]  }
 0x140   :  { %v221_v42 = vpop.f32.mrb[0].mxu0 }
 0x141   :  { %v5991_v43 = vadd.f32 %v221_v42, %v100_v40  ;;  %v223_v44 = vpop.f32.mrb[1].mxu0  ;;  %v6041_v40 = vld [vmem:[#allocation2 + $0xe0] ss:$8 sps:$4 sm:$0xff]   ;;  %v6045_v42 = vld [vmem:[#allocation2 + $0xf4] ss:$8 sps:$4 sm:$0xff]  }
 0x142   :  { %v5993_v45 = vadd.f32 %v223_v44, %v104_v41  ;;  %v225_v46 = vpop.f32.mrb[2].mxu0  ;;  %v6043_v41 = vld [vmem:[#allocation2 + $0xe4] ss:$8 sps:$4 sm:$0xff]   ;;  %v6049_v44 = vld [vmem:[#allocation2 + $0xf0] ss:$8 sps:$4 sm:$0xff]  }
 0x143   :  { %v279_v47 = vsel %vm278_vm0, %v5991_v43, 0.0  ;;  %v293_v48 = vmul.f32 %v5991_v43, %v5991_v43  ;;  %v226_v49 = vpop.f32.mrb[3].mxu0  ;;  %v5271_v46 = vld [vmem:[#allocation5] ss:$16 sps:$4 sm:$0xff]  }
 0x144   :  { %v280_v50 = vrot.slane %v279_v47, 4  ;;  %v286_v51 = vsel %vm278_vm0, %v5993_v45, 0.0  ;;  %v294_v52 = vmul.f32 %v5993_v45, %v5993_v45  ;;  %v5277_v49 = vld [vmem:[#allocation5 + $0x20] ss:$16 sps:$4 sm:$0xff]  }
 0x145   :  { %v295_v53 = vsel %vm278_vm0, %v293_v48, 0.0  ;;  %v287_v54 = vrot.slane %v286_v51, 4  ;;  %v5279_v48 = vld [vmem:[#allocation5 + $0x24] ss:$16 sps:$4 sm:$0xff]  }
 0x146   :  { %v281_v55 = vadd.f32 %v280_v50, %v279_v47  ;;  %v296_v56 = vrot.slane %v295_v53, 4  ;;  %v302_v57 = vsel %vm278_vm0, %v294_v52, 0.0  ;;  %v5273_v47 = vld [vmem:[#allocation5 + $0x4] ss:$16 sps:$4 sm:$0xff]  }
 0x147   :  { %v288_v58 = vadd.f32 %v287_v54, %v286_v51  ;;  %v303_v59 = vrot.slane %v302_v57, 4  ;;  %1111 = vmatprep.subr.bf16.mxu0 %v5273_v47  ;;  %v5285_v50 = vld [vmem:[#allocation5 + $0x44] ss:$16 sps:$4 sm:$0xff]   ;;  %v5283_v51 = vld [vmem:[#allocation5 + $0x40] ss:$16 sps:$4 sm:$0xff]  }
 0x148   :  { %v282_v60 = vrot.slane %v281_v55, 2  ;;  %v297_v61 = vadd.f32 %v296_v56, %v295_v53  ;;  %v5291_v52 = vld [vmem:[#allocation5 + $0x64] ss:$16 sps:$4 sm:$0xff]   ;;  %v5289_v53 = vld [vmem:[#allocation5 + $0x60] ss:$16 sps:$4 sm:$0xff]  }
 0x149   :  { %v289_v62 = vrot.slane %v288_v58, 2  ;;  %v304_v63 = vadd.f32 %v303_v59, %v302_v57  ;;  %v5297_v54 = vld [vmem:[#allocation5 + $0x84] ss:$16 sps:$4 sm:$0xff]   ;;  %v5301_v57 = vld [vmem:[#allocation5 + $0xa0] ss:$16 sps:$4 sm:$0xff]  }
 0x14a   :  { %v283_v1 = vadd.f32 %v282_v60, %v281_v55  ;;  %v298_v2 = vrot.slane %v297_v61, 2  ;;  %v5295_v55 = vld [vmem:[#allocation5 + $0x80] ss:$16 sps:$4 sm:$0xff]   ;;  %v5303_v56 = vld [vmem:[#allocation5 + $0xa4] ss:$16 sps:$4 sm:$0xff]  }
 0x14b   :  { %v290_v3 = vadd.f32 %v289_v62, %v288_v58  ;;  %v305_v4 = vrot.slane %v304_v63, 2  ;;  %v5309_v58 = vld [vmem:[#allocation5 + $0xc4] ss:$16 sps:$4 sm:$0xff]   ;;  %v5307_v59 = vld [vmem:[#allocation5 + $0xc0] ss:$16 sps:$4 sm:$0xff]  }
 0x14c   :  { %v284_v5 = vrot.slane %v283_v1, 1  ;;  %v299_v6 = vadd.f32 %v298_v2, %v297_v61  ;;  %v5315_v60 = vld [vmem:[#allocation5 + $0xe4] ss:$16 sps:$4 sm:$0xff]   ;;  %v5313_v61 = vld [vmem:[#allocation5 + $0xe0] ss:$16 sps:$4 sm:$0xff]  }
 0x14d   :  { %v291_v7 = vrot.slane %v290_v3, 1  ;;  %v306_v8 = vadd.f32 %v305_v4, %v304_v63  ;;  %v5321_v62 = vld [vmem:[#allocation5 + $0x104] ss:$16 sps:$4 sm:$0xff]   ;;  %v5319_v63 = vld [vmem:[#allocation5 + $0x100] ss:$16 sps:$4 sm:$0xff]  }
 0x14e   :  { %v300_v9 = vrot.slane %v299_v6, 1  ;;  %v285_v11 = vadd.f32 %v284_v5, %v283_v1  ;;  %v5327_v1 = vld [vmem:[#allocation5 + $0x124] ss:$16 sps:$4 sm:$0xff]   ;;  %v5325_v2 = vld [vmem:[#allocation5 + $0x120] ss:$16 sps:$4 sm:$0xff]  }
 0x14f   :  { %v307_v10 = vrot.slane %v306_v8, 1  ;;  %v292_v13 = vadd.f32 %v291_v7, %v290_v3  ;;  %v5333_v3 = vld [vmem:[#allocation5 + $0x144] ss:$16 sps:$4 sm:$0xff]   ;;  %v5331_v4 = vld [vmem:[#allocation5 + $0x140] ss:$16 sps:$4 sm:$0xff]  }
 0x150   :  { %v301_v12 = vadd.f32 %v300_v9, %v299_v6  ;;  %v5339_v5 = vld [vmem:[#allocation5 + $0x164] ss:$16 sps:$4 sm:$0xff]   ;;  %v5337_v6 = vld [vmem:[#allocation5 + $0x160] ss:$16 sps:$4 sm:$0xff]  }
 0x151   :  { %v308_v14 = vadd.f32 %v307_v10, %v306_v8  ;;  %v5345_v9 = vld [vmem:[#allocation5 + $0x184] ss:$16 sps:$4 sm:$0xff]  }
 0x152   :  { %v310_v15 = vsel %vm309_vm1, %v285_v11, %v301_v12 }
 0x153   :  { %v311_v16 = vsel %vm309_vm1, %v292_v13, %v308_v14  ;;  %v312_v17 = vpack.c.bf16 %v310_v15, %v310_v15  ;;  %v5343_v13 = vld [vmem:[#allocation5 + $0x180] ss:$16 sps:$4 sm:$0xff]  }
 0x154   :  { %v313_v18 = vpack.c.bf16 %v311_v16, %v311_v16 }
 0x155   :  { %v314_v19 = vunpack.c.l.bf16 %v312_v17 }
 0x156   :  { %488 = vmatprep.mubr.bf16.mxu0 %v313_v18  ;;  %v315_v20 = vunpack.c.l.bf16 %v313_v18 }
 0x157   :  { %489 = vmatmul.mubr.bf16.vlgmr.msra.gmra.mrb[4].mxu0 %v312_v17  ;;  %v316_v21 = vsub.f32 %v310_v15, %v314_v19 }
 0x158   :  { %v317_v22 = vsub.f32 %v311_v16, %v315_v20  ;;  %1112 = vmatpush1.bf16.msra.mxu0 %v5271_v46 }
 0x159   :  { %v318_v24 = vpack.c.bf16 %v316_v21, %v316_v21  ;;  %1113 = vmatprep.subr.bf16.mxu0 %v5279_v48 }
 0x15a   :  { %v319_v23 = vpack.c.bf16 %v317_v22, %v317_v22 }
 0x15c   :  { %448 = vmatprep.mubr.bf16.mxu1 %v319_v23  ;;  %1114 = vmatpush1.bf16.msra.mxu0 %v5277_v49  ;;  %v277_v49 = vld [vmem:[#allocation8 + $0x4] ss:$0 sm:$0xff] }
 0x15d   :  { %449 = vmatmul.mubr.bf16.vlgmr.msra.gmra.mrb[0].mxu1 %v318_v24  ;;  %1115 = vmatprep.subr.bf16.mxu0 %v5285_v50 }
 0x15e   :  { %630 = vmatprep.mubr.bf16.mxu1 %v6598_v0  ;;  %599 = vmatpush1.bf16.msra.mxu1 %v6008_v26 }
 0x15f   :  { %600 = vmatprep.subr.bf16.mxu1 %v6011_v27 }
 0x160   :  { %1116 = vmatpush1.bf16.msra.mxu0 %v5283_v51 }
 0x161   :  { %1117 = vmatprep.subr.bf16.mxu0 %v5291_v52 }
 0x162   :  { %601 = vmatpush1.bf16.msra.mxu1 %v6013_v28 }
 0x163   :  { %602 = vmatprep.subr.bf16.mxu1 %v6017_v29 }
 0x164   :  { %1118 = vmatpush1.bf16.msra.mxu0 %v5289_v53 }
 0x165   :  { %1119 = vmatprep.subr.bf16.mxu0 %v5297_v54 }
 0x166   :  { %603 = vmatpush1.bf16.msra.mxu1 %v6019_v30 }
 0x167   :  { %604 = vmatprep.subr.bf16.mxu1 %v6023_v31 }
 0x168   :  { %1120 = vmatpush1.bf16.msra.mxu0 %v5295_v55 }
 0x169   :  { %1121 = vmatprep.subr.bf16.mxu0 %v5303_v56 }
 0x16a   :  { %605 = vmatpush1.bf16.msra.mxu1 %v6025_v32 }
 0x16b   :  { %606 = vmatprep.subr.bf16.mxu1 %v6029_v33 }
 0x16c   :  { %1122 = vmatpush1.bf16.msra.mxu0 %v5301_v57 }
 0x16d   :  { %1123 = vmatprep.subr.bf16.mxu0 %v5309_v58  ;;  %v5316_v58 = vld [vmem:[#allocation5 + $0xe8] ss:$16 sps:$4 sm:$0xff]  }
 0x16e   :  { %607 = vmatpush1.bf16.msra.mxu1 %v6031_v34 }
 0x16f   :  { %608 = vmatprep.subr.bf16.mxu1 %v6035_v35 }
 0x170   :  { %1124 = vmatpush1.bf16.msra.mxu0 %v5307_v59  ;;  %v5324_v59 = vld [vmem:[#allocation5 + $0x10c] ss:$16 sps:$4 sm:$0xff]  }
 0x171   :  { %1125 = vmatprep.subr.bf16.mxu0 %v5315_v60  ;;  %v5322_v60 = vld [vmem:[#allocation5 + $0x108] ss:$16 sps:$4 sm:$0xff]  }
 0x172   :  { %609 = vmatpush1.bf16.msra.mxu1 %v6037_v38 }
 0x173   :  { %610 = vmatprep.subr.bf16.mxu1 %v6043_v41 }
 0x174   :  { %1126 = vmatpush1.bf16.msra.mxu0 %v5313_v61  ;;  %v5330_v61 = vld [vmem:[#allocation5 + $0x12c] ss:$16 sps:$4 sm:$0xff]  }
 0x175   :  { %1127 = vmatprep.subr.bf16.mxu0 %v5321_v62  ;;  %v5328_v62 = vld [vmem:[#allocation5 + $0x128] ss:$16 sps:$4 sm:$0xff]  }
 0x176   :  { %611 = vmatpush1.bf16.msra.mxu1 %v6041_v40 }
 0x177   :  { %612 = vmatprep.subr.bf16.mxu1 %v6045_v42 }
 0x178   :  { %1128 = vmatpush1.bf16.msra.mxu0 %v5319_v63  ;;  %v5336_v63 = vld [vmem:[#allocation5 + $0x14c] ss:$16 sps:$4 sm:$0xff]  }
 0x179   :  { %1129 = vmatprep.subr.bf16.mxu0 %v5327_v1  ;;  %v5334_v1 = vld [vmem:[#allocation5 + $0x148] ss:$16 sps:$4 sm:$0xff]  }
 0x17a   :  { %613 = vmatpush1.bf16.msra.mxu1 %v6049_v44 }
 0x17b   :  { %639 = vmatprep.subr.bf16.mxu1 %v5249_v25  ;;  %v276_v25 = vld [vmem:[#allocation8 + $0x3] ss:$0 sm:$0xff] }
 0x17c   :  { %1130 = vmatpush1.bf16.msra.mxu0 %v5325_v2  ;;  %v5342_v2 = vld [vmem:[#allocation5 + $0x16c] ss:$16 sps:$4 sm:$0xff]  }
 0x17d   :  { %1131 = vmatprep.subr.bf16.mxu0 %v5333_v3  ;;  %v5340_v3 = vld [vmem:[#allocation5 + $0x168] ss:$16 sps:$4 sm:$0xff]  }
 0x180   :  { %1132 = vmatpush1.bf16.msra.mxu0 %v5331_v4  ;;  %v5348_v4 = vld [vmem:[#allocation5 + $0x18c] ss:$16 sps:$4 sm:$0xff]  }
 0x181   :  { %1133 = vmatprep.subr.bf16.mxu0 %v5339_v5  ;;  %v5346_v5 = vld [vmem:[#allocation5 + $0x188] ss:$16 sps:$4 sm:$0xff]  }
 0x184   :  { %1134 = vmatpush1.bf16.msra.mxu0 %v5337_v6  ;;  %v5351_v6 = vld [vmem:[#allocation5 + $0x1a4] ss:$16 sps:$4 sm:$0xff]  }
 0x185   :  { %1135 = vmatprep.subr.bf16.mxu0 %v5345_v9  ;;  %v5352_v9 = vld [vmem:[#allocation5 + $0x1a8] ss:$16 sps:$4 sm:$0xff]  }
 0x188   :  { %1136 = vmatpush1.bf16.msra.mxu0 %v5343_v13  ;;  %v5358_v13 = vld [vmem:[#allocation5 + $0x1c8] ss:$16 sps:$4 sm:$0xff]  }
 0x189   :  { %1137 = vmatprep.subr.bf16.mxu0 %v5351_v6 }
 0x22a   :  { %v4904_v7 = vpop.f32.mrb[4].mxu0 }
 0x22b   :  { %v4905_v8 = vpop.f32.mrb[5].mxu0 }
 0x22c   :  { %v4906_v10 = vadd.f32 %v4905_v8, %v4904_v7  ;;  %v4907_v11 = vpop.f32.mrb[6].mxu0  ;;  %v5354_v7 = vld [vmem:[#allocation5 + $0x1ac] ss:$16 sps:$4 sm:$0xff]   ;;  %v5349_v8 = vld [vmem:[#allocation5 + $0x1a0] ss:$16 sps:$4 sm:$0xff]  }
 0x22d   :  { %v4908_v12 = vpop.f32.mrb[7].mxu0  ;;  %1138 = vmatpush1.bf16.msra.mxu0 %v5349_v8  ;;  %v5360_v11 = vld [vmem:[#allocation5 + $0x1cc] ss:$16 sps:$4 sm:$0xff]  }
 0x22e   :  { %v5355_v12 = vld [vmem:[#allocation5 + $0x1c0] ss:$16 sps:$4 sm:$0xff]  }
 0x230   :  { %v4882_v14 = vpop.f32.mrb[0].mxu1 }
 0x231   :  { %v4883_v15 = vpop.f32.mrb[1].mxu1 }
 0x232   :  { %v4884_v16 = vadd.f32 %v4883_v15, %v4882_v14  ;;  %v4885_v17 = vpop.f32.mrb[2].mxu1  ;;  %v5363_v14 = vld [vmem:[#allocation5 + $0x1e4] ss:$16 sps:$4 sm:$0xff]   ;;  %v5366_v15 = vld [vmem:[#allocation5 + $0x1ec] ss:$16 sps:$4 sm:$0xff]  }
 0x233   :  { %v4886_v18 = vpop.f32.mrb[3].mxu1  ;;  %v5364_v17 = vld [vmem:[#allocation5 + $0x1e8] ss:$16 sps:$4 sm:$0xff]  }
 0x234   :  { %v491_v19 = vadd.f32 %v4906_v10, %v4884_v16  ;;  %v5357_v10 = vld [vmem:[#allocation5 + $0x1c4] ss:$16 sps:$4 sm:$0xff]   ;;  %v5361_v16 = vld [vmem:[#allocation5 + $0x1e0] ss:$16 sps:$4 sm:$0xff]  }
 0x235   :  { %1139 = vmatprep.subr.bf16.mxu0 %v5357_v10  ;;  %v5367_v18 = vld [vmem:[#allocation7 + $0x200] sm:$0xff]  }
 0x236   :  { %v496_v20 = vmul.f32 0.014705882, %v491_v19  ;;  %1140 = vmatpush1.bf16.msra.mxu0 %v5355_v12 }
 0x237   :  { %1141 = vmatprep.subr.bf16.mxu0 %v5363_v14 }
 0x238   :  { %v497_v21 = vmul.f32 %v496_v20, %v496_v20 }
 0x23a   :  { %v499_v22 = vrot.slane %v497_v21, 7  ;;  %1142 = vmatpush1.bf16.msra.mxu0 %v5361_v16 }
 0x23b   :  { %4910 = vmatprep.subr.bf16.mxu0 %v5367_v18 }
 0x23c   :  { %v501_v23 = vsub.f32 %v496_v20, %v499_v22 }
 0x23e   :  { %v502_v24 = vadd.f32 1e-05, %v501_v23 }
 0x240   :  { %5759 = vrsqrt.f32 %v502_v24 }
 0x24a   :  { %v5760_v46 = vpop.eup %5759 }
 0x24b   :  { %v504_v47 = vmul.f32 %v5760_v46, %v276_v25 }
 0x24d   :  { %v506_v48 = vrot.slane %v504_v47, 1 }
 0x24f   :  { %v508_v50 = vmul.f32 %v506_v48, %v496_v20 }
 0x251   :  { %v509_v51 = vsub.f32 %v277_v49, %v508_v50 }
 0x253   :  { %v511_v52 = vrot.slane %v509_v51, 7 }
 0x255   :  { %v513_v53 = vsel %vm309_vm1, %v506_v48, %v511_v52 }
 0x256   :  { %v514_v54 = vpack.c.bf16 %v513_v53, %v513_v53 }
 0x258   :  { %v515_v55 = vunpack.c.l.bf16 %v514_v54 }
 0x25a   :  { %v516_v56 = vsub.f32 %v513_v53, %v515_v55 }
 0x25c   :  { %v517_v57 = vpack.c.bf16 %v516_v56, %v516_v56  ;;  %v5369_v56 = vld [vmem:[#allocation7 + $0x208] sm:$0xff]  }
 0x25e   :  { %631 = vmatmul.mubr.bf16.vlgmr.msra.gmra.mrb[4].mxu1 %v517_v57  ;;  %v5371_v57 = vld [vmem:[#allocation7 + $0x210] sm:$0xff]  }
 0x25f   :  { %640 = vmatpush1.bf16.msra.mxu1 %v6008_v26  ;;  %671 = vmatprep.mubr.bf16.mxu1 %v6598_v0  ;;  %v5276_v26 = vld [vmem:[#allocation5 + $0xc] ss:$16 sps:$4 sm:$0xff]  }
 0x260   :  { %641 = vmatprep.subr.bf16.mxu1 %v6011_v27  ;;  %v5274_v27 = vld [vmem:[#allocation5 + $0x8] ss:$16 sps:$4 sm:$0xff]  }
 0x263   :  { %642 = vmatpush1.bf16.msra.mxu1 %v6013_v28  ;;  %v5282_v28 = vld [vmem:[#allocation5 + $0x2c] ss:$16 sps:$4 sm:$0xff]  }
 0x264   :  { %643 = vmatprep.subr.bf16.mxu1 %v6017_v29  ;;  %v5280_v29 = vld [vmem:[#allocation5 + $0x28] ss:$16 sps:$4 sm:$0xff]  }
 0x267   :  { %644 = vmatpush1.bf16.msra.mxu1 %v6019_v30  ;;  %v5288_v30 = vld [vmem:[#allocation5 + $0x4c] ss:$16 sps:$4 sm:$0xff]  }
 0x268   :  { %645 = vmatprep.subr.bf16.mxu1 %v6023_v31  ;;  %v5286_v31 = vld [vmem:[#allocation5 + $0x48] ss:$16 sps:$4 sm:$0xff]  }
 0x26b   :  { %646 = vmatpush1.bf16.msra.mxu1 %v6025_v32  ;;  %v5294_v32 = vld [vmem:[#allocation5 + $0x6c] ss:$16 sps:$4 sm:$0xff]  }
 0x26c   :  { %647 = vmatprep.subr.bf16.mxu1 %v6029_v33  ;;  %v5292_v33 = vld [vmem:[#allocation5 + $0x68] ss:$16 sps:$4 sm:$0xff]  }
 0x26f   :  { %648 = vmatpush1.bf16.msra.mxu1 %v6031_v34  ;;  %v5300_v34 = vld [vmem:[#allocation5 + $0x8c] ss:$16 sps:$4 sm:$0xff]  }
 0x270   :  { %649 = vmatprep.subr.bf16.mxu1 %v6035_v35  ;;  %v5298_v35 = vld [vmem:[#allocation5 + $0x88] ss:$16 sps:$4 sm:$0xff]  }
 0x273   :  { %650 = vmatpush1.bf16.msra.mxu1 %v6037_v38  ;;  %v5306_v38 = vld [vmem:[#allocation5 + $0xac] ss:$16 sps:$4 sm:$0xff]  }
 0x274   :  { %651 = vmatprep.subr.bf16.mxu1 %v6043_v41  ;;  %v5312_v41 = vld [vmem:[#allocation5 + $0xcc] ss:$16 sps:$4 sm:$0xff]  }
 0x277   :  { %652 = vmatpush1.bf16.msra.mxu1 %v6041_v40  ;;  %v5304_v40 = vld [vmem:[#allocation5 + $0xa8] ss:$16 sps:$4 sm:$0xff]  }
 0x278   :  { %653 = vmatprep.subr.bf16.mxu1 %v6045_v42  ;;  %v5310_v42 = vld [vmem:[#allocation5 + $0xc8] ss:$16 sps:$4 sm:$0xff]  }
 0x27b   :  { %654 = vmatpush1.bf16.msra.mxu1 %v6049_v44  ;;  %v5318_v44 = vld [vmem:[#allocation5 + $0xec] ss:$16 sps:$4 sm:$0xff]  }
 0x27c   :  { %1152 = vmatprep.subr.bf16.mxu1 %v5276_v26  ;;  %v5373_v26 = vld [vmem:[#allocation7 + $0x218] sm:$0xff]  }
 0x27e   :  { %672 = vmatmul.mubr.bf16.vlgmr.msra.gmra.mrb[4].mxu1 %v514_v54  ;;  %v5368_v54 = vld [vmem:[#allocation7 + $0x1c0] sm:$0xff]  }
 0x27f   :  { %1153 = vmatpush1.bf16.msra.mxu1 %v5274_v27  ;;  %v5374_v27 = vld [vmem:[#allocation7 + $0x1d8] sm:$0xff]  }
 0x280   :  { %1154 = vmatprep.subr.bf16.mxu1 %v5282_v28  ;;  %v5375_v28 = vld [vmem:[#allocation7 + $0x220] sm:$0xff]  }
 0x283   :  { %1155 = vmatpush1.bf16.msra.mxu1 %v5280_v29  ;;  %v5376_v29 = vld [vmem:[#allocation7 + $0x1e0] sm:$0xff]  }
 0x284   :  { %1156 = vmatprep.subr.bf16.mxu1 %v5288_v30  ;;  %v5377_v30 = vld [vmem:[#allocation7 + $0x228] sm:$0xff]  }
 0x287   :  { %1157 = vmatpush1.bf16.msra.mxu1 %v5286_v31  ;;  %v5378_v31 = vld [vmem:[#allocation7 + $0x1e8] sm:$0xff]  }
 0x288   :  { %1158 = vmatprep.subr.bf16.mxu1 %v5294_v32  ;;  %v5379_v32 = vld [vmem:[#allocation7 + $0x230] sm:$0xff]  }
 0x28b   :  { %1159 = vmatpush1.bf16.msra.mxu1 %v5292_v33  ;;  %v5380_v33 = vld [vmem:[#allocation7 + $0x1f0] sm:$0xff]  }
 0x28c   :  { %1160 = vmatprep.subr.bf16.mxu1 %v5300_v34  ;;  %v5381_v34 = vld [vmem:[#allocation7 + $0x238] sm:$0xff]  }
 0x28f   :  { %1161 = vmatpush1.bf16.msra.mxu1 %v5298_v35  ;;  %v5382_v35 = vld [vmem:[#allocation7 + $0x1f8] sm:$0xff]  }
 0x290   :  { %1162 = vmatprep.subr.bf16.mxu1 %v5306_v38  ;;  %v6076_v38 = vld [vmem:[#allocation7 + $0x280] sm:$0xff]  }
 0x293   :  { %1163 = vmatpush1.bf16.msra.mxu1 %v5304_v40  ;;  %v769_v40 = vld [vmem:[#allocation8 + $0x1] ss:$8 sm:$0xf] }
 0x294   :  { %1164 = vmatprep.subr.bf16.mxu1 %v5312_v41  ;;  %v785_v41 = vsub.s32 3, %v5981_v36 }
 0x297   :  { %1165 = vmatpush1.bf16.msra.mxu1 %v5310_v42  ;;  %v774_v42 = vrot.slane %v769_v40, %v5984_v37 }
 0x298   :  { %1166 = vmatprep.subr.bf16.mxu1 %v5318_v44  ;;  %v778_v44 = vrot.slane %v769_v40, %v5987_v39 }
 0x29b   :  { %1167 = vmatpush1.bf16.msra.mxu1 %v5316_v58  ;;  %v786_v58 = vrot.slane %v769_v40, %v785_v41 }
 0x29c   :  { %1168 = vmatprep.subr.bf16.mxu1 %v5324_v59 }
 0x29f   :  { %1169 = vmatpush1.bf16.msra.mxu1 %v5322_v60 }
 0x2a0   :  { %1170 = vmatprep.subr.bf16.mxu1 %v5330_v61 }
 0x2a3   :  { %1171 = vmatpush1.bf16.msra.mxu1 %v5328_v62 }
 0x2a4   :  { %1172 = vmatprep.subr.bf16.mxu1 %v5336_v63 }
 0x2a7   :  { %1173 = vmatpush1.bf16.msra.mxu1 %v5334_v1  ;;  %v781_v1 = vsub.s32 2, %v5981_v36 }
 0x2a8   :  { %1174 = vmatprep.subr.bf16.mxu1 %v5342_v2 }
 0x2ab   :  { %1175 = vmatpush1.bf16.msra.mxu1 %v5340_v3 }
 0x2ac   :  { %1176 = vmatprep.subr.bf16.mxu1 %v5348_v4 }
 0x2af   :  { %1177 = vmatpush1.bf16.msra.mxu1 %v5346_v5 }
 0x2b0   :  { %1178 = vmatprep.subr.bf16.mxu1 %v5354_v7 }
 0x2b3   :  { %1179 = vmatpush1.bf16.msra.mxu1 %v5352_v9 }
 0x2b4   :  { %1180 = vmatprep.subr.bf16.mxu1 %v5360_v11 }
 0x2b7   :  { %1181 = vmatpush1.bf16.msra.mxu1 %v5358_v13 }
 0x2b8   :  { %1182 = vmatprep.subr.bf16.mxu1 %v5366_v15 }
 0x2bb   :  { %1183 = vmatpush1.bf16.msra.mxu1 %v5364_v17 }
 0x2bc   :  { %4954 = vmatprep.subr.bf16.mxu1 %v5367_v18  ;;  %v782_v18 = vrot.slane %v769_v40, %v781_v1 }
 0x351   :  { %v673_v19 = vpop.f32.mrb[4].mxu1 }
 0x352   :  { %v683_v20 = vrot.slane %v673_v19, %v5984_v37  ;;  %v675_v21 = vpop.f32.mrb[5].mxu1  ;;  %v693_v25 = vrot.slane %v673_v19, %v5987_v39 }
 0x353   :  { %v687_v22 = vrot.slane %v675_v21, %v5984_v37  ;;  %v677_v23 = vpop.f32.mrb[6].mxu1  ;;  %v697_v48 = vrot.slane %v675_v21, %v5987_v39 }
 0x354   :  { %v688_v24 = vmul.f32 %v683_v20, %v5991_v43  ;;  %v678_v46 = vpop.f32.mrb[7].mxu1  ;;  %v5370_v43 = vld [vmem:[#allocation7 + $0x1c8] sm:$0xff]  }
 0x355   :  { %v689_v47 = vmul.f32 %v687_v22, %v5993_v45  ;;  %v5372_v45 = vld [vmem:[#allocation7 + $0x1d0] sm:$0xff]  }
 0x356   :  { %v698_v49 = vadd.f32 %v693_v25, %v688_v24 }
 0x357   :  { %v699_v50 = vadd.f32 %v697_v48, %v689_v47 }
 0x358   :  { %v700_v51 = vmax.f32 %v698_v49, 0.0 }
 0x359   :  { %v701_v52 = vmax.f32 %v699_v50, 0.0 }
 0x35a   :  { %v766_v55 = vpack.c.bf16 %v700_v51, %v700_v51 }
 0x35b   :  { %v767_v53 = vpack.c.bf16 %v701_v52, %v701_v52 }
 0x35d   :  { %1143 = vmatprep.mubr.bf16.mxu0 %v767_v53  ;;  %1184 = vmatprep.mubr.bf16.mxu1 %v767_v53 }
 0x35e   :  { %1144 = vmatmul.mubr.bf16.vlgmr.msra.gmra.mrb[8].mxu0 %v766_v55  ;;  %1185 = vmatmul.mubr.bf16.vlgmr.msra.gmra.mrb[8].mxu1 %v766_v55 }
 0x35f   :  { %4955 = vmatpush3.bf16.msra.mxu1 %v5368_v54  ;;  %4911 = vmatpush3.bf16.msra.mxu0 %v5368_v54 }
 0x360   :  { %4956 = vmatprep.subr.bf16.mxu1 %v5369_v56  ;;  %4912 = vmatprep.subr.bf16.mxu0 %v5369_v56 }
 0x363   :  { %4957 = vmatpush3.bf16.msra.mxu1 %v5370_v43  ;;  %4913 = vmatpush3.bf16.msra.mxu0 %v5370_v43 }
 0x364   :  { %4958 = vmatprep.subr.bf16.mxu1 %v5371_v57  ;;  %4914 = vmatprep.subr.bf16.mxu0 %v5371_v57 }
 0x367   :  { %4959 = vmatpush3.bf16.msra.mxu1 %v5372_v45  ;;  %4915 = vmatpush3.bf16.msra.mxu0 %v5372_v45 }
 0x368   :  { %4960 = vmatprep.subr.bf16.mxu1 %v5373_v26  ;;  %4916 = vmatprep.subr.bf16.mxu0 %v5373_v26 }
 0x36b   :  { %4961 = vmatpush3.bf16.msra.mxu1 %v5374_v27  ;;  %4917 = vmatpush3.bf16.msra.mxu0 %v5374_v27 }
 0x36c   :  { %4962 = vmatprep.subr.bf16.mxu1 %v5375_v28  ;;  %4918 = vmatprep.subr.bf16.mxu0 %v5375_v28 }
 0x36f   :  { %4963 = vmatpush3.bf16.msra.mxu1 %v5376_v29  ;;  %4919 = vmatpush3.bf16.msra.mxu0 %v5376_v29 }
 0x370   :  { %4964 = vmatprep.subr.bf16.mxu1 %v5377_v30  ;;  %4920 = vmatprep.subr.bf16.mxu0 %v5377_v30 }
 0x373   :  { %4965 = vmatpush3.bf16.msra.mxu1 %v5378_v31  ;;  %4921 = vmatpush3.bf16.msra.mxu0 %v5378_v31 }
 0x374   :  { %4966 = vmatprep.subr.bf16.mxu1 %v5379_v32  ;;  %4922 = vmatprep.subr.bf16.mxu0 %v5379_v32 }
 0x377   :  { %4967 = vmatpush3.bf16.msra.mxu1 %v5380_v33  ;;  %4923 = vmatpush3.bf16.msra.mxu0 %v5380_v33 }
 0x378   :  { %4968 = vmatprep.subr.bf16.mxu1 %v5381_v34  ;;  %4924 = vmatprep.subr.bf16.mxu0 %v5381_v34 }
 0x37b   :  { %4969 = vmatpush3.bf16.msra.mxu1 %v5382_v35  ;;  %4925 = vmatpush3.bf16.msra.mxu0 %v5382_v35 }
 0x37c   :  { %4932 = vmatprep.subr.bf16.mxu0 %v6076_v38 }
 0x431   :  { %v1145_v59 = vpop.f32.mrb[8].mxu0  ;;  %v1186_v60 = vpop.f32.mrb[8].mxu1 }
 0x432   :  { %v6084_v61 = vadd.f32 %v1145_v59, %v774_v42  ;;  %v1147_v62 = vpop.f32.mrb[9].mxu0  ;;  %v1188_v63 = vpop.f32.mrb[9].mxu1  ;;  %v6108_v51 = vadd.f32 %v1186_v60, %v782_v18 }
 0x433   :  { %v6087_v2 = vadd.f32 %v1147_v62, %v778_v44  ;;  %v6089_v3 = vadd.f32 %v1188_v63, %v786_v58  ;;  %v1149_v4 = vpop.f32.mrb[10].mxu0  ;;  %v1190_v5 = vpop.f32.mrb[10].mxu1 }
 0x434   :  { %v1291_v6 = vsel %vm278_vm0, %v6084_v61, 0.0  ;;  %v1319_v7 = vmul.f32 %v6084_v61, %v6084_v61  ;;  %v1150_v8 = vpop.f32.mrb[11].mxu0  ;;  %v1191_v9 = vpop.f32.mrb[11].mxu1  ;;  %v1321_v28 = vmul.f32 %v6108_v51, %v6108_v51  ;;  %v1305_v63 = vsel %vm278_vm0, %v6108_v51, 0.0 }
 0x435   :  { %v1292_v10 = vrot.slane %v1291_v6, 4  ;;  %v1298_v11 = vsel %vm278_vm0, %v6087_v2, 0.0  ;;  %v1320_v12 = vmul.f32 %v6087_v2, %v6087_v2  ;;  %v1312_v15 = vsel %vm278_vm0, %v6089_v3, 0.0 }
 0x436   :  { %v1323_v13 = vsel %vm278_vm0, %v1319_v7, 0.0  ;;  %v1299_v14 = vrot.slane %v1298_v11, 4  ;;  %v1313_v21 = vrot.slane %v1312_v15, 4  ;;  %v1322_v22 = vmul.f32 %v6089_v3, %v6089_v3 }
 0x437   :  { %v1293_v16 = vadd.f32 %v1292_v10, %v1291_v6  ;;  %v1324_v17 = vrot.slane %v1323_v13, 4  ;;  %v1330_v20 = vsel %vm278_vm0, %v1320_v12, 0.0  ;;  %v1337_v42 = vsel %vm278_vm0, %v1321_v28, 0.0 }
 0x438   :  { %v1300_v19 = vadd.f32 %v1299_v14, %v1298_v11  ;;  %v1331_v46 = vrot.slane %v1330_v20, 4  ;;  %v1314_v47 = vadd.f32 %v1313_v21, %v1312_v15  ;;  %v1344_v48 = vsel %vm278_vm0, %v1322_v22, 0.0 }
 0x439   :  { %v1294_v23 = vrot.slane %v1293_v16, 2  ;;  %v1325_v24 = vadd.f32 %v1324_v17, %v1323_v13  ;;  %v1345_v55 = vrot.slane %v1344_v48, 4  ;;  %v1338_v8 = vrot.slane %v1337_v42, 4 }
 0x43a   :  { %v1301_v25 = vrot.slane %v1300_v19, 2  ;;  %v1332_v53 = vadd.f32 %v1331_v46, %v1330_v20  ;;  %v1315_v54 = vrot.slane %v1314_v47, 2  ;;  %v1306_v11 = vrot.slane %v1305_v63, 4  ;;  %v5384_v20 = vld [vmem:[#allocation7 + $0x240] sm:$0xff]  }
 0x43b   :  { %v1295_v49 = vadd.f32 %v1294_v23, %v1293_v16  ;;  %v1326_v50 = vrot.slane %v1325_v24, 2  ;;  %v1346_v26 = vadd.f32 %v1345_v55, %v1344_v48  ;;  %v1339_v15 = vadd.f32 %v1338_v8, %v1337_v42  ;;  %v5385_v23 = vld [vmem:[#allocation7 + $0x288] sm:$0xff]   ;;  %v5387_v48 = vld [vmem:[#allocation7 + $0x290] sm:$0xff]  }
 0x43c   :  { %v1302_v52 = vadd.f32 %v1301_v25, %v1300_v19  ;;  %v1333_v57 = vrot.slane %v1332_v53, 2  ;;  %v1316_v45 = vadd.f32 %v1315_v54, %v1314_v47  ;;  %v1307_v18 = vadd.f32 %v1306_v11, %v1305_v63  ;;  %v5386_v47 = vld [vmem:[#allocation7 + $0x248] sm:$0xff]   ;;  %v6138_v63 = vld [vmem:[#allocation5 + $0x620] ss:$16 sps:$4 sm:$0xff]  }
 0x43d   :  { %v1296_v56 = vrot.slane %v1295_v49, 1  ;;  %v1327_v43 = vadd.f32 %v1326_v50, %v1325_v24  ;;  %v1347_v31 = vrot.slane %v1346_v26, 2  ;;  %v1340_v24 = vrot.slane %v1339_v15, 2  ;;  %v6152_v8 = vld [vmem:[#allocation5 + $0x648] ss:$16 sps:$4 sm:$0xff]  }
 0x43e   :  { %v1303_v29 = vrot.slane %v1302_v52, 1  ;;  %v1334_v30 = vadd.f32 %v1333_v57, %v1332_v53  ;;  %v1317_v34 = vrot.slane %v1316_v45, 1  ;;  %v1308_v46 = vrot.slane %v1307_v18, 2  ;;  %v5389_v53 = vld [vmem:[#allocation7 + $0x298] sm:$0xff]   ;;  %v6162_v11 = vld [vmem:[#allocation5 + $0x660] ss:$16 sps:$4 sm:$0xff]  }
 0x43f   :  { %v1328_v27 = vrot.slane %v1327_v43, 1  ;;  %v1297_v32 = vadd.f32 %v1296_v56, %v1295_v49  ;;  %v1348_v35 = vadd.f32 %v1347_v31, %v1346_v26  ;;  %v1341_v49 = vadd.f32 %v1340_v24, %v1339_v15  ;;  %v5390_v56 = vld [vmem:[#allocation7 + $0x258] sm:$0xff]   ;;  %v5392_v26 = vld [vmem:[#allocation7 + $0x260] sm:$0xff]  }
 0x440   :  { %v1335_v40 = vrot.slane %v1334_v30, 1  ;;  %v1304_v58 = vadd.f32 %v1303_v29, %v1302_v52  ;;  %v1318_v6 = vadd.f32 %v1317_v34, %v1316_v45  ;;  %v1309_v50 = vadd.f32 %v1308_v46, %v1307_v18  ;;  %v5388_v52 = vld [vmem:[#allocation7 + $0x250] sm:$0xff]   ;;  %v5394_v29 = vld [vmem:[#allocation7 + $0x268] sm:$0xff]  }
 0x441   :  { %v1329_v33 = vadd.f32 %v1328_v27, %v1327_v43  ;;  %v1349_v62 = vrot.slane %v1348_v35, 1  ;;  %v1342_v54 = vrot.slane %v1341_v49, 1  ;;  %v5391_v43 = vld [vmem:[#allocation7 + $0x2a0] sm:$0xff]   ;;  %v5393_v27 = vld [vmem:[#allocation7 + $0x2a8] sm:$0xff]  }
 0x442   :  { %v1336_v59 = vadd.f32 %v1335_v40, %v1334_v30  ;;  %v1310_v55 = vrot.slane %v1309_v50, 1  ;;  %v5395_v30 = vld [vmem:[#allocation7 + $0x2b0] sm:$0xff]   ;;  %v6184_v18 = vld [vmem:[#allocation5 + $0x6ac] ss:$16 sps:$4 sm:$0xff]  }
 0x443   :  { %v1351_v44 = vsel %vm309_vm1, %v1297_v32, %v1329_v33  ;;  %v1350_v7 = vadd.f32 %v1349_v62, %v1348_v35  ;;  %v1343_v57 = vadd.f32 %v1342_v54, %v1341_v49  ;;  %v5396_v32 = vld [vmem:[#allocation7 + $0x270] sm:$0xff]   ;;  %v5397_v33 = vld [vmem:[#allocation7 + $0x2b8] sm:$0xff]  }
 0x444   :  { %v1355_v60 = vpack.c.bf16 %v1351_v44, %v1351_v44  ;;  %v1352_v4 = vsel %vm309_vm1, %v1304_v58, %v1336_v59  ;;  %v1311_v45 = vadd.f32 %v1310_v55, %v1309_v50  ;;  %v5398_v35 = vld [vmem:[#allocation7 + $0x278] sm:$0xff]   ;;  %v6126_v58 = vld [vmem:[#allocation5 + $0x600] ss:$16 sps:$4 sm:$0xff]  }
 0x445   :  { %v1356_v9 = vpack.c.bf16 %v1352_v4, %v1352_v4  ;;  %v1354_v10 = vsel %vm309_vm1, %v1318_v6, %v1350_v7  ;;  %v6128_v59 = vld [vmem:[#allocation5 + $0x608] ss:$16 sps:$4 sm:$0xff]   ;;  %v6136_v62 = vld [vmem:[#allocation5 + $0x62c] ss:$16 sps:$4 sm:$0xff]   ;;  %v6150_v7 = vld [vmem:[#allocation5 + $0x640] ss:$16 sps:$4 sm:$0xff]  }
 0x446   :  { %v1359_v5 = vunpack.c.l.bf16 %v1355_v60  ;;  %v1358_v13 = vpack.c.bf16 %v1354_v10, %v1354_v10  ;;  %v1353_v28 = vsel %vm309_vm1, %v1311_v45, %v1343_v57  ;;  %v6148_v6 = vld [vmem:[#allocation5 + $0x64c] ss:$16 sps:$4 sm:$0xff]   ;;  %v6174_v15 = vld [vmem:[#allocation5 + $0x680] ss:$16 sps:$4 sm:$0xff]  }
 0x447   :  { %v1360_v12 = vunpack.c.l.bf16 %v1356_v9  ;;  %1675 = vmatprep.mubr.bf16.mxu1 %v1356_v9  ;;  %v1357_v31 = vpack.c.bf16 %v1353_v28, %v1353_v28  ;;  %v6158_v9 = vld [vmem:[#allocation5 + $0x664] ss:$16 sps:$4 sm:$0xff]   ;;  %v6200_v24 = vld [vmem:[#allocation5 + $0x6cc] ss:$16 sps:$4 sm:$0xff]  }
 0x448   :  { %1676 = vmatmul.mubr.bf16.vlgmr.msra.gmra.mrb[12].mxu1 %v1355_v60  ;;  %v1363_v14 = vsub.f32 %v1351_v44, %v1359_v5  ;;  %v1362_v17 = vunpack.c.l.bf16 %v1358_v13  ;;  %v6124_v44 = vld [vmem:[#allocation5 + $0x60c] ss:$16 sps:$4 sm:$0xff]   ;;  %v6134_v60 = vld [vmem:[#allocation5 + $0x624] ss:$16 sps:$4 sm:$0xff]  }
 0x449   :  { %v1364_v16 = vsub.f32 %v1352_v4, %v1360_v12  ;;  %1937 = vmatprep.mubr.bf16.mxu1 %v6598_v0  ;;  %v1361_v34 = vunpack.c.l.bf16 %v1357_v31  ;;  %v6140_v4 = vld [vmem:[#allocation5 + $0x628] ss:$16 sps:$4 sm:$0xff]   ;;  %v6146_v5 = vld [vmem:[#allocation5 + $0x644] ss:$16 sps:$4 sm:$0xff]   ;;  %v6205_v46 = vld [vmem:[#allocation5 + $0x6ec] ss:$16 sps:$4 sm:$0xff]  }
 0x44a   :  { %v1366_v21 = vsub.f32 %v1354_v10, %v1362_v17  ;;  %v1367_v22 = vpack.c.bf16 %v1363_v14, %v1363_v14  ;;  %v6160_v10 = vld [vmem:[#allocation5 + $0x66c] ss:$16 sps:$4 sm:$0xff]   ;;  %v6164_v12 = vld [vmem:[#allocation5 + $0x668] ss:$16 sps:$4 sm:$0xff]   ;;  %v6182_v17 = vld [vmem:[#allocation5 + $0x6a4] ss:$16 sps:$4 sm:$0xff]  }
 0x44b   :  { %v1368_v19 = vpack.c.bf16 %v1364_v16, %v1364_v16  ;;  %v1365_v40 = vsub.f32 %v1353_v28, %v1361_v34  ;;  %v6172_v14 = vld [vmem:[#allocation5 + $0x68c] ss:$16 sps:$4 sm:$0xff]   ;;  %v6176_v16 = vld [vmem:[#allocation5 + $0x688] ss:$16 sps:$4 sm:$0xff]  }
 0x44c   :  { %v1370_v25 = vpack.c.bf16 %v1366_v21, %v1366_v21  ;;  %v6194_v21 = vld [vmem:[#allocation5 + $0x6c0] ss:$16 sps:$4 sm:$0xff]  }
 0x44d   :  { %1595 = vmatprep.mubr.bf16.mxu0 %v1368_v19  ;;  %v1369_v42 = vpack.c.bf16 %v1365_v40, %v1365_v40  ;;  %v6186_v19 = vld [vmem:[#allocation5 + $0x6a0] ss:$16 sps:$4 sm:$0xff]  }
 0x44e   :  { %1596 = vmatmul.mubr.bf16.vlgmr.msra.gmra.mrb[12].mxu0 %v1367_v22  ;;  %v6196_v22 = vld [vmem:[#allocation5 + $0x6c4] ss:$16 sps:$4 sm:$0xff]  }
 0x44f   :  { %4933 = vmatpush3.bf16.msra.mxu0 %v5384_v20  ;;  %1635 = vmatprep.mubr.bf16.mxu0 %v1370_v25  ;;  %v6202_v25 = vld [vmem:[#allocation5 + $0x6e4] ss:$16 sps:$4 sm:$0xff]  }
 0x450   :  { %4934 = vmatprep.subr.bf16.mxu0 %v5385_v23 }
 0x453   :  { %4935 = vmatpush3.bf16.msra.mxu0 %v5386_v47 }
 0x454   :  { %4936 = vmatprep.subr.bf16.mxu0 %v5387_v48 }
 0x457   :  { %4937 = vmatpush3.bf16.msra.mxu0 %v5388_v52 }
 0x458   :  { %4938 = vmatprep.subr.bf16.mxu0 %v5389_v53 }
 0x45b   :  { %4939 = vmatpush3.bf16.msra.mxu0 %v5390_v56 }
 0x45c   :  { %4940 = vmatprep.subr.bf16.mxu0 %v5391_v43 }
 0x45f   :  { %4941 = vmatpush3.bf16.msra.mxu0 %v5392_v26 }
 0x460   :  { %4942 = vmatprep.subr.bf16.mxu0 %v5393_v27 }
 0x463   :  { %4943 = vmatpush3.bf16.msra.mxu0 %v5394_v29 }
 0x464   :  { %4944 = vmatprep.subr.bf16.mxu0 %v5395_v30 }
 0x467   :  { %4945 = vmatpush3.bf16.msra.mxu0 %v5396_v32 }
 0x468   :  { %4946 = vmatprep.subr.bf16.mxu0 %v5397_v33 }
 0x46b   :  { %4947 = vmatpush3.bf16.msra.mxu0 %v5398_v35 }
 0x46c   :  { %4976 = vmatprep.subr.bf16.mxu0 %v6076_v38  ;;  %v6122_v38 = vld [vmem:[#allocation5 + $0x604] ss:$16 sps:$4 sm:$0xff]  }
 0x46d   :  { %1905 = vmatprep.subr.bf16.mxu1 %v6122_v38 }
 0x46e   :  { %1636 = vmatmul.mubr.bf16.vlgmr.msra.gmra.mrb[16].mxu0 %v1369_v42  ;;  %1906 = vmatpush1.bf16.msra.mxu1 %v6126_v58 }
 0x46f   :  { %4977 = vmatpush3.bf16.msra.mxu0 %v5384_v20  ;;  %1715 = vmatprep.mubr.bf16.mxu0 %v1358_v13  ;;  %v6170_v13 = vld [vmem:[#allocation5 + $0x684] ss:$16 sps:$4 sm:$0xff]   ;;  %v6188_v20 = vld [vmem:[#allocation5 + $0x6a8] ss:$16 sps:$4 sm:$0xff]  }
 0x470   :  { %4978 = vmatprep.subr.bf16.mxu0 %v5385_v23  ;;  %1907 = vmatprep.subr.bf16.mxu1 %v6134_v60  ;;  %v6198_v23 = vld [vmem:[#allocation5 + $0x6c8] ss:$16 sps:$4 sm:$0xff]  }
 0x472   :  { %1908 = vmatpush1.bf16.msra.mxu1 %v6138_v63 }
 0x473   :  { %4979 = vmatpush3.bf16.msra.mxu0 %v5386_v47  ;;  %1909 = vmatprep.subr.bf16.mxu1 %v6146_v5  ;;  %v6210_v47 = vld [vmem:[#allocation5 + $0x6e0] ss:$16 sps:$4 sm:$0xff]  }
 0x474   :  { %4980 = vmatprep.subr.bf16.mxu0 %v5387_v48  ;;  %v6212_v48 = vld [vmem:[#allocation5 + $0x6e8] ss:$16 sps:$4 sm:$0xff]  }
 0x476   :  { %1910 = vmatpush1.bf16.msra.mxu1 %v6150_v7 }
 0x477   :  { %4981 = vmatpush3.bf16.msra.mxu0 %v5388_v52  ;;  %1911 = vmatprep.subr.bf16.mxu1 %v6158_v9 }
 0x478   :  { %4982 = vmatprep.subr.bf16.mxu0 %v5389_v53 }
 0x47a   :  { %1912 = vmatpush1.bf16.msra.mxu1 %v6162_v11 }
 0x47b   :  { %4983 = vmatpush3.bf16.msra.mxu0 %v5390_v56  ;;  %1913 = vmatprep.subr.bf16.mxu1 %v6170_v13 }
 0x47c   :  { %4984 = vmatprep.subr.bf16.mxu0 %v5391_v43 }
 0x47e   :  { %1914 = vmatpush1.bf16.msra.mxu1 %v6174_v15 }
 0x47f   :  { %4985 = vmatpush3.bf16.msra.mxu0 %v5392_v26  ;;  %1915 = vmatprep.subr.bf16.mxu1 %v6182_v17 }
 0x480   :  { %4986 = vmatprep.subr.bf16.mxu0 %v5393_v27 }
 0x482   :  { %1916 = vmatpush1.bf16.msra.mxu1 %v6186_v19 }
 0x483   :  { %4987 = vmatpush3.bf16.msra.mxu0 %v5394_v29  ;;  %1917 = vmatprep.subr.bf16.mxu1 %v6196_v22 }
 0x484   :  { %4988 = vmatprep.subr.bf16.mxu0 %v5395_v30 }
 0x486   :  { %1918 = vmatpush1.bf16.msra.mxu1 %v6194_v21 }
 0x487   :  { %4989 = vmatpush3.bf16.msra.mxu0 %v5396_v32  ;;  %1919 = vmatprep.subr.bf16.mxu1 %v6202_v25 }
 0x488   :  { %4990 = vmatprep.subr.bf16.mxu0 %v5397_v33 }
 0x48a   :  { %1920 = vmatpush1.bf16.msra.mxu1 %v6210_v47 }
 0x48b   :  { %4991 = vmatpush3.bf16.msra.mxu0 %v5398_v35  ;;  %1987 = vmatprep.subr.bf16.mxu1 %v6122_v38 }
 0x48c   :  { %1946 = vmatprep.subr.bf16.mxu0 %v6124_v44 }
 0x48e   :  { %1716 = vmatmul.mubr.bf16.vlgmr.msra.gmra.mrb[20].mxu0 %v1357_v31 }
 0x48f   :  { %1978 = vmatprep.mubr.bf16.mxu0 %v6598_v0  ;;  %1947 = vmatpush1.bf16.msra.mxu0 %v6128_v59 }
 0x490   :  { %1948 = vmatprep.subr.bf16.mxu0 %v6136_v62 }
 0x493   :  { %1949 = vmatpush1.bf16.msra.mxu0 %v6140_v4 }
 0x494   :  { %1950 = vmatprep.subr.bf16.mxu0 %v6148_v6 }
 0x497   :  { %1951 = vmatpush1.bf16.msra.mxu0 %v6152_v8 }
 0x498   :  { %1952 = vmatprep.subr.bf16.mxu0 %v6160_v10 }
 0x49b   :  { %1953 = vmatpush1.bf16.msra.mxu0 %v6164_v12 }
 0x49c   :  { %1954 = vmatprep.subr.bf16.mxu0 %v6172_v14 }
 0x49f   :  { %1955 = vmatpush1.bf16.msra.mxu0 %v6176_v16 }
 0x4a0   :  { %1956 = vmatprep.subr.bf16.mxu0 %v6184_v18 }
 0x4a3   :  { %1957 = vmatpush1.bf16.msra.mxu0 %v6188_v20 }
 0x4a4   :  { %1958 = vmatprep.subr.bf16.mxu0 %v6200_v24 }
 0x4a7   :  { %1959 = vmatpush1.bf16.msra.mxu0 %v6198_v23 }
 0x4a8   :  { %1960 = vmatprep.subr.bf16.mxu0 %v6205_v46 }
 0x4ab   :  { %1961 = vmatpush1.bf16.msra.mxu0 %v6212_v48 }
 0x4ac   :  { %2028 = vmatprep.subr.bf16.mxu0 %v6124_v44 }
 0x51b   :  { %v4970_v49 = vpop.f32.mrb[12].mxu1 }
 0x51c   :  { %v4971_v50 = vpop.f32.mrb[13].mxu1 }
 0x51d   :  { %v4972_v52 = vadd.f32 %v4971_v50, %v4970_v49  ;;  %v4973_v53 = vpop.f32.mrb[14].mxu1 }
 0x51e   :  { %v4974_v54 = vpop.f32.mrb[15].mxu1 }
 0x521   :  { %v4926_v55 = vpop.f32.mrb[12].mxu0 }
 0x522   :  { %v4927_v56 = vpop.f32.mrb[13].mxu0 }
 0x523   :  { %v4928_v43 = vadd.f32 %v4927_v56, %v4926_v55  ;;  %v4929_v57 = vpop.f32.mrb[14].mxu0  ;;  %v1289_v55 = vld [vmem:[#allocation8 + $0x5] ss:$0 sm:$0xff] }
 0x524   :  { %v4930_v45 = vpop.f32.mrb[15].mxu0 }
 0x541   :  { %v4948_v26 = vpop.f32.mrb[16].mxu0 }
 0x542   :  { %v4949_v27 = vpop.f32.mrb[17].mxu0 }
 0x543   :  { %v4950_v28 = vadd.f32 %v4949_v27, %v4948_v26  ;;  %v4951_v29 = vpop.f32.mrb[18].mxu0  ;;  %v1290_v26 = vld [vmem:[#allocation8 + $0x6] ss:$0 sm:$0xff] }
 0x544   :  { %v4952_v30 = vpop.f32.mrb[19].mxu0 }
 0x545   :  { %v1638_v31 = vadd.f32 %v4950_v28, %v4928_v43 }
 0x547   :  { %v1678_v32 = vadd.f32 %v4972_v52, %v1638_v31 }
 0x561   :  { %v4992_v33 = vpop.f32.mrb[20].mxu0 }
 0x562   :  { %v4993_v34 = vpop.f32.mrb[21].mxu0 }
 0x563   :  { %v4994_v35 = vadd.f32 %v4993_v34, %v4992_v33  ;;  %v4995_v40 = vpop.f32.mrb[22].mxu0  ;;  %v5489_v33 = vld [vmem:[#allocation5 + $0x2e0] ss:$16 sps:$4 sm:$0xff]   ;;  %v5492_v34 = vld [vmem:[#allocation5 + $0x2e8] ss:$16 sps:$4 sm:$0xff]  }
 0x564   :  { %v4996_v42 = vpop.f32.mrb[23].mxu0  ;;  %v5500_v40 = vld [vmem:[#allocation5 + $0x30c] ss:$16 sps:$4 sm:$0xff]  }
 0x565   :  { %v1718_v38 = vadd.f32 %v4994_v35, %v1678_v32  ;;  %v5497_v35 = vld [vmem:[#allocation5 + $0x304] ss:$16 sps:$4 sm:$0xff]   ;;  %v5495_v42 = vld [vmem:[#allocation5 + $0x300] ss:$16 sps:$4 sm:$0xff]  }
 0x567   :  { %v1723_v44 = vmul.f32 0.015625, %v1718_v38  ;;  %v5498_v38 = vld [vmem:[#allocation5 + $0x308] ss:$16 sps:$4 sm:$0xff]  }
 0x569   :  { %v1724_v49 = vmul.f32 %v1723_v44, %v1723_v44 }
 0x56b   :  { %v1726_v50 = vrot.slane %v1724_v49, 7  ;;  %v5506_v49 = vld [vmem:[#allocation5 + $0x32c] ss:$16 sps:$4 sm:$0xff]  }
 0x56d   :  { %v1728_v53 = vsub.f32 %v1723_v44, %v1726_v50  ;;  %v5501_v50 = vld [vmem:[#allocation5 + $0x320] ss:$16 sps:$4 sm:$0xff]  }
 0x56f   :  { %v1729_v54 = vadd.f32 1e-05, %v1728_v53  ;;  %v5504_v53 = vld [vmem:[#allocation5 + $0x328] ss:$16 sps:$4 sm:$0xff]  }
 0x571   :  { %5761 = vrsqrt.f32 %v1729_v54  ;;  %v5509_v54 = vld [vmem:[#allocation5 + $0x344] ss:$16 sps:$4 sm:$0xff]  }
 0x57b   :  { %v5762_v56 = vpop.eup %5761 }
 0x57c   :  { %v1731_v57 = vmul.f32 %v5762_v56, %v1289_v55  ;;  %v5512_v55 = vld [vmem:[#allocation5 + $0x34c] ss:$16 sps:$4 sm:$0xff]   ;;  %v5507_v56 = vld [vmem:[#allocation5 + $0x340] ss:$16 sps:$4 sm:$0xff]  }
 0x57e   :  { %v1733_v45 = vrot.slane %v1731_v57, 1  ;;  %v5510_v57 = vld [vmem:[#allocation5 + $0x348] ss:$16 sps:$4 sm:$0xff]  }
 0x580   :  { %v1735_v27 = vmul.f32 %v1733_v45, %v1723_v44  ;;  %v5503_v44 = vld [vmem:[#allocation5 + $0x324] ss:$16 sps:$4 sm:$0xff]  }
 0x582   :  { %v1736_v43 = vsub.f32 %v1290_v26, %v1735_v27  ;;  %v5518_v26 = vld [vmem:[#allocation5 + $0x36c] ss:$16 sps:$4 sm:$0xff]   ;;  %v5513_v27 = vld [vmem:[#allocation5 + $0x360] ss:$16 sps:$4 sm:$0xff]  }
 0x584   :  { %v1738_v52 = vrot.slane %v1736_v43, 7  ;;  %v5516_v43 = vld [vmem:[#allocation5 + $0x368] ss:$16 sps:$4 sm:$0xff]  }
 0x586   :  { %v1740_v28 = vsel %vm309_vm1, %v1733_v45, %v1738_v52  ;;  %v5515_v45 = vld [vmem:[#allocation5 + $0x364] ss:$16 sps:$4 sm:$0xff]  }
 0x587   :  { %v1741_v29 = vpack.c.bf16 %v1740_v28, %v1740_v28  ;;  %v5521_v52 = vld [vmem:[#allocation5 + $0x384] ss:$16 sps:$4 sm:$0xff]  }
 0x589   :  { %v1742_v30 = vunpack.c.l.bf16 %v1741_v29 }
 0x58b   :  { %v1743_v31 = vsub.f32 %v1740_v28, %v1742_v30  ;;  %v5524_v28 = vld [vmem:[#allocation5 + $0x38c] ss:$16 sps:$4 sm:$0xff]   ;;  %v5522_v30 = vld [vmem:[#allocation5 + $0x388] ss:$16 sps:$4 sm:$0xff]  }
 0x58d   :  { %v1744_v32 = vpack.c.bf16 %v1743_v31, %v1743_v31  ;;  %v5527_v31 = vld [vmem:[#allocation5 + $0x3a4] ss:$16 sps:$4 sm:$0xff]  }
 0x58f   :  { %1938 = vmatmul.mubr.bf16.vlgmr.msra.gmra.mrb[16].mxu1 %v1744_v32  ;;  %1979 = vmatmul.mubr.bf16.vlgmr.msra.gmra.mrb[24].mxu0 %v1744_v32  ;;  %v5530_v32 = vld [vmem:[#allocation5 + $0x3ac] ss:$16 sps:$4 sm:$0xff]  }
 0x590   :  { %1988 = vmatpush1.bf16.msra.mxu1 %v6126_v58  ;;  %2029 = vmatpush1.bf16.msra.mxu0 %v6128_v59  ;;  %v5449_v58 = vld [vmem:[#allocation5 + $0x204] ss:$16 sps:$4 sm:$0xff]   ;;  %v5452_v59 = vld [vmem:[#allocation5 + $0x20c] ss:$16 sps:$4 sm:$0xff]  }
 0x591   :  { %1989 = vmatprep.subr.bf16.mxu1 %v6134_v60  ;;  %2030 = vmatprep.subr.bf16.mxu0 %v6136_v62  ;;  %v5447_v60 = vld [vmem:[#allocation5 + $0x200] ss:$16 sps:$4 sm:$0xff]   ;;  %v5450_v62 = vld [vmem:[#allocation5 + $0x208] ss:$16 sps:$4 sm:$0xff]  }
 0x592   :  { %2019 = vmatprep.mubr.bf16.mxu1 %v6598_v0  ;;  %2060 = vmatprep.mubr.bf16.mxu0 %v6598_v0 }
 0x594   :  { %1990 = vmatpush1.bf16.msra.mxu1 %v6138_v63  ;;  %2031 = vmatpush1.bf16.msra.mxu0 %v6140_v4  ;;  %v5455_v63 = vld [vmem:[#allocation5 + $0x224] ss:$16 sps:$4 sm:$0xff]   ;;  %v5458_v4 = vld [vmem:[#allocation5 + $0x22c] ss:$16 sps:$4 sm:$0xff]  }
 0x595   :  { %1991 = vmatprep.subr.bf16.mxu1 %v6146_v5  ;;  %2032 = vmatprep.subr.bf16.mxu0 %v6148_v6  ;;  %v5453_v5 = vld [vmem:[#allocation5 + $0x220] ss:$16 sps:$4 sm:$0xff]   ;;  %v5456_v6 = vld [vmem:[#allocation5 + $0x228] ss:$16 sps:$4 sm:$0xff]  }
 0x598   :  { %1992 = vmatpush1.bf16.msra.mxu1 %v6150_v7  ;;  %2033 = vmatpush1.bf16.msra.mxu0 %v6152_v8  ;;  %v5461_v7 = vld [vmem:[#allocation5 + $0x244] ss:$16 sps:$4 sm:$0xff]   ;;  %v5464_v8 = vld [vmem:[#allocation5 + $0x24c] ss:$16 sps:$4 sm:$0xff]  }
 0x599   :  { %1993 = vmatprep.subr.bf16.mxu1 %v6158_v9  ;;  %2034 = vmatprep.subr.bf16.mxu0 %v6160_v10  ;;  %v5459_v9 = vld [vmem:[#allocation5 + $0x240] ss:$16 sps:$4 sm:$0xff]   ;;  %v5462_v10 = vld [vmem:[#allocation5 + $0x248] ss:$16 sps:$4 sm:$0xff]  }
 0x59c   :  { %1994 = vmatpush1.bf16.msra.mxu1 %v6162_v11  ;;  %2035 = vmatpush1.bf16.msra.mxu0 %v6164_v12  ;;  %v5467_v11 = vld [vmem:[#allocation5 + $0x264] ss:$16 sps:$4 sm:$0xff]   ;;  %v5470_v12 = vld [vmem:[#allocation5 + $0x26c] ss:$16 sps:$4 sm:$0xff]  }
 0x59d   :  { %1995 = vmatprep.subr.bf16.mxu1 %v6170_v13  ;;  %2036 = vmatprep.subr.bf16.mxu0 %v6172_v14  ;;  %v5465_v13 = vld [vmem:[#allocation5 + $0x260] ss:$16 sps:$4 sm:$0xff]   ;;  %v5468_v14 = vld [vmem:[#allocation5 + $0x268] ss:$16 sps:$4 sm:$0xff]  }
 0x5a0   :  { %1996 = vmatpush1.bf16.msra.mxu1 %v6174_v15  ;;  %2037 = vmatpush1.bf16.msra.mxu0 %v6176_v16  ;;  %v5473_v15 = vld [vmem:[#allocation5 + $0x284] ss:$16 sps:$4 sm:$0xff]   ;;  %v5476_v16 = vld [vmem:[#allocation5 + $0x28c] ss:$16 sps:$4 sm:$0xff]  }
 0x5a1   :  { %1997 = vmatprep.subr.bf16.mxu1 %v6182_v17  ;;  %2038 = vmatprep.subr.bf16.mxu0 %v6184_v18  ;;  %v5471_v17 = vld [vmem:[#allocation5 + $0x280] ss:$16 sps:$4 sm:$0xff]   ;;  %v5474_v18 = vld [vmem:[#allocation5 + $0x288] ss:$16 sps:$4 sm:$0xff]  }
 0x5a4   :  { %1998 = vmatpush1.bf16.msra.mxu1 %v6186_v19  ;;  %2039 = vmatpush1.bf16.msra.mxu0 %v6188_v20  ;;  %v5479_v19 = vld [vmem:[#allocation5 + $0x2a4] ss:$16 sps:$4 sm:$0xff]   ;;  %v5482_v20 = vld [vmem:[#allocation5 + $0x2ac] ss:$16 sps:$4 sm:$0xff]  }
 0x5a5   :  { %1999 = vmatprep.subr.bf16.mxu1 %v6196_v22  ;;  %2040 = vmatprep.subr.bf16.mxu0 %v6200_v24  ;;  %v5480_v22 = vld [vmem:[#allocation5 + $0x2a8] ss:$16 sps:$4 sm:$0xff]   ;;  %v5488_v24 = vld [vmem:[#allocation5 + $0x2cc] ss:$16 sps:$4 sm:$0xff]  }
 0x5a8   :  { %2000 = vmatpush1.bf16.msra.mxu1 %v6194_v21  ;;  %2041 = vmatpush1.bf16.msra.mxu0 %v6198_v23  ;;  %v5477_v21 = vld [vmem:[#allocation5 + $0x2a0] ss:$16 sps:$4 sm:$0xff]   ;;  %v5485_v23 = vld [vmem:[#allocation5 + $0x2c4] ss:$16 sps:$4 sm:$0xff]  }
 0x5a9   :  { %2001 = vmatprep.subr.bf16.mxu1 %v6202_v25  ;;  %2042 = vmatprep.subr.bf16.mxu0 %v6205_v46  ;;  %v5483_v25 = vld [vmem:[#allocation5 + $0x2c0] ss:$16 sps:$4 sm:$0xff]   ;;  %v5486_v46 = vld [vmem:[#allocation5 + $0x2c8] ss:$16 sps:$4 sm:$0xff]  }
 0x5ac   :  { %2002 = vmatpush1.bf16.msra.mxu1 %v6210_v47  ;;  %2043 = vmatpush1.bf16.msra.mxu0 %v6212_v48  ;;  %v5491_v47 = vld [vmem:[#allocation5 + $0x2e4] ss:$16 sps:$4 sm:$0xff]   ;;  %v5494_v48 = vld [vmem:[#allocation5 + $0x2ec] ss:$16 sps:$4 sm:$0xff]  }
 0x5ad   :  { %2908 = vmatprep.subr.bf16.mxu1 %v5449_v58  ;;  %2990 = vmatprep.subr.bf16.mxu0 %v5452_v59  ;;  %v5525_v58 = vld [vmem:[#allocation5 + $0x3a0] ss:$16 sps:$4 sm:$0xff]   ;;  %v5528_v59 = vld [vmem:[#allocation5 + $0x3a8] ss:$16 sps:$4 sm:$0xff]  }
 0x5af   :  { %2020 = vmatmul.mubr.bf16.vlgmr.msra.gmra.mrb[16].mxu1 %v1741_v29  ;;  %2061 = vmatmul.mubr.bf16.vlgmr.msra.gmra.mrb[24].mxu0 %v1741_v29  ;;  %v5519_v29 = vld [vmem:[#allocation5 + $0x380] ss:$16 sps:$4 sm:$0xff]  }
 0x5b0   :  { %2909 = vmatpush1.bf16.msra.mxu1 %v5447_v60  ;;  %2991 = vmatpush1.bf16.msra.mxu0 %v5450_v62  ;;  %v5533_v60 = vld [vmem:[#allocation5 + $0x3c4] ss:$16 sps:$4 sm:$0xff]   ;;  %v5536_v62 = vld [vmem:[#allocation5 + $0x3cc] ss:$16 sps:$4 sm:$0xff]  }
 0x5b1   :  { %2910 = vmatprep.subr.bf16.mxu1 %v5455_v63  ;;  %2992 = vmatprep.subr.bf16.mxu0 %v5458_v4  ;;  %v5531_v63 = vld [vmem:[#allocation5 + $0x3c0] ss:$16 sps:$4 sm:$0xff]   ;;  %v5534_v4 = vld [vmem:[#allocation5 + $0x3c8] ss:$16 sps:$4 sm:$0xff]  }
 0x5b4   :  { %2911 = vmatpush1.bf16.msra.mxu1 %v5453_v5  ;;  %2993 = vmatpush1.bf16.msra.mxu0 %v5456_v6  ;;  %v5539_v5 = vld [vmem:[#allocation5 + $0x3e4] ss:$16 sps:$4 sm:$0xff]   ;;  %v5542_v6 = vld [vmem:[#allocation5 + $0x3ec] ss:$16 sps:$4 sm:$0xff]  }
 0x5b5   :  { %2912 = vmatprep.subr.bf16.mxu1 %v5461_v7  ;;  %2994 = vmatprep.subr.bf16.mxu0 %v5464_v8  ;;  %v5537_v7 = vld [vmem:[#allocation5 + $0x3e0] ss:$16 sps:$4 sm:$0xff]   ;;  %v5540_v8 = vld [vmem:[#allocation5 + $0x3e8] ss:$16 sps:$4 sm:$0xff]  }
 0x5b8   :  { %2913 = vmatpush1.bf16.msra.mxu1 %v5459_v9  ;;  %2995 = vmatpush1.bf16.msra.mxu0 %v5462_v10  ;;  %v5545_v9 = vld [vmem:[#allocation5 + $0x404] ss:$16 sps:$4 sm:$0xff]   ;;  %v5548_v10 = vld [vmem:[#allocation5 + $0x40c] ss:$16 sps:$4 sm:$0xff]  }
 0x5b9   :  { %2914 = vmatprep.subr.bf16.mxu1 %v5467_v11  ;;  %2996 = vmatprep.subr.bf16.mxu0 %v5470_v12 }
 0x5bc   :  { %2915 = vmatpush1.bf16.msra.mxu1 %v5465_v13  ;;  %2997 = vmatpush1.bf16.msra.mxu0 %v5468_v14 }
 0x5bd   :  { %2916 = vmatprep.subr.bf16.mxu1 %v5473_v15  ;;  %2998 = vmatprep.subr.bf16.mxu0 %v5476_v16 }
 0x5c0   :  { %2917 = vmatpush1.bf16.msra.mxu1 %v5471_v17  ;;  %2999 = vmatpush1.bf16.msra.mxu0 %v5474_v18 }
 0x5c1   :  { %2918 = vmatprep.subr.bf16.mxu1 %v5479_v19  ;;  %3000 = vmatprep.subr.bf16.mxu0 %v5482_v20 }
 0x5c4   :  { %2919 = vmatpush1.bf16.msra.mxu1 %v5477_v21  ;;  %3001 = vmatpush1.bf16.msra.mxu0 %v5480_v22 }
 0x5c5   :  { %2920 = vmatprep.subr.bf16.mxu1 %v5485_v23  ;;  %3002 = vmatprep.subr.bf16.mxu0 %v5488_v24 }
 0x5c8   :  { %2921 = vmatpush1.bf16.msra.mxu1 %v5483_v25  ;;  %3003 = vmatpush1.bf16.msra.mxu0 %v5486_v46 }
 0x5c9   :  { %2922 = vmatprep.subr.bf16.mxu1 %v5491_v47  ;;  %3004 = vmatprep.subr.bf16.mxu0 %v5494_v48 }
 0x5cc   :  { %2923 = vmatpush1.bf16.msra.mxu1 %v5489_v33  ;;  %3005 = vmatpush1.bf16.msra.mxu0 %v5492_v34 }
 0x5cd   :  { %2924 = vmatprep.subr.bf16.mxu1 %v5497_v35  ;;  %3006 = vmatprep.subr.bf16.mxu0 %v5500_v40 }
 0x5d0   :  { %2925 = vmatpush1.bf16.msra.mxu1 %v5495_v42  ;;  %3007 = vmatpush1.bf16.msra.mxu0 %v5498_v38 }
 0x5d1   :  { %2926 = vmatprep.subr.bf16.mxu1 %v5503_v44  ;;  %3008 = vmatprep.subr.bf16.mxu0 %v5506_v49  ;;  %v5546_v44 = vld [vmem:[#allocation5 + $0x408] ss:$16 sps:$4 sm:$0xff]  }
 0x5d4   :  { %2927 = vmatpush1.bf16.msra.mxu1 %v5501_v50  ;;  %3009 = vmatpush1.bf16.msra.mxu0 %v5504_v53  ;;  %v5551_v50 = vld [vmem:[#allocation5 + $0x424] ss:$16 sps:$4 sm:$0xff]  }
 0x5d5   :  { %2928 = vmatprep.subr.bf16.mxu1 %v5509_v54  ;;  %3010 = vmatprep.subr.bf16.mxu0 %v5512_v55  ;;  %v5552_v54 = vld [vmem:[#allocation5 + $0x428] ss:$16 sps:$4 sm:$0xff]   ;;  %v5557_v55 = vld [vmem:[#allocation5 + $0x444] ss:$16 sps:$4 sm:$0xff]  }
 0x5d8   :  { %2929 = vmatpush1.bf16.msra.mxu1 %v5507_v56  ;;  %3011 = vmatpush1.bf16.msra.mxu0 %v5510_v57  ;;  %v5560_v56 = vld [vmem:[#allocation5 + $0x44c] ss:$16 sps:$4 sm:$0xff]   ;;  %v5555_v57 = vld [vmem:[#allocation5 + $0x440] ss:$16 sps:$4 sm:$0xff]  }
 0x5d9   :  { %2930 = vmatprep.subr.bf16.mxu1 %v5515_v45  ;;  %3012 = vmatprep.subr.bf16.mxu0 %v5518_v26  ;;  %v5558_v45 = vld [vmem:[#allocation5 + $0x448] ss:$16 sps:$4 sm:$0xff]   ;;  %v5563_v26 = vld [vmem:[#allocation5 + $0x464] ss:$16 sps:$4 sm:$0xff]  }
 0x5dc   :  { %2931 = vmatpush1.bf16.msra.mxu1 %v5513_v27  ;;  %3013 = vmatpush1.bf16.msra.mxu0 %v5516_v43  ;;  %v5566_v27 = vld [vmem:[#allocation5 + $0x46c] ss:$16 sps:$4 sm:$0xff]   ;;  %v5561_v43 = vld [vmem:[#allocation5 + $0x460] ss:$16 sps:$4 sm:$0xff]  }
 0x5dd   :  { %2932 = vmatprep.subr.bf16.mxu1 %v5521_v52  ;;  %3014 = vmatprep.subr.bf16.mxu0 %v5524_v28  ;;  %v5564_v52 = vld [vmem:[#allocation5 + $0x468] ss:$16 sps:$4 sm:$0xff]   ;;  %v5569_v28 = vld [vmem:[#allocation5 + $0x484] ss:$16 sps:$4 sm:$0xff]  }
 0x5e0   :  { %2933 = vmatpush1.bf16.msra.mxu1 %v5519_v29  ;;  %3015 = vmatpush1.bf16.msra.mxu0 %v5522_v30  ;;  %v5572_v29 = vld [vmem:[#allocation5 + $0x48c] ss:$16 sps:$4 sm:$0xff]   ;;  %v5567_v30 = vld [vmem:[#allocation5 + $0x480] ss:$16 sps:$4 sm:$0xff]  }
 0x5e1   :  { %2934 = vmatprep.subr.bf16.mxu1 %v5527_v31  ;;  %3016 = vmatprep.subr.bf16.mxu0 %v5530_v32  ;;  %v5570_v31 = vld [vmem:[#allocation5 + $0x488] ss:$16 sps:$4 sm:$0xff]   ;;  %v5575_v32 = vld [vmem:[#allocation5 + $0x4a4] ss:$16 sps:$4 sm:$0xff]  }
 0x5e4   :  { %2935 = vmatpush1.bf16.msra.mxu1 %v5525_v58  ;;  %3017 = vmatpush1.bf16.msra.mxu0 %v5528_v59  ;;  %v5578_v58 = vld [vmem:[#allocation5 + $0x4ac] ss:$16 sps:$4 sm:$0xff]   ;;  %v5573_v59 = vld [vmem:[#allocation5 + $0x4a0] ss:$16 sps:$4 sm:$0xff]  }
 0x5e5   :  { %2936 = vmatprep.subr.bf16.mxu1 %v5533_v60  ;;  %3018 = vmatprep.subr.bf16.mxu0 %v5536_v62  ;;  %v5576_v60 = vld [vmem:[#allocation5 + $0x4a8] ss:$16 sps:$4 sm:$0xff]   ;;  %v5581_v62 = vld [vmem:[#allocation5 + $0x4c4] ss:$16 sps:$4 sm:$0xff]  }
 0x5e8   :  { %2937 = vmatpush1.bf16.msra.mxu1 %v5531_v63  ;;  %3019 = vmatpush1.bf16.msra.mxu0 %v5534_v4  ;;  %v5584_v63 = vld [vmem:[#allocation5 + $0x4cc] ss:$16 sps:$4 sm:$0xff]   ;;  %v5579_v4 = vld [vmem:[#allocation5 + $0x4c0] ss:$16 sps:$4 sm:$0xff]  }
 0x5e9   :  { %2938 = vmatprep.subr.bf16.mxu1 %v5539_v5  ;;  %3020 = vmatprep.subr.bf16.mxu0 %v5542_v6  ;;  %v5582_v5 = vld [vmem:[#allocation5 + $0x4c8] ss:$16 sps:$4 sm:$0xff]   ;;  %v5587_v6 = vld [vmem:[#allocation5 + $0x4e4] ss:$16 sps:$4 sm:$0xff]  }
 0x5ec   :  { %2939 = vmatpush1.bf16.msra.mxu1 %v5537_v7  ;;  %3021 = vmatpush1.bf16.msra.mxu0 %v5540_v8  ;;  %v5590_v7 = vld [vmem:[#allocation5 + $0x4ec] ss:$16 sps:$4 sm:$0xff]   ;;  %v5585_v8 = vld [vmem:[#allocation5 + $0x4e0] ss:$16 sps:$4 sm:$0xff]  }
 0x5ed   :  { %2949 = vmatprep.subr.bf16.mxu1 %v5545_v9  ;;  %3031 = vmatprep.subr.bf16.mxu0 %v5548_v10  ;;  %v5588_v9 = vld [vmem:[#allocation5 + $0x4e8] ss:$16 sps:$4 sm:$0xff]   ;;  %v5593_v10 = vld [vmem:[#allocation5 + $0x504] ss:$16 sps:$4 sm:$0xff]  }
 0x682   :  { %v2021_v11 = vpop.f32.mrb[16].mxu1  ;;  %v6253_v12 = vpop.f32.mrb[24].mxu0 }
 0x683   :  { %v2072_v13 = vrot.slane %v2021_v11, %v5984_v37  ;;  %v2023_v14 = vpop.f32.mrb[17].mxu1  ;;  %v2064_v15 = vpop.f32.mrb[25].mxu0  ;;  %v2092_v21 = vrot.slane %v2021_v11, %v5987_v39  ;;  %v5596_v11 = vld [vmem:[#allocation5 + $0x50c] ss:$16 sps:$4 sm:$0xff]  }
 0x684   :  { %v2076_v16 = vrot.slane %v2023_v14, %v5984_v37  ;;  %v2084_v17 = vrot.slane %v2064_v15, %v5984_v37  ;;  %v2025_v18 = vpop.f32.mrb[18].mxu1  ;;  %v2066_v19 = vpop.f32.mrb[26].mxu0  ;;  %v2096_v25 = vrot.slane %v2023_v14, %v5987_v39  ;;  %v2104_v47 = vrot.slane %v2064_v15, %v5987_v39  ;;  %v5594_v14 = vld [vmem:[#allocation5 + $0x508] ss:$16 sps:$4 sm:$0xff]   ;;  %v5599_v15 = vld [vmem:[#allocation5 + $0x524] ss:$16 sps:$4 sm:$0xff]  }
 0x685   :  { %v2085_v20 = vmul.f32 %v2072_v13, %v6084_v61  ;;  %v2026_v22 = vpop.f32.mrb[19].mxu1  ;;  %v2067_v23 = vpop.f32.mrb[27].mxu0  ;;  %v5543_v61 = vld [vmem:[#allocation5 + $0x400] ss:$16 sps:$4 sm:$0xff]   ;;  %v5600_v18 = vld [vmem:[#allocation5 + $0x528] ss:$16 sps:$4 sm:$0xff]  }
 0x686   :  { %v2086_v24 = vmul.f32 %v2076_v16, %v6087_v2  ;;  %v2088_v46 = vmul.f32 %v2084_v17, %v6089_v3  ;;  %v5554_v2 = vld [vmem:[#allocation5 + $0x42c] ss:$16 sps:$4 sm:$0xff]   ;;  %v5549_v3 = vld [vmem:[#allocation5 + $0x420] ss:$16 sps:$4 sm:$0xff]   ;;  %v5605_v19 = vld [vmem:[#allocation5 + $0x544] ss:$16 sps:$4 sm:$0xff]  }
 0x687   :  { %v2105_v48 = vadd.f32 %v2092_v21, %v2085_v20  ;;  %v5591_v13 = vld [vmem:[#allocation5 + $0x500] ss:$16 sps:$4 sm:$0xff]   ;;  %v5602_v16 = vld [vmem:[#allocation5 + $0x52c] ss:$16 sps:$4 sm:$0xff]   ;;  %v5606_v22 = vld [vmem:[#allocation5 + $0x548] ss:$16 sps:$4 sm:$0xff]  }
 0x688   :  { %v2106_v33 = vadd.f32 %v2096_v25, %v2086_v24  ;;  %v2108_v34 = vadd.f32 %v2104_v47, %v2088_v46  ;;  %v5597_v17 = vld [vmem:[#allocation5 + $0x520] ss:$16 sps:$4 sm:$0xff]   ;;  %v5608_v20 = vld [vmem:[#allocation5 + $0x54c] ss:$16 sps:$4 sm:$0xff]   ;;  %v5611_v23 = vld [vmem:[#allocation5 + $0x564] ss:$16 sps:$4 sm:$0xff]  }
 0x689   :  { %v2109_v35 = vmax.f32 %v2105_v48, 0.0  ;;  %v5603_v21 = vld [vmem:[#allocation5 + $0x540] ss:$16 sps:$4 sm:$0xff]   ;;  %v5614_v24 = vld [vmem:[#allocation5 + $0x56c] ss:$16 sps:$4 sm:$0xff]  }
 0x68a   :  { %v2110_v40 = vmax.f32 %v2106_v33, 0.0  ;;  %v2112_v42 = vmax.f32 %v2108_v34, 0.0  ;;  %v5609_v25 = vld [vmem:[#allocation5 + $0x560] ss:$16 sps:$4 sm:$0xff]   ;;  %v5612_v46 = vld [vmem:[#allocation5 + $0x568] ss:$16 sps:$4 sm:$0xff]  }
 0x68b   :  { %v2241_v49 = vpack.c.bf16 %v2109_v35, %v2109_v35  ;;  %v5617_v47 = vld [vmem:[#allocation5 + $0x584] ss:$16 sps:$4 sm:$0xff]   ;;  %v5620_v48 = vld [vmem:[#allocation5 + $0x58c] ss:$16 sps:$4 sm:$0xff]   ;;  %v5615_v33 = vld [vmem:[#allocation5 + $0x580] ss:$16 sps:$4 sm:$0xff]   ;;  %v2080_v35 = vrot.slane %v6253_v12, %v5984_v37 }
 0x68c   :  { %v2242_v38 = vpack.c.bf16 %v2110_v40, %v2110_v40  ;;  %v2244_v53 = vpack.c.bf16 %v2112_v42, %v2112_v42  ;;  %v5618_v34 = vld [vmem:[#allocation5 + $0x588] ss:$16 sps:$4 sm:$0xff]   ;;  %v5623_v40 = vld [vmem:[#allocation5 + $0x5a4] ss:$16 sps:$4 sm:$0xff]   ;;  %v5626_v42 = vld [vmem:[#allocation5 + $0x5ac] ss:$16 sps:$4 sm:$0xff]  }
 0x68e   :  { %2940 = vmatprep.mubr.bf16.mxu1 %v2242_v38  ;;  %3022 = vmatprep.mubr.bf16.mxu0 %v2242_v38  ;;  %v5621_v38 = vld [vmem:[#allocation5 + $0x5a0] ss:$16 sps:$4 sm:$0xff]  }
 0x68f   :  { %2941 = vmatmul.mubr.bf16.vlgmr.msra.gmra.mrb[20].mxu1 %v2241_v49  ;;  %3023 = vmatmul.mubr.bf16.vlgmr.msra.gmra.mrb[28].mxu0 %v2241_v49  ;;  %v5629_v49 = vld [vmem:[#allocation5 + $0x5c4] ss:$16 sps:$4 sm:$0xff]  }
 0x690   :  { %2950 = vmatpush1.bf16.msra.mxu1 %v5543_v61  ;;  %3032 = vmatpush1.bf16.msra.mxu0 %v5546_v44  ;;  %v5624_v61 = vld [vmem:[#allocation5 + $0x5a8] ss:$16 sps:$4 sm:$0xff]   ;;  %v2087_v44 = vmul.f32 %v2080_v35, %v6108_v51 }
 0x691   :  { %2981 = vmatprep.mubr.bf16.mxu1 %v2244_v53  ;;  %3063 = vmatprep.mubr.bf16.mxu0 %v2244_v53  ;;  %v5627_v53 = vld [vmem:[#allocation5 + $0x5c0] ss:$16 sps:$4 sm:$0xff]   ;;  %v5636_v51 = vld [vmem:[#allocation5 + $0x5e8] ss:$16 sps:$4 sm:$0xff]  }
 0x692   :  { %2951 = vmatprep.subr.bf16.mxu1 %v5551_v50  ;;  %3033 = vmatprep.subr.bf16.mxu0 %v5554_v2  ;;  %v5632_v50 = vld [vmem:[#allocation5 + $0x5cc] ss:$16 sps:$4 sm:$0xff]   ;;  %v2100_v2 = vrot.slane %v6253_v12, %v5987_v39  ;;  %v6273_v12 = vld [vmem:[#allocation7 + $0x2c0] sm:$0xff]  }
 0x694   :  { %2952 = vmatpush1.bf16.msra.mxu1 %v5549_v3  ;;  %3034 = vmatpush1.bf16.msra.mxu0 %v5552_v54  ;;  %v5630_v3 = vld [vmem:[#allocation5 + $0x5c8] ss:$16 sps:$4 sm:$0xff]   ;;  %v2107_v54 = vadd.f32 %v2100_v2, %v2087_v44 }
 0x695   :  { %2953 = vmatprep.subr.bf16.mxu1 %v5557_v55  ;;  %3035 = vmatprep.subr.bf16.mxu0 %v5560_v56  ;;  %v5635_v55 = vld [vmem:[#allocation5 + $0x5e4] ss:$16 sps:$4 sm:$0xff]   ;;  %v5638_v56 = vld [vmem:[#allocation5 + $0x5ec] ss:$16 sps:$4 sm:$0xff]  }
 0x698   :  { %2954 = vmatpush1.bf16.msra.mxu1 %v5555_v57  ;;  %3036 = vmatpush1.bf16.msra.mxu0 %v5558_v45  ;;  %v5633_v57 = vld [vmem:[#allocation5 + $0x5e0] ss:$16 sps:$4 sm:$0xff]   ;;  %v2111_v45 = vmax.f32 %v2107_v54, 0.0 }
 0x699   :  { %2955 = vmatprep.subr.bf16.mxu1 %v5563_v26  ;;  %3037 = vmatprep.subr.bf16.mxu0 %v5566_v27  ;;  %v6269_v26 = vld [vmem:[#allocation7 + $0x300] sm:$0xff]  }
 0x69a   :  { %v6271_v27 = vld [vmem:[#allocation7 + $0x380] sm:$0xff]  }
 0x69c   :  { %2956 = vmatpush1.bf16.msra.mxu1 %v5561_v43  ;;  %3038 = vmatpush1.bf16.msra.mxu0 %v5564_v52  ;;  %v6275_v43 = vld [vmem:[#allocation7 + $0x340] sm:$0xff]   ;;  %v2243_v52 = vpack.c.bf16 %v2111_v45, %v2111_v45 }
 0x69d   :  { %2957 = vmatprep.subr.bf16.mxu1 %v5569_v28  ;;  %3039 = vmatprep.subr.bf16.mxu0 %v5572_v29  ;;  %v6281_v28 = vld [vmem:[#allocation7 + $0x308] sm:$0xff]  }
 0x69e   :  { %v6283_v29 = vld [vmem:[#allocation7 + $0x388] sm:$0xff]  }
 0x6a0   :  { %2958 = vmatpush1.bf16.msra.mxu1 %v5567_v30  ;;  %3040 = vmatpush1.bf16.msra.mxu0 %v5570_v31  ;;  %v6287_v30 = vld [vmem:[#allocation7 + $0x2c8] sm:$0xff]  }
 0x6a1   :  { %2959 = vmatprep.subr.bf16.mxu1 %v5575_v32  ;;  %3041 = vmatprep.subr.bf16.mxu0 %v5578_v58  ;;  %v6289_v31 = vld [vmem:[#allocation7 + $0x348] sm:$0xff]   ;;  %v6293_v32 = vld [vmem:[#allocation7 + $0x310] sm:$0xff]  }
 0x6a2   :  { %v6295_v58 = vld [vmem:[#allocation7 + $0x390] sm:$0xff]  }
 0x6a4   :  { %2960 = vmatpush1.bf16.msra.mxu1 %v5573_v59  ;;  %3042 = vmatpush1.bf16.msra.mxu0 %v5576_v60  ;;  %v6297_v59 = vld [vmem:[#allocation7 + $0x2d0] sm:$0xff]  }
 0x6a5   :  { %2961 = vmatprep.subr.bf16.mxu1 %v5581_v62  ;;  %3043 = vmatprep.subr.bf16.mxu0 %v5584_v63  ;;  %v6299_v60 = vld [vmem:[#allocation7 + $0x350] sm:$0xff]   ;;  %v6305_v62 = vld [vmem:[#allocation7 + $0x318] sm:$0xff]  }
 0x6a6   :  { %v6307_v63 = vld [vmem:[#allocation7 + $0x398] sm:$0xff]  }
 0x6a8   :  { %2962 = vmatpush1.bf16.msra.mxu1 %v5579_v4  ;;  %3044 = vmatpush1.bf16.msra.mxu0 %v5582_v5  ;;  %v6309_v4 = vld [vmem:[#allocation7 + $0x2d8] sm:$0xff]  }
 0x6a9   :  { %2963 = vmatprep.subr.bf16.mxu1 %v5587_v6  ;;  %3045 = vmatprep.subr.bf16.mxu0 %v5590_v7  ;;  %v6311_v5 = vld [vmem:[#allocation7 + $0x358] sm:$0xff]   ;;  %v6317_v6 = vld [vmem:[#allocation7 + $0x320] sm:$0xff]  }
 0x6aa   :  { %v6319_v7 = vld [vmem:[#allocation7 + $0x3a0] sm:$0xff]  }
 0x6ac   :  { %2964 = vmatpush1.bf16.msra.mxu1 %v5585_v8  ;;  %3046 = vmatpush1.bf16.msra.mxu0 %v5588_v9  ;;  %v6321_v8 = vld [vmem:[#allocation7 + $0x2e0] sm:$0xff]  }
 0x6ad   :  { %2965 = vmatprep.subr.bf16.mxu1 %v5593_v10  ;;  %3047 = vmatprep.subr.bf16.mxu0 %v5596_v11  ;;  %v6323_v9 = vld [vmem:[#allocation7 + $0x360] sm:$0xff]   ;;  %v6329_v10 = vld [vmem:[#allocation7 + $0x328] sm:$0xff]  }
 0x6ae   :  { %v6331_v11 = vld [vmem:[#allocation7 + $0x3a8] sm:$0xff]  }
 0x6b0   :  { %2966 = vmatpush1.bf16.msra.mxu1 %v5591_v13  ;;  %3048 = vmatpush1.bf16.msra.mxu0 %v5594_v14  ;;  %v6333_v13 = vld [vmem:[#allocation7 + $0x2e8] sm:$0xff]  }
 0x6b1   :  { %2967 = vmatprep.subr.bf16.mxu1 %v5599_v15  ;;  %3049 = vmatprep.subr.bf16.mxu0 %v5602_v16  ;;  %v6335_v14 = vld [vmem:[#allocation7 + $0x368] sm:$0xff]   ;;  %v6337_v15 = vld [vmem:[#allocation7 + $0x330] sm:$0xff]  }
 0x6b2   :  { %v6339_v16 = vld [vmem:[#allocation7 + $0x3b0] sm:$0xff]  }
 0x6b4   :  { %2968 = vmatpush1.bf16.msra.mxu1 %v5597_v17  ;;  %3050 = vmatpush1.bf16.msra.mxu0 %v5600_v18  ;;  %v6345_v17 = vld [vmem:[#allocation7 + $0x2f0] sm:$0xff]  }
 0x6b5   :  { %2969 = vmatprep.subr.bf16.mxu1 %v5605_v19  ;;  %3051 = vmatprep.subr.bf16.mxu0 %v5608_v20  ;;  %v6347_v18 = vld [vmem:[#allocation7 + $0x370] sm:$0xff]   ;;  %v6351_v19 = vld [vmem:[#allocation7 + $0x338] sm:$0xff]  }
 0x6b6   :  { %v6353_v20 = vld [vmem:[#allocation7 + $0x3b8] sm:$0xff]  }
 0x6b8   :  { %2970 = vmatpush1.bf16.msra.mxu1 %v5603_v21  ;;  %3052 = vmatpush1.bf16.msra.mxu0 %v5606_v22  ;;  %v6357_v21 = vld [vmem:[#allocation7 + $0x2f8] sm:$0xff]  }
 0x6b9   :  { %2971 = vmatprep.subr.bf16.mxu1 %v5611_v23  ;;  %3053 = vmatprep.subr.bf16.mxu0 %v5614_v24  ;;  %v6359_v22 = vld [vmem:[#allocation7 + $0x378] sm:$0xff]  }
 0x6ba   :  { %v2246_v23 = vld [vmem:[#allocation8 + $0x2] ss:$8 sm:$0xf] }
 0x6bb   :  { %v2251_v24 = vrot.slane %v2246_v23, %v5984_v37 }
 0x6bc   :  { %2972 = vmatpush1.bf16.msra.mxu1 %v5609_v25  ;;  %3054 = vmatpush1.bf16.msra.mxu0 %v5612_v46  ;;  %v2259_v25 = vrot.slane %v2246_v23, %v781_v1  ;;  %v2255_v46 = vrot.slane %v2246_v23, %v5987_v39 }
 0x6bd   :  { %2973 = vmatprep.subr.bf16.mxu1 %v5617_v47  ;;  %3055 = vmatprep.subr.bf16.mxu0 %v5620_v48  ;;  %v2263_v47 = vrot.slane %v2246_v23, %v785_v41 }
 0x6c0   :  { %2974 = vmatpush1.bf16.msra.mxu1 %v5615_v33  ;;  %3056 = vmatpush1.bf16.msra.mxu0 %v5618_v34 }
 0x6c1   :  { %2975 = vmatprep.subr.bf16.mxu1 %v5623_v40  ;;  %3057 = vmatprep.subr.bf16.mxu0 %v5626_v42 }
 0x6c4   :  { %2976 = vmatpush1.bf16.msra.mxu1 %v5621_v38  ;;  %3058 = vmatpush1.bf16.msra.mxu0 %v5624_v61 }
 0x6c5   :  { %2977 = vmatprep.subr.bf16.mxu1 %v5629_v49  ;;  %3059 = vmatprep.subr.bf16.mxu0 %v5632_v50 }
 0x6c8   :  { %2978 = vmatpush1.bf16.msra.mxu1 %v5627_v53  ;;  %3060 = vmatpush1.bf16.msra.mxu0 %v5630_v3 }
 0x6c9   :  { %2979 = vmatprep.subr.bf16.mxu1 %v5635_v55  ;;  %3061 = vmatprep.subr.bf16.mxu0 %v5638_v56 }
 0x6cc   :  { %2980 = vmatpush1.bf16.msra.mxu1 %v5633_v57  ;;  %3062 = vmatpush1.bf16.msra.mxu0 %v5636_v51 }
 0x6cd   :  { %4998 = vmatprep.subr.bf16.mxu1 %v6269_v26  ;;  %5020 = vmatprep.subr.bf16.mxu0 %v6271_v27 }
 0x6cf   :  { %2982 = vmatmul.mubr.bf16.vlgmr.msra.gmra.mrb[20].mxu1 %v2243_v52  ;;  %3064 = vmatmul.mubr.bf16.vlgmr.msra.gmra.mrb[28].mxu0 %v2243_v52 }
 0x6d0   :  { %4999 = vmatpush3.bf16.msra.mxu1 %v6273_v12  ;;  %5021 = vmatpush3.bf16.msra.mxu0 %v6275_v43 }
 0x6d1   :  { %5000 = vmatprep.subr.bf16.mxu1 %v6281_v28  ;;  %5022 = vmatprep.subr.bf16.mxu0 %v6283_v29 }
 0x6d4   :  { %5001 = vmatpush3.bf16.msra.mxu1 %v6287_v30  ;;  %5023 = vmatpush3.bf16.msra.mxu0 %v6289_v31 }
 0x6d5   :  { %5002 = vmatprep.subr.bf16.mxu1 %v6293_v32  ;;  %5024 = vmatprep.subr.bf16.mxu0 %v6295_v58 }
 0x6d8   :  { %5003 = vmatpush3.bf16.msra.mxu1 %v6297_v59  ;;  %5025 = vmatpush3.bf16.msra.mxu0 %v6299_v60 }
 0x6d9   :  { %5004 = vmatprep.subr.bf16.mxu1 %v6305_v62  ;;  %5026 = vmatprep.subr.bf16.mxu0 %v6307_v63 }
 0x6dc   :  { %5005 = vmatpush3.bf16.msra.mxu1 %v6309_v4  ;;  %5027 = vmatpush3.bf16.msra.mxu0 %v6311_v5 }
 0x6dd   :  { %5006 = vmatprep.subr.bf16.mxu1 %v6317_v6  ;;  %5028 = vmatprep.subr.bf16.mxu0 %v6319_v7 }
 0x6e0   :  { %5007 = vmatpush3.bf16.msra.mxu1 %v6321_v8  ;;  %5029 = vmatpush3.bf16.msra.mxu0 %v6323_v9 }
 0x6e1   :  { %5008 = vmatprep.subr.bf16.mxu1 %v6329_v10  ;;  %5030 = vmatprep.subr.bf16.mxu0 %v6331_v11 }
 0x6e4   :  { %5009 = vmatpush3.bf16.msra.mxu1 %v6333_v13  ;;  %5031 = vmatpush3.bf16.msra.mxu0 %v6335_v14 }
 0x6e5   :  { %5010 = vmatprep.subr.bf16.mxu1 %v6337_v15  ;;  %5032 = vmatprep.subr.bf16.mxu0 %v6339_v16 }
 0x6e8   :  { %5011 = vmatpush3.bf16.msra.mxu1 %v6345_v17  ;;  %5033 = vmatpush3.bf16.msra.mxu0 %v6347_v18 }
 0x6e9   :  { %5012 = vmatprep.subr.bf16.mxu1 %v6351_v19  ;;  %5034 = vmatprep.subr.bf16.mxu0 %v6353_v20 }
 0x6ec   :  { %5013 = vmatpush3.bf16.msra.mxu1 %v6357_v21  ;;  %5035 = vmatpush3.bf16.msra.mxu0 %v6359_v22 }
 0x6ed   :  { %5042 = vmatprep.subr.bf16.mxu1 %v6269_v26  ;;  %5064 = vmatprep.subr.bf16.mxu0 %v6271_v27 }
 0x7a2   :  { %v2983_v48 = vpop.f32.mrb[20].mxu1  ;;  %v3065_v33 = vpop.f32.mrb[28].mxu0 }
 0x7a3   :  { %v6373_v34 = vadd.f32 %v2983_v48, %v2251_v24  ;;  %v6375_v35 = vadd.f32 %v3065_v33, %v2259_v25  ;;  %v2985_v40 = vpop.f32.mrb[21].mxu1  ;;  %v3067_v42 = vpop.f32.mrb[29].mxu0 }
 0x7a4   :  { %v6377_v38 = vadd.f32 %v2985_v40, %v2255_v46  ;;  %v6379_v61 = vadd.f32 %v3067_v42, %v2263_v47  ;;  %v2987_v44 = vpop.f32.mrb[22].mxu1  ;;  %v3069_v49 = vpop.f32.mrb[30].mxu0 }
 0x7a5   :  { %6606 = vst [vmem:[#allocation16_spill] sm:$0xff] %v6375_v35  ;;  %v3170_v1 = vsel %vm278_vm0, %v6373_v34, 0.0  ;;  %v3198_v36 = vmul.f32 %v6373_v34, %v6373_v34  ;;  %v3184_v41 = vsel %vm278_vm0, %v6375_v35, 0.0  ;;  %v3200_v50 = vmul.f32 %v6375_v35, %v6375_v35  ;;  %v2988_v2 = vpop.f32.mrb[23].mxu1  ;;  %v3070_v53 = vpop.f32.mrb[31].mxu0 }
 0x7a6   :  { %6607 = vst [vmem:[#allocation17_spill] sm:$0xff] %v6377_v38  ;;  %6608 = vst [vmem:[#allocation18_spill] sm:$0xff] %v6379_v61  ;;  %v3171_v3 = vrot.slane %v3170_v1, 4  ;;  %v3185_v54 = vrot.slane %v3184_v41, 4  ;;  %v3177_v55 = vsel %vm278_vm0, %v6377_v38, 0.0  ;;  %v3199_v56 = vmul.f32 %v6377_v38, %v6377_v38 }
 0x7a7   :  { %v3202_v57 = vsel %vm278_vm0, %v3198_v36, 0.0  ;;  %v3216_v51 = vsel %vm278_vm0, %v3200_v50, 0.0  ;;  %v3178_v45 = vrot.slane %v3177_v55, 4  ;;  %v3191_v26 = vsel %vm278_vm0, %v6379_v61, 0.0 }
 0x7a8   :  { %v3172_v27 = vadd.f32 %v3171_v3, %v3170_v1  ;;  %v3203_v52 = vrot.slane %v3202_v57, 4  ;;  %v3186_v23 = vadd.f32 %v3185_v54, %v3184_v41  ;;  %v3217_v24 = vrot.slane %v3216_v51, 4 }
 0x7a9   :  { %v3179_v25 = vadd.f32 %v3178_v45, %v3177_v55  ;;  %v3209_v46 = vsel %vm278_vm0, %v3199_v56, 0.0  ;;  %v3192_v47 = vrot.slane %v3191_v26, 4  ;;  %v3201_v48 = vmul.f32 %v6379_v61, %v6379_v61 }
 0x7aa   :  { %v3173_v33 = vrot.slane %v3172_v27, 2  ;;  %v3204_v40 = vadd.f32 %v3203_v52, %v3202_v57  ;;  %v3187_v42 = vrot.slane %v3186_v23, 2  ;;  %v3218_v44 = vadd.f32 %v3217_v24, %v3216_v51 }
 0x7ab   :  { %v3180_v49 = vrot.slane %v3179_v25, 2  ;;  %v3210_v36 = vrot.slane %v3209_v46, 4  ;;  %v3193_v50 = vadd.f32 %v3192_v47, %v3191_v26  ;;  %v3223_v2 = vsel %vm278_vm0, %v3201_v48, 0.0 }
 0x7ac   :  { %v3174_v1 = vadd.f32 %v3173_v33, %v3172_v27  ;;  %v3205_v53 = vrot.slane %v3204_v40, 2  ;;  %v3188_v41 = vadd.f32 %v3187_v42, %v3186_v23  ;;  %v3219_v3 = vrot.slane %v3218_v44, 2 }
 0x7ad   :  { %v3181_v54 = vadd.f32 %v3180_v49, %v3179_v25  ;;  %v3211_v55 = vadd.f32 %v3210_v36, %v3209_v46  ;;  %v3194_v56 = vrot.slane %v3193_v50, 2  ;;  %v3224_v45 = vrot.slane %v3223_v2, 4 }
 0x7ae   :  { %v3175_v0 = vrot.slane %v3174_v1, 1  ;;  %v3206_v38 = vadd.f32 %v3205_v53, %v3204_v40  ;;  %v3189_v61 = vrot.slane %v3188_v41, 1  ;;  %v3220_v35 = vadd.f32 %v3219_v3, %v3218_v44 }
 0x7af   :  { %v3212_v57 = vrot.slane %v3211_v55, 2  ;;  %v3195_v52 = vadd.f32 %v3194_v56, %v3193_v50  ;;  %v3225_v51 = vadd.f32 %v3224_v45, %v3223_v2  ;;  %v3182_v26 = vrot.slane %v3181_v54, 1 }
 0x7b0   :  { %v3207_v24 = vrot.slane %v3206_v38, 1  ;;  %v3221_v39 = vrot.slane %v3220_v35, 1  ;;  %v3176_v27 = vadd.f32 %v3175_v0, %v3174_v1  ;;  %v3190_v23 = vadd.f32 %v3189_v61, %v3188_v41 }
 0x7b1   :  { %v3213_v47 = vadd.f32 %v3212_v57, %v3211_v55  ;;  %v3226_v48 = vrot.slane %v3225_v51, 2  ;;  %v3196_v25 = vrot.slane %v3195_v52, 1  ;;  %v3183_v36 = vadd.f32 %v3182_v26, %v3181_v54 }
 0x7b2   :  { %v3208_v33 = vadd.f32 %v3207_v24, %v3206_v38  ;;  %v3222_v42 = vadd.f32 %v3221_v39, %v3220_v35 }
 0x7b3   :  { %v3227_v46 = vadd.f32 %v3226_v48, %v3225_v51  ;;  %v3214_v49 = vrot.slane %v3213_v47, 1  ;;  %v3197_v55 = vadd.f32 %v3196_v25, %v3195_v52  ;;  %v6520_v52 = vld [vmem:[#allocation5 + $0x7ec] ss:$16 sps:$4 sm:$0xff]  }
 0x7b4   :  { %v3230_v40 = vsel %vm309_vm1, %v3176_v27, %v3208_v33  ;;  %v3232_v44 = vsel %vm309_vm1, %v3190_v23, %v3222_v42  ;;  %v6525_v33 = vld [vmem:[#allocation5 + $0x7e0] ss:$16 sps:$4 sm:$0xff]   ;;  %v6527_v23 = vld [vmem:[#allocation5 + $0x7e8] ss:$16 sps:$4 sm:$0xff]  }
 0x7b5   :  { %v3215_v53 = vadd.f32 %v3214_v49, %v3213_v47  ;;  %v3228_v50 = vrot.slane %v3227_v46, 1  ;;  %v3234_v2 = vpack.c.bf16 %v3230_v40, %v3230_v40  ;;  %v3236_v3 = vpack.c.bf16 %v3232_v44, %v3232_v44 }
 0x7b7   :  { %v3231_v56 = vsel %vm309_vm1, %v3183_v36, %v3215_v53  ;;  %v3229_v45 = vadd.f32 %v3228_v50, %v3227_v46  ;;  %v3238_v0 = vunpack.c.l.bf16 %v3234_v2  ;;  %v3240_v35 = vunpack.c.l.bf16 %v3236_v3 }
 0x7b8   :  { %v3235_v38 = vpack.c.bf16 %v3231_v56, %v3231_v56 }
 0x7b9   :  { %v3233_v39 = vsel %vm309_vm1, %v3197_v55, %v3229_v45  ;;  %v3242_v41 = vsub.f32 %v3230_v40, %v3238_v0  ;;  %v3244_v51 = vsub.f32 %v3232_v44, %v3240_v35 }
 0x7ba   :  { %v3239_v61 = vunpack.c.l.bf16 %v3235_v38  ;;  %v3237_v1 = vpack.c.bf16 %v3233_v39, %v3233_v39 }
 0x7bb   :  { %v3246_v47 = vpack.c.bf16 %v3242_v41, %v3242_v41  ;;  %v3248_v27 = vpack.c.bf16 %v3244_v51, %v3244_v51 }
 0x7bc   :  { %v3243_v54 = vsub.f32 %v3231_v56, %v3239_v61  ;;  %v3241_v57 = vunpack.c.l.bf16 %v3237_v1 }
 0x7be   :  { %v3247_v24 = vpack.c.bf16 %v3243_v54, %v3243_v54  ;;  %v3245_v26 = vsub.f32 %v3233_v39, %v3241_v57 }
 0x7c0   :  { %3474 = vmatprep.mubr.bf16.mxu1 %v3247_v24  ;;  %v3249_v48 = vpack.c.bf16 %v3245_v26, %v3245_v26 }
 0x7c1   :  { %3475 = vmatmul.mubr.bf16.vlgmr.msra.gmra.mrb[24].mxu1 %v3246_v47 }
 0x7c2   :  { %3514 = vmatprep.mubr.bf16.mxu0 %v3249_v48  ;;  %5043 = vmatpush3.bf16.msra.mxu1 %v6273_v12  ;;  %v6609_v12 = vmov 0  }
 0x7c3   :  { %3515 = vmatmul.mubr.bf16.vlgmr.msra.gmra.mrb[32].mxu0 %v3248_v27  ;;  %3554 = vmatprep.mubr.bf16.mxu1 %v3235_v38  ;;  %v3168_v27 = vld [vmem:[#allocation8 + $0x7] ss:$0 sm:$0xff] }
 0x7c4   :  { %5065 = vmatpush3.bf16.msra.mxu0 %v6275_v43  ;;  %3594 = vmatprep.mubr.bf16.mxu0 %v3237_v1  ;;  %v6437_v43 = vld [vmem:[#allocation5 + $0x704] ss:$16 sps:$4 sm:$0xff]  }
 0x7c5   :  { %5044 = vmatprep.subr.bf16.mxu1 %v6281_v28  ;;  %5066 = vmatprep.subr.bf16.mxu0 %v6283_v29  ;;  %v6439_v28 = vld [vmem:[#allocation5 + $0x70c] ss:$16 sps:$4 sm:$0xff]   ;;  %v6441_v29 = vld [vmem:[#allocation5 + $0x700] ss:$16 sps:$4 sm:$0xff]  }
 0x7c6   :  { %5045 = vmatpush3.bf16.msra.mxu1 %v6287_v30  ;;  %v6443_v30 = vld [vmem:[#allocation5 + $0x708] ss:$16 sps:$4 sm:$0xff]  }
 0x7c7   :  { %5046 = vmatprep.subr.bf16.mxu1 %v6293_v32  ;;  %v6451_v32 = vld [vmem:[#allocation5 + $0x72c] ss:$16 sps:$4 sm:$0xff]  }
 0x7c8   :  { %5067 = vmatpush3.bf16.msra.mxu0 %v6289_v31  ;;  %v6449_v31 = vld [vmem:[#allocation5 + $0x724] ss:$16 sps:$4 sm:$0xff]  }
 0x7c9   :  { %5068 = vmatprep.subr.bf16.mxu0 %v6295_v58  ;;  %v6453_v58 = vld [vmem:[#allocation5 + $0x720] ss:$16 sps:$4 sm:$0xff]  }
 0x7ca   :  { %5047 = vmatpush3.bf16.msra.mxu1 %v6297_v59  ;;  %v6455_v59 = vld [vmem:[#allocation5 + $0x728] ss:$16 sps:$4 sm:$0xff]  }
 0x7cb   :  { %5048 = vmatprep.subr.bf16.mxu1 %v6305_v62  ;;  %v6463_v62 = vld [vmem:[#allocation5 + $0x74c] ss:$16 sps:$4 sm:$0xff]  }
 0x7cc   :  { %5069 = vmatpush3.bf16.msra.mxu0 %v6299_v60  ;;  %v6461_v60 = vld [vmem:[#allocation5 + $0x744] ss:$16 sps:$4 sm:$0xff]  }
 0x7cd   :  { %5070 = vmatprep.subr.bf16.mxu0 %v6307_v63  ;;  %v6465_v63 = vld [vmem:[#allocation5 + $0x740] ss:$16 sps:$4 sm:$0xff]  }
 0x7ce   :  { %5049 = vmatpush3.bf16.msra.mxu1 %v6309_v4  ;;  %v6467_v4 = vld [vmem:[#allocation5 + $0x748] ss:$16 sps:$4 sm:$0xff]  }
 0x7cf   :  { %5050 = vmatprep.subr.bf16.mxu1 %v6317_v6  ;;  %v6475_v6 = vld [vmem:[#allocation5 + $0x76c] ss:$16 sps:$4 sm:$0xff]  }
 0x7d0   :  { %5071 = vmatpush3.bf16.msra.mxu0 %v6311_v5  ;;  %v6473_v5 = vld [vmem:[#allocation5 + $0x764] ss:$16 sps:$4 sm:$0xff]  }
 0x7d1   :  { %5072 = vmatprep.subr.bf16.mxu0 %v6319_v7  ;;  %v6477_v7 = vld [vmem:[#allocation5 + $0x760] ss:$16 sps:$4 sm:$0xff]  }
 0x7d2   :  { %5051 = vmatpush3.bf16.msra.mxu1 %v6321_v8  ;;  %v6479_v8 = vld [vmem:[#allocation5 + $0x768] ss:$16 sps:$4 sm:$0xff]  }
 0x7d3   :  { %5052 = vmatprep.subr.bf16.mxu1 %v6329_v10  ;;  %v6487_v10 = vld [vmem:[#allocation5 + $0x78c] ss:$16 sps:$4 sm:$0xff]  }
 0x7d4   :  { %5073 = vmatpush3.bf16.msra.mxu0 %v6323_v9  ;;  %v6485_v9 = vld [vmem:[#allocation5 + $0x784] ss:$16 sps:$4 sm:$0xff]  }
 0x7d5   :  { %5074 = vmatprep.subr.bf16.mxu0 %v6331_v11  ;;  %v6489_v11 = vld [vmem:[#allocation5 + $0x780] ss:$16 sps:$4 sm:$0xff]  }
 0x7d6   :  { %5053 = vmatpush3.bf16.msra.mxu1 %v6333_v13  ;;  %v6491_v13 = vld [vmem:[#allocation5 + $0x788] ss:$16 sps:$4 sm:$0xff]  }
 0x7d7   :  { %5054 = vmatprep.subr.bf16.mxu1 %v6337_v15  ;;  %v6499_v15 = vld [vmem:[#allocation5 + $0x7ac] ss:$16 sps:$4 sm:$0xff]  }
 0x7d8   :  { %5075 = vmatpush3.bf16.msra.mxu0 %v6335_v14  ;;  %v6497_v14 = vld [vmem:[#allocation5 + $0x7a4] ss:$16 sps:$4 sm:$0xff]  }
 0x7d9   :  { %5076 = vmatprep.subr.bf16.mxu0 %v6339_v16  ;;  %v6501_v16 = vld [vmem:[#allocation5 + $0x7a0] ss:$16 sps:$4 sm:$0xff]  }
 0x7da   :  { %5055 = vmatpush3.bf16.msra.mxu1 %v6345_v17  ;;  %v6503_v17 = vld [vmem:[#allocation5 + $0x7a8] ss:$16 sps:$4 sm:$0xff]  }
 0x7db   :  { %5056 = vmatprep.subr.bf16.mxu1 %v6351_v19  ;;  %v6511_v19 = vld [vmem:[#allocation5 + $0x7c0] ss:$16 sps:$4 sm:$0xff]  }
 0x7dc   :  { %5077 = vmatpush3.bf16.msra.mxu0 %v6347_v18  ;;  %v6507_v18 = vld [vmem:[#allocation5 + $0x7c4] ss:$16 sps:$4 sm:$0xff]  }
 0x7dd   :  { %5078 = vmatprep.subr.bf16.mxu0 %v6353_v20  ;;  %v6513_v20 = vld [vmem:[#allocation5 + $0x7c8] ss:$16 sps:$4 sm:$0xff]  }
 0x7de   :  { %5057 = vmatpush3.bf16.msra.mxu1 %v6357_v21  ;;  %v6515_v21 = vld [vmem:[#allocation5 + $0x7cc] ss:$16 sps:$4 sm:$0xff]  }
 0x7df   :  { %3784 = vmatprep.subr.bf16.mxu1 %v6437_v43 }
 0x7e0   :  { %5079 = vmatpush3.bf16.msra.mxu0 %v6359_v22  ;;  %v6518_v22 = vld [vmem:[#allocation5 + $0x7e4] ss:$16 sps:$4 sm:$0xff]  }
 0x7e1   :  { %3555 = vmatmul.mubr.bf16.vlgmr.msra.gmra.mrb[28].mxu1 %v3234_v2  ;;  %3825 = vmatprep.subr.bf16.mxu0 %v6439_v28 }
 0x7e2   :  { %3816 = vmatprep.mubr.bf16.mxu1 %v6609_v12  ;;  %3785 = vmatpush1.bf16.msra.mxu1 %v6441_v29 }
 0x7e3   :  { %3595 = vmatmul.mubr.bf16.vlgmr.msra.gmra.mrb[36].mxu0 %v3236_v3  ;;  %3786 = vmatprep.subr.bf16.mxu1 %v6449_v31 }
 0x7e4   :  { %3857 = vmatprep.mubr.bf16.mxu0 %v6609_v12  ;;  %3826 = vmatpush1.bf16.msra.mxu0 %v6443_v30 }
 0x7e5   :  { %3827 = vmatprep.subr.bf16.mxu0 %v6451_v32 }
 0x7e6   :  { %3787 = vmatpush1.bf16.msra.mxu1 %v6453_v58 }
 0x7e7   :  { %3788 = vmatprep.subr.bf16.mxu1 %v6461_v60 }
 0x7e8   :  { %3828 = vmatpush1.bf16.msra.mxu0 %v6455_v59 }
 0x7e9   :  { %3829 = vmatprep.subr.bf16.mxu0 %v6463_v62 }
 0x7ea   :  { %3789 = vmatpush1.bf16.msra.mxu1 %v6465_v63 }
 0x7eb   :  { %3790 = vmatprep.subr.bf16.mxu1 %v6473_v5 }
 0x7ec   :  { %3830 = vmatpush1.bf16.msra.mxu0 %v6467_v4 }
 0x7ed   :  { %3831 = vmatprep.subr.bf16.mxu0 %v6475_v6 }
 0x7ee   :  { %3791 = vmatpush1.bf16.msra.mxu1 %v6477_v7 }
 0x7ef   :  { %3792 = vmatprep.subr.bf16.mxu1 %v6485_v9 }
 0x7f0   :  { %3832 = vmatpush1.bf16.msra.mxu0 %v6479_v8 }
 0x7f1   :  { %3833 = vmatprep.subr.bf16.mxu0 %v6487_v10 }
 0x7f2   :  { %3793 = vmatpush1.bf16.msra.mxu1 %v6489_v11 }
 0x7f3   :  { %3794 = vmatprep.subr.bf16.mxu1 %v6497_v14 }
 0x7f4   :  { %3834 = vmatpush1.bf16.msra.mxu0 %v6491_v13 }
 0x7f5   :  { %3835 = vmatprep.subr.bf16.mxu0 %v6499_v15 }
 0x7f6   :  { %3795 = vmatpush1.bf16.msra.mxu1 %v6501_v16 }
 0x7f7   :  { %3796 = vmatprep.subr.bf16.mxu1 %v6507_v18 }
 0x7f8   :  { %3836 = vmatpush1.bf16.msra.mxu0 %v6503_v17 }
 0x7f9   :  { %3837 = vmatprep.subr.bf16.mxu0 %v6515_v21 }
 0x7fa   :  { %3797 = vmatpush1.bf16.msra.mxu1 %v6511_v19 }
 0x7fb   :  { %3798 = vmatprep.subr.bf16.mxu1 %v6518_v22 }
 0x7fc   :  { %3838 = vmatpush1.bf16.msra.mxu0 %v6513_v20 }
 0x7fd   :  { %3839 = vmatprep.subr.bf16.mxu0 %v6520_v52 }
 0x7fe   :  { %3799 = vmatpush1.bf16.msra.mxu1 %v6525_v33 }
 0x7ff   :  { %3866 = vmatprep.subr.bf16.mxu1 %v6437_v43 }
 0x800   :  { %3840 = vmatpush1.bf16.msra.mxu0 %v6527_v23 }
 0x801   :  { %3907 = vmatprep.subr.bf16.mxu0 %v6439_v28 }
 0x894   :  { %v5014_v42 = vpop.f32.mrb[24].mxu1 }
 0x895   :  { %v5015_v25 = vpop.f32.mrb[25].mxu1 }
 0x896   :  { %v5036_v46 = vpop.f32.mrb[32].mxu0  ;;  %v5016_v49 = vadd.f32 %v5015_v25, %v5014_v42  ;;  %v5017_v36 = vpop.f32.mrb[26].mxu1  ;;  %v3169_v25 = vld [vmem:[#allocation8 + $0x20] ss:$0 sm:$0xff] }
 0x897   :  { %v5037_v40 = vpop.f32.mrb[33].mxu0  ;;  %v5018_v44 = vpop.f32.mrb[27].mxu1 }
 0x898   :  { %v5038_v53 = vadd.f32 %v5037_v40, %v5036_v46  ;;  %v5039_v50 = vpop.f32.mrb[34].mxu0 }
 0x899   :  { %v5040_v2 = vpop.f32.mrb[35].mxu0 }
 0x89a   :  { %v3517_v3 = vadd.f32 %v5038_v53, %v5016_v49 }
 0x8b4   :  { %v5058_v56 = vpop.f32.mrb[28].mxu1 }
 0x8b5   :  { %v5059_v55 = vpop.f32.mrb[29].mxu1 }
 0x8b6   :  { %v5080_v45 = vpop.f32.mrb[36].mxu0  ;;  %v5060_v0 = vadd.f32 %v5059_v55, %v5058_v56  ;;  %v5061_v38 = vpop.f32.mrb[30].mxu1  ;;  %v5896_v56 = vmov 0.0  }
 0x8b7   :  { %v5081_v39 = vpop.f32.mrb[37].mxu0  ;;  %v5062_v35 = vpop.f32.mrb[31].mxu1 }
 0x8b8   :  { %v3557_v61 = vadd.f32 %v5060_v0, %v3517_v3  ;;  %v5082_v1 = vadd.f32 %v5081_v39, %v5080_v45  ;;  %v5083_v41 = vpop.f32.mrb[38].mxu0  ;;  %v5750_v3 = vld [vmem:[#allocation7 + $0xb8] sm:$0xff]  }
 0x8b9   :  { %v5084_v54 = vpop.f32.mrb[39].mxu0 }
 0x8ba   :  { %v3597_v57 = vadd.f32 %v5082_v1, %v3557_v61 }
 0x8bc   :  { %v3602_v51 = vmul.f32 0.033333335, %v3597_v57 }
 0x8be   :  { %v3603_v24 = vmul.f32 %v3602_v51, %v3602_v51 }
 0x8c0   :  { %v3605_v26 = vrot.slane %v3603_v24, 7 }
 0x8c2   :  { %v3607_v47 = vsub.f32 %v3602_v51, %v3605_v26  ;;  %v6611_v26 = vld [vmem:[#allocation16_spill] sm:$0xff] }
 0x8c4   :  { %v3608_v48 = vadd.f32 1e-05, %v3607_v47 }
 0x8c6   :  { %5763 = vrsqrt.f32 %v3608_v48 }
 0x8d0   :  { %v5764_v43 = vpop.eup %5763 }
 0x8d1   :  { %v3610_v28 = vmul.f32 %v5764_v43, %v3168_v27 }
 0x8d3   :  { %v3612_v42 = vrot.slane %v3610_v28, 1  ;;  %v6612_v28 = vld [vmem:[#allocation17_spill] sm:$0xff] }
 0x8d5   :  { %v3614_v46 = vmul.f32 %v3612_v42, %v3602_v51  ;;  %v6610_v51 = vld [vmem:[#allocation15_spill] sm:$0xff] }
 0x8d7   :  { %v3615_v49 = vsub.f32 %v3169_v25, %v3614_v46  ;;  %v6613_v46 = vld [vmem:[#allocation18_spill] sm:$0xff] }
 0x8d9   :  { %v3617_v36 = vrot.slane %v3615_v49, 7 }
 0x8db   :  { %v3619_v40 = vsel %vm309_vm1, %v3612_v42, %v3617_v36 }
 0x8dc   :  { %v3620_v44 = vpack.c.bf16 %v3619_v40, %v3619_v40 }
 0x8de   :  { %v3621_v53 = vunpack.c.l.bf16 %v3620_v44 }
 0x8e0   :  { %v3622_v50 = vsub.f32 %v3619_v40, %v3621_v53 }
 0x8e2   :  { %v3623_v2 = vpack.c.bf16 %v3622_v50, %v3622_v50 }
 0x8e4   :  { %3817 = vmatmul.mubr.bf16.vlgmr.msra.gmra.mrb[32].mxu1 %v3623_v2  ;;  %3858 = vmatmul.mubr.bf16.vlgmr.msra.gmra.mrb[40].mxu0 %v3623_v2 }
 0x8e5   :  { %3867 = vmatpush1.bf16.msra.mxu1 %v6441_v29  ;;  %3908 = vmatpush1.bf16.msra.mxu0 %v6443_v30  ;;  %v5720_v29 = vld [vmem:[#allocation7 + $0xc0] sm:$0xff]  }
 0x8e6   :  { %3868 = vmatprep.subr.bf16.mxu1 %v6449_v31  ;;  %3909 = vmatprep.subr.bf16.mxu0 %v6451_v32  ;;  %v5721_v30 = vld [vmem:[#allocation7] sm:$0xff]   ;;  %v5723_v32 = vld [vmem:[#allocation7 + $0x48] sm:$0xff]  }
 0x8e7   :  { %3898 = vmatprep.mubr.bf16.mxu1 %v6609_v12  ;;  %3939 = vmatprep.mubr.bf16.mxu0 %v6609_v12  ;;  %v5719_v12 = vld [vmem:[#allocation7 + $0x40] sm:$0xff]  }
 0x8e8   :  { %v5722_v31 = vld [vmem:[#allocation7 + $0x80] sm:$0xff]  }
 0x8e9   :  { %3869 = vmatpush1.bf16.msra.mxu1 %v6453_v58  ;;  %3910 = vmatpush1.bf16.msra.mxu0 %v6455_v59  ;;  %v5724_v58 = vld [vmem:[#allocation7 + $0xc8] sm:$0xff]  }
 0x8ea   :  { %3870 = vmatprep.subr.bf16.mxu1 %v6461_v60  ;;  %3911 = vmatprep.subr.bf16.mxu0 %v6463_v62  ;;  %v5725_v59 = vld [vmem:[#allocation7 + $0x8] sm:$0xff]   ;;  %v5727_v62 = vld [vmem:[#allocation7 + $0x50] sm:$0xff]  }
 0x8eb   :  { %v5726_v60 = vld [vmem:[#allocation7 + $0x88] sm:$0xff]  }
 0x8ed   :  { %3871 = vmatpush1.bf16.msra.mxu1 %v6465_v63  ;;  %3912 = vmatpush1.bf16.msra.mxu0 %v6467_v4  ;;  %v5728_v63 = vld [vmem:[#allocation7 + $0xd0] sm:$0xff]  }
 0x8ee   :  { %3872 = vmatprep.subr.bf16.mxu1 %v6473_v5  ;;  %3913 = vmatprep.subr.bf16.mxu0 %v6475_v6  ;;  %v5729_v4 = vld [vmem:[#allocation7 + $0x10] sm:$0xff]   ;;  %v5731_v6 = vld [vmem:[#allocation7 + $0x58] sm:$0xff]  }
 0x8ef   :  { %v5730_v5 = vld [vmem:[#allocation7 + $0x90] sm:$0xff]  }
 0x8f1   :  { %3873 = vmatpush1.bf16.msra.mxu1 %v6477_v7  ;;  %3914 = vmatpush1.bf16.msra.mxu0 %v6479_v8  ;;  %v5732_v7 = vld [vmem:[#allocation7 + $0xd8] sm:$0xff]  }
 0x8f2   :  { %3874 = vmatprep.subr.bf16.mxu1 %v6485_v9  ;;  %3915 = vmatprep.subr.bf16.mxu0 %v6487_v10  ;;  %v5733_v8 = vld [vmem:[#allocation7 + $0x18] sm:$0xff]   ;;  %v5735_v10 = vld [vmem:[#allocation7 + $0x60] sm:$0xff]  }
 0x8f3   :  { %v5734_v9 = vld [vmem:[#allocation7 + $0x98] sm:$0xff]  }
 0x8f5   :  { %3875 = vmatpush1.bf16.msra.mxu1 %v6489_v11  ;;  %3916 = vmatpush1.bf16.msra.mxu0 %v6491_v13  ;;  %v5736_v11 = vld [vmem:[#allocation7 + $0xe0] sm:$0xff]  }
 0x8f6   :  { %3876 = vmatprep.subr.bf16.mxu1 %v6497_v14  ;;  %3917 = vmatprep.subr.bf16.mxu0 %v6499_v15  ;;  %v5737_v13 = vld [vmem:[#allocation7 + $0x20] sm:$0xff]   ;;  %v5739_v15 = vld [vmem:[#allocation7 + $0x68] sm:$0xff]  }
 0x8f7   :  { %v5738_v14 = vld [vmem:[#allocation7 + $0xa0] sm:$0xff]  }
 0x8f9   :  { %3877 = vmatpush1.bf16.msra.mxu1 %v6501_v16  ;;  %3918 = vmatpush1.bf16.msra.mxu0 %v6503_v17  ;;  %v5740_v16 = vld [vmem:[#allocation7 + $0xe8] sm:$0xff]  }
 0x8fa   :  { %3878 = vmatprep.subr.bf16.mxu1 %v6507_v18  ;;  %3919 = vmatprep.subr.bf16.mxu0 %v6515_v21  ;;  %v5741_v17 = vld [vmem:[#allocation7 + $0x28] sm:$0xff]   ;;  %v5745_v21 = vld [vmem:[#allocation7 + $0x30] sm:$0xff]  }
 0x8fb   :  { %v5742_v18 = vld [vmem:[#allocation7 + $0xa8] sm:$0xff]  }
 0x8fd   :  { %3879 = vmatpush1.bf16.msra.mxu1 %v6511_v19  ;;  %3920 = vmatpush1.bf16.msra.mxu0 %v6513_v20  ;;  %v5743_v19 = vld [vmem:[#allocation7 + $0x70] sm:$0xff]  }
 0x8fe   :  { %3880 = vmatprep.subr.bf16.mxu1 %v6518_v22  ;;  %3921 = vmatprep.subr.bf16.mxu0 %v6520_v52  ;;  %v5744_v20 = vld [vmem:[#allocation7 + $0xf0] sm:$0xff]   ;;  %v5747_v52 = vld [vmem:[#allocation7 + $0x78] sm:$0xff]  }
 0x8ff   :  { %v5746_v22 = vld [vmem:[#allocation7 + $0xb0] sm:$0xff]  }
 0x901   :  { %3881 = vmatpush1.bf16.msra.mxu1 %v6525_v33  ;;  %3922 = vmatpush1.bf16.msra.mxu0 %v6527_v23  ;;  %v5748_v33 = vld [vmem:[#allocation7 + $0xf8] sm:$0xff]  }
 0x902   :  { %5086 = vmatprep.subr.bf16.mxu1 %v5719_v12  ;;  %5108 = vmatprep.subr.bf16.mxu0 %v5720_v29  ;;  %v5749_v23 = vld [vmem:[#allocation7 + $0x38] sm:$0xff]  }
 0x904   :  { %3899 = vmatmul.mubr.bf16.vlgmr.msra.gmra.mrb[32].mxu1 %v3620_v44  ;;  %3940 = vmatmul.mubr.bf16.vlgmr.msra.gmra.mrb[40].mxu0 %v3620_v44 }
 0x905   :  { %5087 = vmatpush3.bf16.msra.mxu1 %v5721_v30  ;;  %5109 = vmatpush3.bf16.msra.mxu0 %v5722_v31  ;;  %v5751_v31 = vld [vmem:[#allocation7 + $0x100] sm:$0xff]  }
 0x906   :  { %5088 = vmatprep.subr.bf16.mxu1 %v5723_v32  ;;  %5110 = vmatprep.subr.bf16.mxu0 %v5724_v58 }
 0x909   :  { %5089 = vmatpush3.bf16.msra.mxu1 %v5725_v59  ;;  %5111 = vmatpush3.bf16.msra.mxu0 %v5726_v60  ;;  %v5752_v59 = vld [vmem:[#allocation7 + $0x108] sm:$0xff]   ;;  %v5753_v60 = vld [vmem:[#allocation7 + $0x110] sm:$0xff]  }
 0x90a   :  { %5090 = vmatprep.subr.bf16.mxu1 %v5727_v62  ;;  %5112 = vmatprep.subr.bf16.mxu0 %v5728_v63  ;;  %v5754_v62 = vld [vmem:[#allocation7 + $0x118] sm:$0xff]   ;;  %v5755_v63 = vld [vmem:[#allocation7 + $0x120] sm:$0xff]  }
 0x90d   :  { %5091 = vmatpush3.bf16.msra.mxu1 %v5729_v4  ;;  %5113 = vmatpush3.bf16.msra.mxu0 %v5730_v5  ;;  %v5756_v4 = vld [vmem:[#allocation7 + $0x128] sm:$0xff]   ;;  %v5757_v5 = vld [vmem:[#allocation7 + $0x130] sm:$0xff]  }
 0x90e   :  { %5092 = vmatprep.subr.bf16.mxu1 %v5731_v6  ;;  %5114 = vmatprep.subr.bf16.mxu0 %v5732_v7  ;;  %v5758_v6 = vld [vmem:[#allocation7 + $0x138] sm:$0xff]  }
 0x911   :  { %5093 = vmatpush3.bf16.msra.mxu1 %v5733_v8  ;;  %5115 = vmatpush3.bf16.msra.mxu0 %v5734_v9  ;;  %v4060_v9 = vld [vmem:[#allocation8 + $0x21] ss:$0 sm:$0xff] }
 0x912   :  { %5094 = vmatprep.subr.bf16.mxu1 %v5735_v10  ;;  %5116 = vmatprep.subr.bf16.mxu0 %v5736_v11 }
 0x915   :  { %5095 = vmatpush3.bf16.msra.mxu1 %v5737_v13  ;;  %5117 = vmatpush3.bf16.msra.mxu0 %v5738_v14 }
 0x916   :  { %5096 = vmatprep.subr.bf16.mxu1 %v5739_v15  ;;  %5118 = vmatprep.subr.bf16.mxu0 %v5740_v16 }
 0x919   :  { %5097 = vmatpush3.bf16.msra.mxu1 %v5741_v17  ;;  %5119 = vmatpush3.bf16.msra.mxu0 %v5742_v18 }
 0x91a   :  { %5098 = vmatprep.subr.bf16.mxu1 %v5743_v19  ;;  %5120 = vmatprep.subr.bf16.mxu0 %v5744_v20 }
 0x91d   :  { %5099 = vmatpush3.bf16.msra.mxu1 %v5745_v21  ;;  %5121 = vmatpush3.bf16.msra.mxu0 %v5746_v22 }
 0x91e   :  { %5100 = vmatprep.subr.bf16.mxu1 %v5747_v52  ;;  %5122 = vmatprep.subr.bf16.mxu0 %v5748_v33  ;;  %v4351_v52 = vld [vmem:[#allocation8 + $0x22] ss:$0 sm:$0xff] }
 0x921   :  { %5101 = vmatpush3.bf16.msra.mxu1 %v5749_v23  ;;  %5123 = vmatpush3.bf16.msra.mxu0 %v5750_v3 }
 0x922   :  { %5139 = vmatprep.subr.bf16.mxu1 %v5896_v56 }
 0x9d7   :  { %v3900_v55 = vpop.f32.mrb[32].mxu1  ;;  %v3941_v45 = vpop.f32.mrb[40].mxu0 }
 0x9d8   :  { %v3951_v0 = vrot.slane %v3900_v55, %v5984_v37  ;;  %v3959_v38 = vrot.slane %v3941_v45, %v5984_v37  ;;  %v3902_v39 = vpop.f32.mrb[33].mxu1  ;;  %v3943_v35 = vpop.f32.mrb[41].mxu0  ;;  %v3971_v24 = vrot.slane %v3900_v55, %v6610_v51  ;;  %v3979_v48 = vrot.slane %v3941_v45, %v6610_v51 }
 0x9d9   :  { %v3955_v61 = vrot.slane %v3902_v39, %v5984_v37  ;;  %v3963_v1 = vrot.slane %v3943_v35, %v5984_v37  ;;  %v3904_v41 = vpop.f32.mrb[34].mxu1  ;;  %v3945_v54 = vpop.f32.mrb[42].mxu0  ;;  %v3975_v25 = vrot.slane %v3902_v39, %v6610_v51  ;;  %v3983_v37 = vrot.slane %v3943_v35, %v6610_v51 }
 0x9da   :  { %v3964_v57 = vmul.f32 %v6373_v34, %v3951_v0  ;;  %v3966_v47 = vmul.f32 %v6611_v26, %v3959_v38  ;;  %v3905_v27 = vpop.f32.mrb[35].mxu1  ;;  %v3946_v43 = vpop.f32.mrb[43].mxu0 }
 0x9db   :  { %v3965_v42 = vmul.f32 %v6612_v28, %v3955_v61  ;;  %v3967_v49 = vmul.f32 %v6613_v46, %v3963_v1 }
 0x9dc   :  { %v3984_v36 = vadd.f32 %v3971_v24, %v3964_v57  ;;  %v3986_v40 = vadd.f32 %v3979_v48, %v3966_v47 }
 0x9dd   :  { %v3985_v44 = vadd.f32 %v3975_v25, %v3965_v42  ;;  %v3987_v34 = vadd.f32 %v3983_v37, %v3967_v49 }
 0x9de   :  { %v3988_v53 = vmax.f32 %v3984_v36, 0.0  ;;  %v3990_v50 = vmax.f32 %v3986_v40, 0.0 }
 0x9df   :  { %v3989_v2 = vmax.f32 %v3985_v44, 0.0  ;;  %v3991_v12 = vmax.f32 %v3987_v34, 0.0 }
 0x9e0   :  { %v4056_v32 = vpack.c.bf16 %v3988_v53, %v3988_v53  ;;  %v4058_v58 = vpack.c.bf16 %v3990_v50, %v3990_v50 }
 0x9e1   :  { %v4057_v29 = vpack.c.bf16 %v3989_v2, %v3989_v2  ;;  %v4059_v30 = vpack.c.bf16 %v3991_v12, %v3991_v12 }
 0x9e3   :  { %4285 = vmatprep.mubr.bf16.mxu1 %v4057_v29  ;;  %4325 = vmatprep.mubr.bf16.mxu0 %v4059_v30 }
 0x9e4   :  { %4286 = vmatmul.mubr.bf16.vlgmr.msra.gmra.mrb[36].mxu1 %v4056_v32  ;;  %4326 = vmatmul.mubr.bf16.vlgmr.msra.gmra.mrb[44].mxu0 %v4058_v58 }
 0x9e5   :  { %5140 = vmatpush3.bf16.msra.mxu1 %v5751_v31  ;;  %5155 = vmatprep.mubr.msk.bf16.mxu1 %vm5897_vm2, %v5896_v56 }
 0x9e6   :  { %5141 = vmatprep.subr.bf16.mxu1 %v5896_v56 }
 0x9e9   :  { %5142 = vmatpush3.bf16.msra.mxu1 %v5752_v59 }
 0x9ea   :  { %5143 = vmatprep.subr.bf16.mxu1 %v5896_v56 }
 0x9ed   :  { %5144 = vmatpush3.bf16.msra.mxu1 %v5753_v60 }
 0x9ee   :  { %5145 = vmatprep.subr.bf16.mxu1 %v5896_v56 }
 0x9f1   :  { %5146 = vmatpush3.bf16.msra.mxu1 %v5754_v62 }
 0x9f2   :  { %5147 = vmatprep.subr.bf16.mxu1 %v5896_v56 }
 0x9f5   :  { %5148 = vmatpush3.bf16.msra.mxu1 %v5755_v63 }
 0x9f6   :  { %5149 = vmatprep.subr.bf16.mxu1 %v5896_v56 }
 0x9f9   :  { %5150 = vmatpush3.bf16.msra.mxu1 %v5756_v4 }
 0x9fa   :  { %5151 = vmatprep.subr.bf16.mxu1 %v5896_v56 }
 0x9fd   :  { %5152 = vmatpush3.bf16.msra.mxu1 %v5757_v5 }
 0x9fe   :  { %5153 = vmatprep.subr.bf16.mxu1 %v5896_v56 }
 0xa01   :  { %5154 = vmatpush3.bf16.msra.mxu1 %v5758_v6 }
 0xab7   :  { %v5102_v7 = vpop.f32.mrb[36].mxu1  ;;  %v5124_v8 = vpop.f32.mrb[44].mxu0 }
 0xab8   :  { %v5103_v10 = vpop.f32.mrb[37].mxu1  ;;  %v5125_v11 = vpop.f32.mrb[45].mxu0 }
 0xab9   :  { %v5104_v13 = vadd.f32 %v5103_v10, %v5102_v7  ;;  %v5126_v14 = vadd.f32 %v5125_v11, %v5124_v8  ;;  %v5105_v15 = vpop.f32.mrb[38].mxu1  ;;  %v5127_v16 = vpop.f32.mrb[46].mxu0 }
 0xaba   :  { %v5106_v17 = vpop.f32.mrb[39].mxu1  ;;  %v5128_v18 = vpop.f32.mrb[47].mxu0 }
 0xabb   :  { %v4288_v19 = vadd.f32 %v5104_v13, %v4060_v9 }
 0xabd   :  { %v4328_v20 = vadd.f32 %v5126_v14, %v4288_v19 }
 0xabf   :  { %v4333_v21 = vmax.f32 %v4328_v20, 0.0 }
 0xac1   :  { %v4350_v22 = vpack.c.bf16 %v4333_v21, %v4333_v21 }
 0xac3   :  { %5156 = vmatmul.mubr.bf16.vlgmr.msra.gmra.mrb[40].mxu1 %v4350_v22 }
 0xb96   :  { %v4434_v33 = vpop.f32.mrb[40].mxu1 }
 0xb97   :  { %v4435_v23 = vadd.f32 %v4434_v33, %v4351_v52  ;;  %v5157_v3 = vpop.f32.mrb[41].mxu1 }
 0xb98   :  { %v4437_v56 = vpop.f32.mrb[42].mxu1 }
 0xb99   :  { %4440 = vst [vmem:[#allocation10] sm:$0x3] %v4435_v23  ;;  %v5158_v55 = vpop.f32.mrb[43].mxu1 }
 0xb9a   :  { %5864 = shalt.err (!%p5861_p8)
}
 0xb9b   :  { %s5865_s25 = scalar_lea.hbm %s6597_s5, 32 }
 0xb9c   :  { %p5866_p9 = scmp.ne.s32.totalorder %s6597_s5, %s5865_s25  ;;  %p5869_p10 = scmp.lt.u32.totalorder %s5865_s25, %s6597_s5 }
 0xb9e   :  { %p5871_p11 = pnand %p5869_p10, %p5866_p9 }
 0xba0   :  { %5874 = shalt.err (!%p5871_p11)
}
 0xba1   :  { %4450 = dma.vmem_to_hbm [thread:$0]  %s4448_s21, 32, %s6597_s5, [#allocation4]  }
 0xba2   :  { %5881 = dma.done.wait [#allocation4], 32  }
 0xba3   :  { %5882 = vsyncadd [#allocation4], 4294967264 }
 0xba4   :  { %4454 = vsyncpa [#allocation3], 1 }
 0xba5   :  { %4455 = vsyncpa [#allocation6], 1 }
 0xba6   :  { %4456 = vsyncpa [#allocation9], 1 }
 0xba7   :  { %4457 = vsyncpa [#allocation4], 1 }

</bundles_post_ra>
